<compile_context>
chip_gen: v6e
topology: v6e:2x2x1
jax: 0.10.0
libtpu: 0.0.40
codegen_flags: <defaults>
</compile_context>

<pallas_src>
import functools

import jax
import jax.numpy as jnp
from jax.experimental import pallas as pl
from jax.experimental.pallas import tpu as pltpu


SSL_DIM = 1024       # SSLModel00.out_dim
FRAME_LEN = 64       # synthetic framing for the SSL stub
EMB_SIZE = 128       # args.emb_size (exactly one vreg lane width -> unmasked stores)
N_SSL_LAYERS = 3     # number of stub transformer layers feeding getAttenF
BN_EPS = 1e-5

_SELU_ALPHA = 1.6732632423543772848170429916717
_SELU_SCALE = 1.0507009873554804934193349852946


def _round_up(x, m):
    return ((x + m - 1) // m) * m


# -----------------------------------------------------------------------------
# Fused Pallas kernel:
#   y = SELU( (sum_l w_rows[:, l] * X[l]) @ W' + b' )
#   (BatchNorm2d(1) inference stats folded into W'/b' on the host.)
#
#   X      : (L, M, K) bf16   per-layer SSL features, streamed in tm-row tiles
#   w_rows : (M, L)    f32    per-(row, layer) sigmoid attention weights
#   W'     : (K, N)    bf16   VMEM-resident (constant block index -> fetched once)
#   b'     : (1, N)    f32
#   out    : (M, N)    bf16
#
# Grid = (cdiv(M, tm),), single "parallel" axis; no reduction grid, no scratch.
# Weighted sum done in f32 on the VPU, cast to bf16, one MXU matmul per tile.
# -----------------------------------------------------------------------------
def _fused_attn_ll_selu_kernel(x_ref, wr_ref, wm_ref, b_ref, o_ref):
    n_layers = x_ref.shape[0]
    acc = x_ref[0].astype(jnp.float32) * wr_ref[:, 0:1]
    for l in range(1, n_layers):
        acc = acc + x_ref[l].astype(jnp.float32) * wr_ref[:, l:l + 1]
    y = jnp.dot(acc.astype(jnp.bfloat16), wm_ref[...],
                preferred_element_type=jnp.float32)
    y = y + b_ref[...]
    # SELU; exp() argument clamped to <= 0 so the inactive branch never overflows.
    y = _SELU_SCALE * jnp.where(
        y > 0.0, y, _SELU_ALPHA * (jnp.exp(jnp.minimum(y, 0.0)) - 1.0)
    )
    o_ref[...] = y.astype(o_ref.dtype)


@functools.partial(jax.jit, static_argnames=("tm",))
def fused_attn_ll_bn_selu(layers_bf16, w_rows, w, b, bn, *, tm=1024):
    """Fused getAttenF weighted-sum + nn.Linear(1024, emb) + BatchNorm2d(1)
    (inference) + SELU.

    layers_bf16 : (L, M, K) bf16   per-layer SSL features (M = B*T rows)
    w_rows      : (M, L)    f32    per-row / per-layer sigmoid weights
    w           : (K, N)    f32    LL weight
    b           : (N,)      f32    LL bias
    bn          : (4,)      f32    [gamma, beta, running_mean, running_var]
    returns     : (M, N)    bf16
    """
    L, M, K = layers_bf16.shape
    N = w.shape[1]

    # Fold BatchNorm2d(1) (single channel -> scalar affine) into the linear.
    gamma, beta, mean, var = bn[0], bn[1], bn[2], bn[3]
    scale = gamma * jax.lax.rsqrt(var + BN_EPS)
    w_folded = (w * scale).astype(jnp.bfloat16)                        # bf16 MXU path
    b_folded = ((b - mean) * scale + beta).astype(jnp.float32).reshape(1, N)

    # Row tile: large for HBM-roofline efficiency, but shrunk so the single
    # "parallel" grid axis has >= 2 steps (lets v7x shard across both TCs).
    tm_eff = min(tm, max(8, _round_up((M + 1) // 2, 8)))
    grid = (pl.cdiv(M, tm_eff),)   # ragged last tile: Pallas masks the writeback

    cost = pl.CostEstimate(
        flops=2 * M * K * N + 2 * L * M * K,
        transcendentals=M * N,
        bytes_accessed=2 * L * M * K + 4 * M * L + 2 * K * N + 4 * N + 2 * M * N,
    )

    return pl.pallas_call(
        _fused_attn_ll_selu_kernel,
        out_shape=jax.ShapeDtypeStruct((M, N), jnp.bfloat16),
        grid_spec=pltpu.PrefetchScalarGridSpec(
            num_scalar_prefetch=0,
            grid=grid,
            in_specs=[
                pl.BlockSpec((L, tm_eff, K), lambda i: (0, i, 0)),  # layer tiles (streamed)
                pl.BlockSpec((tm_eff, L), lambda i: (i, 0)),        # per-row layer weights
                pl.BlockSpec((K, N), lambda i: (0, 0)),             # folded W, VMEM resident
                pl.BlockSpec((1, N), lambda i: (0, 0)),             # folded bias
            ],
            out_specs=pl.BlockSpec((tm_eff, N), lambda i: (i, 0)),
        ),
        compiler_params=pltpu.CompilerParams(
            dimension_semantics=("parallel",),
            vmem_limit_bytes=32 * 1024 * 1024,   # v5e default (16 MiB) is too small
        ),
        cost_estimate=cost,
    )(layers_bf16, w_rows, w_folded, b_folded)


def _fused_ref(layers_bf16, w_rows, w, b, bn):
    """Pure-JAX reference mirroring the kernel's bf16 casts."""
    gamma, beta, mean, var = bn[0], bn[1], bn[2], bn[3]
    scale = gamma * jax.lax.rsqrt(var + BN_EPS)
    wf = (w * scale).astype(jnp.bfloat16).astype(jnp.float32)
    bf = (b - mean) * scale + beta
    xw = jnp.einsum("lmk,ml->mk", layers_bf16.astype(jnp.float32), w_rows)
    y = xw.astype(jnp.bfloat16).astype(jnp.float32) @ wf + bf
    y = _SELU_SCALE * jnp.where(
        y > 0.0, y, _SELU_ALPHA * (jnp.exp(jnp.minimum(y, 0.0)) - 1.0)
    )
    return y.astype(jnp.bfloat16).astype(jnp.float32)


# -----------------------------------------------------------------------------
# Model parameters and forward (glue in plain JAX, fully jitted)
# -----------------------------------------------------------------------------
def init_params(key, emb_size=EMB_SIZE, n_layers=N_SSL_LAYERS):
    keys = jax.random.split(key, 8)
    # SSL stub: per-layer frame -> 1024 projection standing in for XLSR layers.
    w_ssl = jax.random.uniform(
        keys[0], (n_layers, FRAME_LEN, SSL_DIM), jnp.float32, -1.0, 1.0
    ) / jnp.sqrt(FRAME_LEN)
    # fc0 = nn.Linear(1024, 1); PyTorch default U(-1/sqrt(fan_in), 1/sqrt(fan_in))
    b0 = 1.0 / jnp.sqrt(SSL_DIM)
    w_fc0 = jax.random.uniform(keys[1], (SSL_DIM, 1), jnp.float32, -b0, b0)
    b_fc0 = jax.random.uniform(keys[2], (1,), jnp.float32, -b0, b0)
    # LL = nn.Linear(1024, emb_size)
    w_ll = jax.random.uniform(keys[3], (SSL_DIM, emb_size), jnp.float32, -b0, b0)
    b_ll = jax.random.uniform(keys[4], (emb_size,), jnp.float32, -b0, b0)
    # BatchNorm2d(1) defaults: gamma=1, beta=0, running_mean=0, running_var=1.
    bn = jnp.array([1.0, 0.0, 0.0, 1.0], jnp.float32)
    # MyConformer: class token ~ U[0,1); fc5 = nn.Linear(emb_size, 2)
    class_token = jax.random.uniform(keys[5], (1, emb_size), jnp.float32)
    b5 = 1.0 / jnp.sqrt(emb_size)
    w_fc5 = jax.random.uniform(keys[6], (emb_size, 2), jnp.float32, -b5, b5)
    b_fc5 = jax.random.uniform(keys[7], (2,), jnp.float32, -b5, b5)
    return dict(w_ssl=w_ssl, w_fc0=w_fc0, b_fc0=b_fc0, w_ll=w_ll, b_ll=b_ll,
                bn=bn, class_token=class_token, w_fc5=w_fc5, b_fc5=b_fc5)


@functools.partial(jax.jit, static_argnames=("return_embedding",))
def ml_xlsr_conformer_forward(x, params, return_embedding=False):
    """x: (B, num_samples, 1) raw audio, as in the PyTorch forward."""
    B = x.shape[0]
    audio = x[..., 0]                                          # x.squeeze(-1)
    T = audio.shape[1] // FRAME_LEN
    frames = audio[:, : T * FRAME_LEN].reshape(B, T, FRAME_LEN)

    # TODO(synk): SSLModel00.extract_feat needs the fairseq XLSR-300m checkpoint;
    # replaced by a deterministic per-layer linear frame embedding -> layer_results.
    # Written to HBM exactly once, in bf16 (the kernel's streaming dtype).
    layer_results = jnp.einsum(
        "btf,lfd->lbtd", frames, params["w_ssl"]
    ).astype(jnp.bfloat16)                                     # (L, B, T, C)

    # getAttenF pooled branch: per-layer temporal average pool -> fc0 -> sigmoid.
    pooled = jnp.transpose(
        jnp.mean(layer_results, axis=2, dtype=jnp.float32), (1, 0, 2)
    )                                                          # (B, L, C)
    y0 = jax.nn.sigmoid(pooled @ params["w_fc0"] + params["b_fc0"])   # (B, L, 1)

    # Per-(row, layer) weights for the fused kernel (rows ordered b*T + t).
    w_rows = jnp.repeat(y0[:, :, 0], T, axis=0)                # (B*T, L)
    layers_flat = layer_results.reshape(N_SSL_LAYERS, B * T, SSL_DIM)

    # Fused Pallas hot path: layer-weighted sum + LL + folded BN + SELU.
    emb_seq = fused_attn_ll_bn_selu(
        layers_flat, w_rows, params["w_ll"], params["b_ll"], params["bn"]
    ).reshape(B, T, EMB_SIZE)                                  # bf16

    # MyConformer: prepend class token, encoder blocks, class-token head.
    cls = jnp.broadcast_to(
        params["class_token"][None, :, :].astype(emb_seq.dtype), (B, 1, EMB_SIZE)
    )
    seq = jnp.concatenate([cls, emb_seq], axis=1)              # (B, T+1, emb)
    # TODO(synk): ConformerBlock encoder stack (class definition not provided).
    embedding = seq[:, 0, :].astype(jnp.float32)               # (B, emb)
    out = embedding @ params["w_fc5"] + params["b_fc5"]        # (B, 2)
    if return_embedding:
        return out, embedding
    return out


if __name__ == "__main__":
    key = jax.random.PRNGKey(0)
    pkey, xkey, tkey, wkey = jax.random.split(key, 4)
    params = init_params(pkey)

    # Kernel-level correctness check (ragged M, exercises the masked last tile).
    M_test = 300
    layers_t = jax.random.normal(
        tkey, (N_SSL_LAYERS, M_test, SSL_DIM), jnp.float32
    ).astype(jnp.bfloat16)
    w_rows_t = jax.random.uniform(wkey, (M_test, N_SSL_LAYERS), jnp.float32)
    got = fused_attn_ll_bn_selu(
        layers_t, w_rows_t, params["w_ll"], params["b_ll"], params["bn"]
    )
    got = jax.block_until_ready(got).astype(jnp.float32)
    ref = _fused_ref(layers_t, w_rows_t, params["w_ll"], params["b_ll"], params["bn"])
    assert got.shape == ref.shape
    rel_err = float(jnp.max(jnp.abs(got - ref)) / (jnp.max(jnp.abs(ref)) + 1e-6))
    assert rel_err < 3e-2, f"relative error too large: {rel_err}"

    # End-to-end forward at small shapes.
    B, T = 2, 16
    x = jax.random.normal(xkey, (B, T * FRAME_LEN, 1), jnp.float32)
    out = ml_xlsr_conformer_forward(x, params)
    out = jax.block_until_ready(out)
    assert out.shape == (B, 2)
    assert bool(jnp.all(jnp.isfinite(out)))
    print("KERNEL_OK")
</pallas_src>

<mosaic_0001>
module attributes {stable_mosaic.version = 11 : i64} {
  func.func @_fused_attn_ll_selu_kernel(%arg0: i32, %arg1: memref<3x152x1024xbf16, #tpu.memory_space<vmem>>, %arg2: memref<152x3xf32, #tpu.memory_space<vmem>>, %arg3: memref<1024x128xbf16, #tpu.memory_space<vmem>>, %arg4: memref<1x128xf32, #tpu.memory_space<vmem>>, %arg5: memref<152x128xbf16, #tpu.memory_space<vmem>>) attributes {dimension_semantics = [#tpu.dimension_semantics<parallel>], iteration_bounds = array<i64: 2>, scalar_prefetch = 0 : i64, scratch_operands = 0 : i64, tpu.core_type = #tpu.core_type<tc>, window_params = [{transform_indices = @transform_0, window_bounds = array<i64: 3, 152, 1024>}, {transform_indices = @transform_1, window_bounds = array<i64: 152, 3>}, {pipeline_mode = #tpu.pipeline_mode<synchronous>, transform_indices = @transform_2, window_bounds = array<i64: 1024, 128>}, {pipeline_mode = #tpu.pipeline_mode<synchronous>, transform_indices = @transform_3, window_bounds = array<i64: 1, 128>}, {transform_indices = @transform_4, window_bounds = array<i64: 152, 128>}]} {
    %c0 = arith.constant 0 : index
    %c0_0 = arith.constant 0 : index
    %c0_1 = arith.constant 0 : index
    %0 = vector.load %arg1[%c0, %c0_0, %c0_1] : memref<3x152x1024xbf16, #tpu.memory_space<vmem>>, vector<1x152x1024xbf16>
    %1 = vector.shape_cast %0 : vector<1x152x1024xbf16> to vector<152x1024xbf16>
    %2 = arith.extf %1 : vector<152x1024xbf16> to vector<152x1024xf32>
    %c0_2 = arith.constant 0 : index
    %c0_3 = arith.constant 0 : index
    %3 = vector.load %arg2[%c0_2, %c0_3] : memref<152x3xf32, #tpu.memory_space<vmem>>, vector<152x1xf32>
    %4 = vector.broadcast %3 : vector<152x1xf32> to vector<152x1024xf32>
    %5 = arith.mulf %2, %4 : vector<152x1024xf32>
    %c1 = arith.constant 1 : index
    %c0_4 = arith.constant 0 : index
    %c0_5 = arith.constant 0 : index
    %6 = vector.load %arg1[%c1, %c0_4, %c0_5] : memref<3x152x1024xbf16, #tpu.memory_space<vmem>>, vector<1x152x1024xbf16>
    %7 = vector.shape_cast %6 : vector<1x152x1024xbf16> to vector<152x1024xbf16>
    %8 = arith.extf %7 : vector<152x1024xbf16> to vector<152x1024xf32>
    %c0_6 = arith.constant 0 : index
    %c1_7 = arith.constant 1 : index
    %9 = vector.load %arg2[%c0_6, %c1_7] : memref<152x3xf32, #tpu.memory_space<vmem>>, vector<152x1xf32>
    %10 = vector.broadcast %9 : vector<152x1xf32> to vector<152x1024xf32>
    %11 = arith.mulf %8, %10 : vector<152x1024xf32>
    %12 = arith.addf %5, %11 : vector<152x1024xf32>
    %c2 = arith.constant 2 : index
    %c0_8 = arith.constant 0 : index
    %c0_9 = arith.constant 0 : index
    %13 = vector.load %arg1[%c2, %c0_8, %c0_9] : memref<3x152x1024xbf16, #tpu.memory_space<vmem>>, vector<1x152x1024xbf16>
    %14 = vector.shape_cast %13 : vector<1x152x1024xbf16> to vector<152x1024xbf16>
    %15 = arith.extf %14 : vector<152x1024xbf16> to vector<152x1024xf32>
    %c0_10 = arith.constant 0 : index
    %c2_11 = arith.constant 2 : index
    %16 = vector.load %arg2[%c0_10, %c2_11] : memref<152x3xf32, #tpu.memory_space<vmem>>, vector<152x1xf32>
    %17 = vector.broadcast %16 : vector<152x1xf32> to vector<152x1024xf32>
    %18 = arith.mulf %15, %17 : vector<152x1024xf32>
    %19 = arith.addf %12, %18 : vector<152x1024xf32>
    %20 = arith.truncf %19 : vector<152x1024xf32> to vector<152x1024xbf16>
    %c0_12 = arith.constant 0 : index
    %c0_13 = arith.constant 0 : index
    %21 = vector.load %arg3[%c0_12, %c0_13] : memref<1024x128xbf16, #tpu.memory_space<vmem>>, vector<1024x128xbf16>
    %cst = arith.constant dense<0.000000e+00> : vector<152x128xf32>
    %22 = tpu.matmul %20, %21, %cst {dimension_numbers = #tpu.dot_dimension_numbers<[1], [0], [0], [1], [0, 0, 1, 1], [], []>} : vector<152x1024xbf16>, vector<1024x128xbf16>, vector<152x128xf32> -> vector<152x128xf32>
    %c0_14 = arith.constant 0 : index
    %c0_15 = arith.constant 0 : index
    %23 = vector.load %arg4[%c0_14, %c0_15] : memref<1x128xf32, #tpu.memory_space<vmem>>, vector<1x128xf32>
    %24 = vector.broadcast %23 : vector<1x128xf32> to vector<152x128xf32>
    %25 = arith.addf %22, %24 : vector<152x128xf32>
    %cst_16 = arith.constant 0.000000e+00 : f32
    %26 = vector.broadcast %cst_16 : f32 to vector<152x128xf32>
    %27 = arith.cmpf ogt, %25, %26 : vector<152x128xf32>
    %cst_17 = arith.constant 0.000000e+00 : f32
    %28 = vector.broadcast %cst_17 : f32 to vector<152x128xf32>
    %29 = arith.minimumf %25, %28 : vector<152x128xf32>
    %30 = math.exp %29 : vector<152x128xf32>
    %cst_18 = arith.constant 1.000000e+00 : f32
    %31 = vector.broadcast %cst_18 : f32 to vector<152x128xf32>
    %32 = arith.subf %30, %31 : vector<152x128xf32>
    %cst_19 = arith.constant 1.67326319 : f32
    %33 = vector.broadcast %cst_19 : f32 to vector<152x128xf32>
    %34 = arith.mulf %33, %32 : vector<152x128xf32>
    %35 = arith.select %27, %25, %34 : vector<152x128xi1>, vector<152x128xf32>
    %cst_20 = arith.constant 1.05070102 : f32
    %36 = vector.broadcast %cst_20 : f32 to vector<152x128xf32>
    %37 = arith.mulf %36, %35 : vector<152x128xf32>
    %38 = arith.truncf %37 : vector<152x128xf32> to vector<152x128xbf16>
    %c0_21 = arith.constant 0 : index
    %c0_22 = arith.constant 0 : index
    %39 = vector.load %arg5[%c0_21, %c0_22] : memref<152x128xbf16, #tpu.memory_space<vmem>>, vector<152x128xbf16>
    tpu.vector_store %arg5[%c0_21, %c0_22], %38 {strides = array<i32>} : memref<152x128xbf16, #tpu.memory_space<vmem>>, vector<152x128xbf16>,
    return
  }
  func.func @transform_0(%arg0: i32) -> (i32, i32, i32) {
    %c0_i32 = arith.constant 0 : i32
    %c0_i32_0 = arith.constant 0 : i32
    %c0_i32_1 = arith.constant 0 : i32
    return %c0_i32, %arg0, %c0_i32_0 : i32, i32, i32
  }
  func.func @transform_1(%arg0: i32) -> (i32, i32) {
    %c0_i32 = arith.constant 0 : i32
    %c0_i32_0 = arith.constant 0 : i32
    return %arg0, %c0_i32 : i32, i32
  }
  func.func @transform_2(%arg0: i32) -> (i32, i32) {
    %c0_i32 = arith.constant 0 : i32
    %c0_i32_0 = arith.constant 0 : i32
    %c0_i32_1 = arith.constant 0 : i32
    return %c0_i32, %c0_i32_0 : i32, i32
  }
  func.func @transform_3(%arg0: i32) -> (i32, i32) {
    %c0_i32 = arith.constant 0 : i32
    %c0_i32_0 = arith.constant 0 : i32
    %c0_i32_1 = arith.constant 0 : i32
    return %c0_i32, %c0_i32_0 : i32, i32
  }
  func.func @transform_4(%arg0: i32) -> (i32, i32) {
    %c0_i32 = arith.constant 0 : i32
    %c0_i32_0 = arith.constant 0 : i32
    return %arg0, %c0_i32 : i32, i32
  }
}

</mosaic_0001>

<bundles_post_ra>
// kernel: fused_attn_ll_bn_selu.1
= control target key start
LH: loop header
LB: loop body
LE: loop exit
PB: predicated region body
PF: predicated region fallthrough
CT: control target
= control target key end

     0   :  { %9 = vsyncpa [#allocation3], 0  ;;  %s7698_s0 = inlined_call_operand.hbm [shape: bf16[3,300,1024], index: 0, kind: input, shape index: {}]   ;;  %s7699_s1 = inlined_call_operand.vmem [shape: f32[300,3], index: 1, kind: input, shape index: {}]   ;;  %s7700_s2 = inlined_call_operand.vmem [shape: bf16[1024,128], index: 2, kind: input, shape index: {}]   ;;  %s7701_s3 = inlined_call_operand.vmem [shape: f32[1,128], index: 3, kind: input, shape index: {}]   ;;  %s7702_s4 = inlined_call_operand.hbm [shape: bf16[300,128], index: 4, kind: output, shape index: {}]  }
   0x1   :  { %11 = vsyncpa [#allocation3 + $0x1], 0 }
   0x2   :  { %12 = vsyncpa [#allocation4], 0 }
   0x3   :  { %14 = vsyncpa [#allocation4 + $0x1], 0  ;;  %s4324_s15 = smov 0   ;;  %s4326_s16 = smov 0  }
   0x4   :  { %s4328_s17 = smov 0   ;;  %s4330_s18 = smov 0  }
   0x5 LB: > { %s4345_s19 = sadd.s32 4294967295, %s4285_s18   ;;  %s3373_s20 = sadd.s32 4294967294, %s4285_s18   ;;  %s4285_s18 = sphi %s4330_s18, %s8701_s18   ;;  %s4281_s17 = sphi %s4328_s17, %s8700_s17   ;;  %s4277_s16 = sphi %s4326_s16, %s8699_s16   ;;  %s4273_s15 = sphi %s4324_s15, %s8698_s15  }
   0x6   : > { %s4349_s21 = sadd.s32 1, %s4285_s18   ;;  %s27_s22 = sadd.s32 1, %s4281_s17 }
   0x7   : > { %s24_s23 = ssub.s32 %s4285_s18, %s4349_s21  ;;  %p34_p0 = scmp.ne.s32.totalorder %s4281_s17, %s4277_s16 }
   0x8   : > { %p25_p1 = scmp.eq.s32.totalorder %s24_s23, 0  ;;  %p35_p2 = scmp.eq.s32.totalorder %s4285_s18, 0 }
   0x9   : > { %p40_p3 = scmp.ne.s32.totalorder %s4277_s16, %s4273_s15  ;;  %p41_p4 = scmp.eq.s32.totalorder %s4345_s19, 0 }
   0xa   : > { %s4361_s24 = scalar_select %p25_p1, %s4281_s17, %s27_s22  }
   0xb   : > { %p4363_p5 = por %p35_p2, %p34_p0  ;;  %p4367_p6 = por %p41_p4, %p40_p3 }
   0xc   : > { %p132_p7 = scmp.eq.s32.totalorder %s4345_s19, 1  ;;  %p138_p8 = scmp.eq.s32.totalorder %s3373_s20, 1 }
   0xd   : > { %p3375_p11 = scmp.ge.s32.totalorder %s4285_s18, 2 }
   0xe   : > { %p4372_p9 = por %p132_p7, %p34_p0  ;;  %p4376_p10 = por %p138_p8, %p40_p3 }
   0xf   : > { %160 = sbr.rel (%p3375_p11) target bundleno = 34 (0x22), region = 24 }
  0x14   : > { %s164_s29 = sand.u32 1, %s4281_s17   ;;  %s3707_s30 = smul.u32 9728, %s4285_s18 }
  0x15   : > { %s4020_s5 = smul.u32 1824, %s164_s29  ;;  %s4287_s6 = smov 19456  }
  0x16   : > { %4024 = sst [smem:[#allocation7]] (%p4363_p5), %s4287_s6  ;;  %s175_s10 = scalar_lea.hbm %s7698_s0, %s3707_s30 }
  0x17   : > { %s4023_s7 = scalar_select %p4363_p5, [#allocation0], [#allocation8] }
  0x18   : > { %s168_s12 = scalar_lea.vmem [#allocation2], %s4020_s5  ;;  %s4288_s14 = smov 9728  }
  0x19   : > { %s180_s11 = sld [smem:[%s4023_s7]]   ;;  %s188_s13 = sshll.u32 %s168_s12, 4  ;;  %s189_s13 = int_to_ptr.vmem [resolvable:$true] %s188_s13 }
  0x1a   : > { %4025 = sst [smem:[#allocation7 + $0x1]] (%p4363_p5), %s4288_s14  ;;  %s4289_s20 = smov 19  }
  0x1b   : > { %4026 = sst [smem:[#allocation7 + $0x2]] (%p4363_p5), %s4289_s20  ;;  %s4290_s22 = smov 512  }
  0x1c   : > { %4027 = sst [smem:[#allocation7 + $0x3]] (%p4363_p5), %s4290_s22  ;;  %s4291_s23 = smov 32  }
  0x1d   : > { %4028 = sst [smem:[#allocation7 + $0x4]] (%p4363_p5), %s4290_s22  ;;  %s165_s5 = scalar_lea.sflag [#allocation3], %s164_s29 }
  0x1e   : > { %4029 = sst [smem:[#allocation7 + $0x5]] (%p4363_p5), %s4291_s23  ;;  %s4292_s7 = smov 131072  }
  0x1f   : > { %s3378_s30 = sshll.u32 %s180_s11, 26 }
  0x20   : > { %s3379_s6 = sadd.s32 134217728, %s3378_s30 }
  0x21   : > { %4030 = dma.general (%p4363_p5), %s175_s10, 29184, %s189_s13, %s165_s5, %s4292_s7, [#allocation7], %s3379_s6, 0  }
  0x22 PF: > { %p3380_p12 = scmp.ge.s32.totalorder %s4285_s18, 1  ;;  %p218_p13 = scmp.lt.s32.totalorder %s4285_s18, 3 }
  0x24   : > { %p219_p0 = pnand %p3380_p12, %p218_p13 }
  0x26   : > { %222 = sbr.rel (%p219_p0) target bundleno = 759 (0x2f7), region = 36 }
  0x2b   : > { %s4407_s8 = sand.u32 1, %s4277_s16  }
  0x2c   : > { %s4021_s9 = smul.u32 1824, %s4407_s8  ;;  %s225_s11 = scalar_lea.sflag [#allocation3], %s4407_s8 }
  0x2e   : > { %s4411_s12 = scalar_lea.vmem [#allocation2], %s4021_s9 }
  0x2f   : > { %4264 = dma.done.wait (%p4367_p6), %s225_s11, 29184  }
  0x30   : > { %4266 = vsyncadd (%p4367_p6), %s225_s11, 4294938112  ;;  %s259_s25 = smul.u32 19, %s4345_s19  ;;  %v7705_v0 = vmov 2   ;;  %v7707_v1 = vmov 1   ;;  %v4117_v2 = vld [vmem:[%s7700_s2 + $0x78] sm:$0xff]   ;;  %v4121_v10 = vld [vmem:[%s7700_s2 + $0x70] sm:$0xff]  }
  0x31   : > { %4083 = vset.pattern.permute.xlu0 %v7705_v0  ;;  %4082 = vset.pattern.permute.xlu1 %v7707_v1  ;;  %v4118_v7 = vld [vmem:[%s7700_s2 + $0xf8] sm:$0xff]   ;;  %v4122_v11 = vld [vmem:[%s7700_s2 + $0xf0] sm:$0xff]   ;;  %v4125_v14 = vld [vmem:[%s7700_s2 + $0x68] sm:$0xff]   ;;  %v7703_v15 = vmov 0   ;;  %s3661_s26 = smul.u32 1216, %s4345_s19  ;;  %s3275_s7 = scalar_lea.sflag [#allocation4], %s4407_s8 }
  0x32   : > { %p260_p1 = scmp.lt.s32.totalorder %s259_s25, 37  ;;  %3716 = vmatprep.subr.bf16.mxu0 %v4117_v2  ;;  %v4119_v8 = vld [vmem:[%s7700_s2 + $0x38] sm:$0xff]   ;;  %3792 = vmatprep.subr.bf16.mxu1 %v4118_v7  ;;  %v4123_v12 = vld [vmem:[%s7700_s2 + $0x30] sm:$0xff]   ;;  %v4126_v16 = vld [vmem:[%s7700_s2 + $0xe8] sm:$0xff]   ;;  %s4296_s19 = smov [#allocation5]  }
  0x33   : > { %v4120_v9 = vld [vmem:[%s7700_s2 + $0xb8] sm:$0xff]   ;;  %3717 = vmatpush3.bf16.msra.mxu0 %v4119_v8  ;;  %v4124_v13 = vld [vmem:[%s7700_s2 + $0xb0] sm:$0xff]   ;;  %v4127_v17 = vld [vmem:[%s7700_s2 + $0x28] sm:$0xff]   ;;  %s7652_s5 = scalar_lea.hbm %s7702_s4, %s3661_s26  ;;  %s4225_s11 = sshll.u32 %s4296_s19, 4  ;;  %s4226_s11 = int_to_ptr.vmem [resolvable:$false] %s4225_s11 }
  0x34   : > { %s8703_s25 = smov (!%p260_p1, %s259_s25), 37  ;;  %3793 = vmatpush3.bf16.msra.mxu1 %v4120_v9  ;;  %3718 = vmatprep.subr.bf16.mxu0 %v4121_v10  ;;  %v4128_v18 = vld [vmem:[%s7700_s2 + $0xa8] sm:$0xff]   ;;  %v4129_v19 = vld [vmem:[%s7700_s2 + $0x60] sm:$0xff]   ;;  %v4133_v24 = vld [vmem:[%s7700_s2 + $0x58] sm:$0xff]  }
  0x35   : > { %s3381_s29 = sshll.u32 %s8703_s25, 3  ;;  %3794 = vmatprep.subr.bf16.mxu1 %v4122_v11  ;;  %v4130_v21 = vld [vmem:[%s7700_s2 + $0xe0] sm:$0xff]   ;;  %v4134_v26 = vld [vmem:[%s7700_s2 + $0xd8] sm:$0xff]   ;;  %v4137_v30 = vld [vmem:[%s7700_s2 + $0x50] sm:$0xff]  }
  0x36   : > { %s4423_s14 = scalar_lea.vmem %s7699_s1, %s3381_s29  ;;  %v4131_v22 = vld [vmem:[%s7700_s2 + $0x20] sm:$0xff]   ;;  %v4135_v27 = vld [vmem:[%s7700_s2 + $0x18] sm:$0xff]   ;;  %v4138_v31 = vld [vmem:[%s7700_s2 + $0xd0] sm:$0xff]  }
  0x37   : > { %v495_v3 = vld [vmem:[%s4423_s14] sm:$0xff]  ;;  %v497_v4 = vld [vmem:[%s4423_s14 + $0x10] sm:$0xff]  ;;  %v496_v5 = vld [vmem:[%s4423_s14 + $0x8] sm:$0xff]  ;;  %3719 = vmatpush3.bf16.msra.mxu0 %v4123_v12 }
  0x38   : > { %1600 = vperm.xlu0 %4083, %v495_v3   ;;  %991 = vperm.xlu1 %4082, %v495_v3   ;;  %v4432_v6 = vld [vmem:[%s4423_s14 + $0x20] sm:$0xff]  ;;  %v498_v20 = vld [vmem:[%s4423_s14 + $0x18] sm:$0xff]  ;;  %v500_v25 = vld [vmem:[%s4423_s14 + $0x28] sm:$0xff] }
  0x39   : > { %3795 = vmatpush3.bf16.msra.mxu1 %v4124_v13  ;;  %3720 = vmatprep.subr.bf16.mxu0 %v4125_v14  ;;  %v4132_v23 = vld [vmem:[%s7700_s2 + $0xa0] sm:$0xff]   ;;  %v4136_v28 = vld [vmem:[%s7700_s2 + $0x98] sm:$0xff]   ;;  %v4139_v32 = vld [vmem:[%s7700_s2 + $0x10] sm:$0xff]  }
  0x3a   : > { %3796 = vmatprep.subr.bf16.mxu1 %v4126_v16  ;;  %v4499_v29 = vld [vmem:[%s4423_s14 + $0x38] sm:$0xff]  ;;  %v4140_v33 = vld [vmem:[%s7700_s2 + $0x90] sm:$0xff]   ;;  %v4515_v34 = vld [vmem:[%s4423_s14 + $0x48] sm:$0xff] }
  0x3b   : > { %3721 = vmatpush3.bf16.msra.mxu0 %v4127_v17  ;;  %v4141_v35 = vld [vmem:[%s7700_s2 + $0x48] sm:$0xff]   ;;  %v4532_v39 = vld [vmem:[%s4423_s14 + $0x58] sm:$0xff]  ;;  %v4145_v40 = vld [vmem:[%s7700_s2 + $0x40] sm:$0xff]  }
  0x3c   : > { %1608 = vperm.xlu0 %4083, %v497_v4   ;;  %995 = vperm.xlu1 %4082, %v496_v5   ;;  %v4142_v36 = vld [vmem:[%s7700_s2 + $0xc8] sm:$0xff]   ;;  %v4146_v41 = vld [vmem:[%s7700_s2 + $0xc0] sm:$0xff]   ;;  %v501_v44 = vld [vmem:[%s4423_s14 + $0x30] sm:$0xff] }
  0x3d   : > { %3722 = vmatprep.subr.bf16.mxu0 %v4129_v19  ;;  %3797 = vmatpush3.bf16.msra.mxu1 %v4128_v18  ;;  %v4143_v37 = vld [vmem:[%s7700_s2 + $0x8] sm:$0xff]   ;;  %v4147_v42 = vld [vmem:[%s7700_s2] sm:$0xff]   ;;  %v4559_v46 = vld [vmem:[%s4423_s14 + $0x50] sm:$0xff] }
  0x3e   : > { %3798 = vmatprep.subr.bf16.mxu1 %v4130_v21  ;;  %v4144_v38 = vld [vmem:[%s7700_s2 + $0x88] sm:$0xff]   ;;  %v4148_v43 = vld [vmem:[%s7700_s2 + $0x80] sm:$0xff]   ;;  %v4567_v48 = vld [vmem:[%s4423_s14 + $0x70] sm:$0xff] }
  0x3f   : > { %3723 = vmatpush3.bf16.msra.mxu0 %v4131_v22  ;;  %v4554_v45 = vld [vmem:[%s4423_s14 + $0x40] sm:$0xff]  ;;  %v4573_v49 = vld [vmem:[%s4423_s14 + $0x68] sm:$0xff]  ;;  %v4578_v50 = vld [vmem:[%s4423_s14 + $0x78] sm:$0xff] }
  0x40   : > { %1616 = vperm.xlu0 %4083, %v4432_v6   ;;  %4084 = vset.pattern.permute.xlu1 %v7705_v0  ;;  %v4564_v47 = vld [vmem:[%s4423_s14 + $0x60] sm:$0xff]  ;;  %v512_v55 = vld [vmem:[%s4423_s14 + $0x88] sm:$0xff]  ;;  %v4848_v17 = vld [vmem:[%s4411_s12 + $0x30] sm:$0xff] }
  0x41   : > { %1604 = vperm.xlu1 %4084, %v496_v5   ;;  %3724 = vmatprep.subr.bf16.mxu0 %v4133_v24  ;;  %v4582_v51 = vld [vmem:[%s4411_s12] sm:$0xff]  ;;  %v4604_v58 = vld [vmem:[%s4411_s12 + $0x8] sm:$0xff]  ;;  %8038 = vst [vmem:[#allocation40_spill] sm:$0xff] %v4848_v17 }
  0x42   : > { %3799 = vmatpush3.bf16.msra.mxu1 %v4132_v23  ;;  %v4585_v52 = vld [vmem:[%s4411_s12 + $0x20] sm:$0xff]  ;;  %v4607_v59 = vld [vmem:[%s4411_s12 + $0x28] sm:$0xff] }
  0x43   : > { %3800 = vmatprep.subr.bf16.mxu1 %v4134_v26  ;;  %3725 = vmatpush3.bf16.msra.mxu0 %v4135_v27  ;;  %v4589_v53 = vld [vmem:[%s4411_s12 + $0x260] sm:$0xff]  ;;  %v4610_v60 = vld [vmem:[%s4411_s12 + $0x268] sm:$0xff] }
  0x44   : > { %4090 = vset.pattern.permute.xlu0 %v7703_v15  ;;  %3726 = vmatprep.subr.bf16.mxu0 %v4137_v30  ;;  %v4592_v54 = vld [vmem:[%s4411_s12 + $0x280] sm:$0xff]  ;;  %v4613_v61 = vld [vmem:[%s4411_s12 + $0x288] sm:$0xff] }
  0x45   : > { %516 = vperm.xlu0 %4090, %v495_v3   ;;  %4085 = vset.pattern.permute.xlu1 %v7703_v15  ;;  %v4597_v56 = vld [vmem:[%s4411_s12 + $0x4c0] sm:$0xff]  ;;  %v4654_v21 = vld [vmem:[%s4411_s12 + $0x48] sm:$0xff]  ;;  %v513_v3 = vld [vmem:[%s4423_s14 + $0x90] sm:$0xff] }
  0x46   : > { %526 = vperm.xlu1 %4085, %v497_v4   ;;  %3801 = vmatpush3.bf16.msra.mxu1 %v4136_v28  ;;  %v4600_v57 = vld [vmem:[%s4411_s12 + $0x4e0] sm:$0xff]  ;;  %v4657_v22 = vld [vmem:[%s4411_s12 + $0x68] sm:$0xff] }
  0x47   : > { %3802 = vmatprep.subr.bf16.mxu1 %v4138_v31  ;;  %3727 = vmatpush3.bf16.msra.mxu0 %v4139_v32  ;;  %v4631_v10 = vld [vmem:[%s4411_s12 + $0x40] sm:$0xff]  ;;  %v4664_v27 = vld [vmem:[%s4411_s12 + $0x2a8] sm:$0xff] }
  0x48   : > { %3728 = vmatprep.subr.bf16.mxu0 %v4141_v35  ;;  %v4634_v11 = vld [vmem:[%s4411_s12 + $0x60] sm:$0xff]  ;;  %v4667_v28 = vld [vmem:[%s4411_s12 + $0x2c8] sm:$0xff] }
  0x49   : > { %521 = vperm.xlu0 %4090, %v496_v5   ;;  %v4623_v5 = vld [vmem:[%s4411_s12 + $0x4e8] sm:$0xff]  ;;  %v4637_v12 = vld [vmem:[%s4411_s12 + $0x2a0] sm:$0xff]  ;;  %8011 = vst [vmem:[#allocation13_spill] sm:$0xff] %v4667_v28 }
  0x4a   : > { %4086 = vset.pattern.permute.xlu1 %v7707_v1  ;;  %3803 = vmatpush3.bf16.msra.mxu1 %v4140_v33  ;;  %v4640_v13 = vld [vmem:[%s4411_s12 + $0x2c0] sm:$0xff]  ;;  %v4748_v62 = vld [vmem:[%s4411_s12 + $0x548] sm:$0xff] }
  0x4b   : > { %999 = vperm.xlu1 %4086, %v497_v4   ;;  %3804 = vmatprep.subr.bf16.mxu1 %v4142_v36  ;;  %v4620_v4 = vld [vmem:[%s4411_s12 + $0x4c8] sm:$0xff]  ;;  %8009 = vst [vmem:[#allocation11_spill] sm:$0xff] %v4640_v13  ;;  %v4648_v19 = vld [vmem:[%s4411_s12 + $0x500] sm:$0xff] }
  0x4c   : > { %3729 = vmatpush3.bf16.msra.mxu0 %v4143_v37  ;;  %v4704_v23 = vld [vmem:[%s4411_s12 + $0x80] sm:$0xff]  ;;  %v4736_v37 = vld [vmem:[%s4411_s12 + $0x2e8] sm:$0xff] }
  0x4d   : > { %531 = vperm.xlu0 %4090, %v498_v20   ;;  %3730 = vmatprep.subr.bf16.mxu0 %v4145_v40  ;;  %v4681_v40 = vld [vmem:[%s4411_s12 + $0x528] sm:$0xff]  ;;  %8013 = vst [vmem:[#allocation15_spill] sm:$0xff] %v4704_v23  ;;  %v4707_v2 = vld [vmem:[%s4411_s12 + $0xa0] sm:$0xff]  ;;  %8020 = vst [vmem:[#allocation22_spill] sm:$0xff] %v4736_v37 }
  0x4e   : > { %3805 = vmatpush3.bf16.msra.mxu1 %v4144_v38  ;;  %v4678_v38 = vld [vmem:[%s4411_s12 + $0x508] sm:$0xff]  ;;  %8012 = vst [vmem:[#allocation14_spill] sm:$0xff] %v4681_v40  ;;  %8014 = vst [vmem:[#allocation16_spill] sm:$0xff] %v4707_v2  ;;  %v4710_v26 = vld [vmem:[%s4411_s12 + $0x2e0] sm:$0xff] }
  0x4f   : > { %1003 = vperm.xlu1 %4086, %v498_v20   ;;  %3806 = vmatprep.subr.bf16.mxu1 %v4146_v41  ;;  %v4685_v41 = vld [vmem:[%s4423_s14 + $0x80] sm:$0xff]  ;;  %8015 = vst [vmem:[#allocation17_spill] sm:$0xff] %v4710_v26  ;;  %v4774_v31 = vld [vmem:[%s4411_s12 + $0xc8] sm:$0xff]  ;;  %v4964_v26 = vld [vmem:[%s4411_s12 + $0x50] sm:$0xff] }
  0x50   : > { %3731 = vmatpush3.bf16.msra.mxu0 %v4147_v42  ;;  %v4717_v24 = vld [vmem:[%s4411_s12 + $0x300] sm:$0xff]  ;;  %8024 = vst [vmem:[#allocation26_spill] sm:$0xff] %v4774_v31  ;;  %v4785_v9 = vld [vmem:[%s4411_s12 + $0x328] sm:$0xff]  ;;  %8052 = vst [vmem:[#allocation53_spill] sm:$0xff] %v4964_v26 }
  0x51   : > { %541 = vperm.xlu0 %4090, %v500_v25   ;;  %8016 = vst [vmem:[#allocation18_spill] sm:$0xff] %v4717_v24  ;;  %v4720_v42 = vld [vmem:[%s4411_s12 + $0x540] sm:$0xff]  ;;  %8026 = vst [vmem:[#allocation28_spill] sm:$0xff] %v4785_v9  ;;  %v4796_v36 = vld [vmem:[%s4411_s12 + $0x588] sm:$0xff] }
  0x52   : > { %3807 = vmatpush3.bf16.msra.mxu1 %v4148_v43  ;;  %v4723_v63 = vld [vmem:[%s4411_s12 + $0x560] sm:$0xff]  ;;  %v4745_v43 = vld [vmem:[%s4411_s12 + $0x308] sm:$0xff]  ;;  %8028 = vst [vmem:[#allocation30_spill] sm:$0xff] %v4796_v36  ;;  %v4947_v36 = vld [vmem:[%s4411_s12 + $0x4f8] sm:$0xff] }
  0x53   : > { %4087 = vset.pattern.permute.xlu1 %v7705_v0  ;;  %8017 = vst [vmem:[#allocation19_spill] sm:$0xff] %v4723_v63  ;;  %8021 = vst [vmem:[#allocation23_spill] sm:$0xff] %v4745_v43  ;;  %v4782_v8 = vld [vmem:[%s4411_s12 + $0x320] sm:$0xff]  ;;  %v4813_v35 = vld [vmem:[%s4411_s12 + $0x348] sm:$0xff] }
  0x54   : > { %1612 = vperm.xlu1 %4087, %v498_v20   ;;  %v4651_v20 = vld [vmem:[%s4411_s12 + $0x520] sm:$0xff]  ;;  %8025 = vst [vmem:[#allocation27_spill] sm:$0xff] %v4782_v8  ;;  %8032 = vst [vmem:[#allocation34_spill] sm:$0xff] %v4813_v35  ;;  %v4824_v33 = vld [vmem:[%s4411_s12 + $0x5a8] sm:$0xff]  ;;  %v8041_v8 = vmov 1  }
  0x55   : > { %551 = vperm.xlu0 %4090, %v4499_v29   ;;  %8010 = vst [vmem:[#allocation12_spill] sm:$0xff] %v4651_v20  ;;  %v4793_v18 = vld [vmem:[%s4411_s12 + $0x580] sm:$0xff]  ;;  %8034 = vst [vmem:[#allocation36_spill] sm:$0xff] %v4824_v33  ;;  %v4875_v16 = vld [vmem:[%s4411_s12 + $0x5c8] sm:$0xff]  ;;  %v8055_v33 = vmov 2  }
  0x56   : > { %8027 = vst [vmem:[#allocation29_spill] sm:$0xff] %v4793_v18  ;;  %v4799_v32 = vld [vmem:[%s4411_s12 + $0xe0] sm:$0xff]  ;;  %8043 = vst [vmem:[#allocation44_spill] sm:$0xff] %v4875_v16  ;;  %v4151_v63 = vld [vmem:[%s7700_s2 + $0x1f8] sm:$0xff]  }
  0x57   : > { %8029 = vst [vmem:[#allocation31_spill] sm:$0xff] %v4799_v32  ;;  %v4803_v14 = vld [vmem:[%s4411_s12 + $0x340] sm:$0xff]  ;;  %v4937_v16 = vld [vmem:[%s4411_s12 + $0x298] sm:$0xff]  ;;  %v4953_v43 = vld [vmem:[%s4411_s12 + $0x5e8] sm:$0xff]  ;;  %3944 = vmatprep.subr.bf16.mxu1 %v4151_v63 }
  0x58   : > { %4088 = vset.pattern.permute.xlu1 %v7703_v15  ;;  %8030 = vst [vmem:[#allocation32_spill] sm:$0xff] %v4803_v14  ;;  %v4820_v7 = vld [vmem:[%s4411_s12 + $0x5a0] sm:$0xff]  ;;  %v4858_v14 = vld [vmem:[%s4411_s12 + $0x368] sm:$0xff]  ;;  %8051 = vst [vmem:[#allocation52_spill] sm:$0xff] %v4953_v43 }
  0x59   : > { %536 = vperm.xlu1 %4088, %v4432_v6   ;;  %561 = vperm.xlu0 %4090, %v4515_v34   ;;  %8033 = vst [vmem:[#allocation35_spill] sm:$0xff] %v4820_v7  ;;  %v4855_v30 = vld [vmem:[%s4411_s12 + $0x360] sm:$0xff]  ;;  %8040 = vst [vmem:[#allocation42_spill] sm:$0xff] %v4858_v14  ;;  %v4907_v14 = vld [vmem:[%s4411_s12 + $0x388] sm:$0xff] }
  0x5a   : > { %8039 = vst [vmem:[#allocation41_spill] sm:$0xff] %v4855_v30  ;;  %v4872_v9 = vld [vmem:[%s4411_s12 + $0x5c0] sm:$0xff]  ;;  %8047 = vst [vmem:[#allocation48_spill] sm:$0xff] %v4907_v14  ;;  %v4923_v30 = vld [vmem:[%s4411_s12 + $0x278] sm:$0xff] }
  0x5b   : > { %8042 = vst [vmem:[#allocation43_spill] sm:$0xff] %v4872_v9  ;;  %v4893_v35 = vld [vmem:[%s4411_s12 + $0x120] sm:$0xff]  ;;  %v4944_v7 = vld [vmem:[%s4411_s12 + $0x4d8] sm:$0xff]  ;;  %v4967_v63 = vld [vmem:[%s4411_s12 + $0x2b0] sm:$0xff] }
  0x5c   : > { %8044 = vst [vmem:[#allocation45_spill] sm:$0xff] %v4893_v35  ;;  %v4896_v31 = vld [vmem:[%s4411_s12 + $0x380] sm:$0xff]  ;;  %8053 = vst [vmem:[#allocation54_spill] sm:$0xff] %v4967_v63  ;;  %v4977_v9 = vld [vmem:[%s4411_s12 + $0x148] sm:$0xff] }
  0x5d   : > { %4089 = vset.pattern.permute.xlu1 %v7707_v1  ;;  %571 = vperm.xlu0 %4090, %v4532_v39   ;;  %8045 = vst [vmem:[#allocation46_spill] sm:$0xff] %v4896_v31  ;;  %v4950_v18 = vld [vmem:[%s4411_s12 + $0x5e0] sm:$0xff]  ;;  %8057 = vst [vmem:[#allocation57_spill] sm:$0xff] %v4977_v9  ;;  %v4984_v14 = vld [vmem:[%s4411_s12 + $0x510] sm:$0xff] }
  0x5e   : > { %1007 = vperm.xlu1 %4089, %v4432_v6   ;;  %v4806_v6 = vld [vmem:[%s4411_s12 + $0xe8] sm:$0xff]  ;;  %8050 = vst [vmem:[#allocation51_spill] sm:$0xff] %v4950_v18  ;;  %v4974_v17 = vld [vmem:[%s4411_s12 + $0x140] sm:$0xff]  ;;  %8058 = vst [vmem:[#allocation58_spill] sm:$0xff] %v4984_v14 }
  0x5f   : > { %8031 = vst [vmem:[#allocation33_spill] sm:$0xff] %v4806_v6  ;;  %8056 = vst [vmem:[#allocation56_spill] sm:$0xff] %v4974_v17  ;;  %v4992_v37 = vld [vmem:[%s4411_s12 + $0x70] sm:$0xff]  ;;  %v4998_v31 = vld [vmem:[%s4411_s12 + $0x78] sm:$0xff] }
  0x60   : > { %8059 = vst [vmem:[#allocation59_spill] sm:$0xff] %v4992_v37  ;;  %v4995_v24 = vld [vmem:[%s4411_s12 + $0x2d0] sm:$0xff]  ;;  %8061 = vst [vmem:[#allocation61_spill] sm:$0xff] %v4998_v31  ;;  %v5001_v35 = vld [vmem:[%s4411_s12 + $0x160] sm:$0xff] }
  0x61   : > { %4099 = vset.pattern.permute.xlu0 %v7705_v0  ;;  %8060 = vst [vmem:[#allocation60_spill] sm:$0xff] %v4995_v24  ;;  %v5030_v26 = vld [vmem:[%s4411_s12 + $0x530] sm:$0xff]  ;;  %v5036_v6 = vld [vmem:[%s4411_s12 + $0x600] sm:$0xff]  ;;  %v5040_v40 = vld [vmem:[%s4411_s12 + $0x608] sm:$0xff] }
  0x62   : > { %1011 = vperm.xlu1 %4089, %v500_v25   ;;  %1624 = vperm.xlu0 %4099, %v501_v44   ;;  %8066 = vst [vmem:[#allocation66_spill] sm:$0xff] %v5030_v26  ;;  %v5043_v32 = vld [vmem:[%s4411_s12 + $0x2d8] sm:$0xff]  ;;  %v5049_v23 = vld [vmem:[%s4411_s12 + $0x3c0] sm:$0xff]  ;;  %v5056_v2 = vld [vmem:[%s4411_s12 + $0x3c8] sm:$0xff] }
  0x63   : > { %8068 = vst [vmem:[#allocation67_spill] sm:$0xff] %v5043_v32  ;;  %8069 = vst [vmem:[#allocation68_spill] sm:$0xff] %v5049_v23  ;;  %v5063_v13 = vld [vmem:[%s4411_s12 + $0x620] sm:$0xff]  ;;  %v5069_v20 = vld [vmem:[%s4411_s12 + $0x538] sm:$0xff] }
  0x64   : > { %8070 = vst [vmem:[#allocation69_spill] sm:$0xff] %v5056_v2  ;;  %8071 = vst [vmem:[#allocation70_spill] sm:$0xff] %v5063_v13  ;;  %v5084_v43 = vld [vmem:[%s4411_s12 + $0x180] sm:$0xff]  ;;  %v5090_v28 = vld [vmem:[%s4411_s12 + $0x188] sm:$0xff] }
  0x65   : > { %8072 = vst [vmem:[#allocation71_spill] sm:$0xff] %v5069_v20  ;;  %8074 = vst [vmem:[#allocation73_spill] sm:$0xff] %v5084_v43  ;;  %v5107_v14 = vld [vmem:[%s4411_s12 + $0x640] sm:$0xff]  ;;  %v5110_v9 = vld [vmem:[%s4411_s12 + $0x648] sm:$0xff]  ;;  %v8091_v43 = vunpack.c.h.bf16 %v4620_v4 }
  0x66   : > { %4091 = vset.pattern.permute.xlu1 %v7705_v0  ;;  %1632 = vperm.xlu0 %4099, %v4554_v45   ;;  %8075 = vst [vmem:[#allocation74_spill] sm:$0xff] %v5090_v28  ;;  %v5122_v13 = vld [vmem:[%s4411_s12 + $0x1a8] sm:$0xff]  ;;  %v5141_v28 = vld [vmem:[%s4411_s12 + $0x90] sm:$0xff]  ;;  %v5144_v2 = vld [vmem:[%s4411_s12 + $0x98] sm:$0xff] }
  0x67   : > { %1620 = vperm.xlu1 %4091, %v500_v25   ;;  %v4751_v25 = vld [vmem:[%s4411_s12 + $0x568] sm:$0xff]  ;;  %8080 = vst [vmem:[#allocation79_spill] sm:$0xff] %v5122_v13  ;;  %8082 = vst [vmem:[#allocation81_spill] sm:$0xff] %v5141_v28  ;;  %v5173_v32 = vld [vmem:[%s4411_s12 + $0x680] sm:$0xff]  ;;  %v8107_v13 = vunpack.c.h.bf16 %v4592_v54 }
  0x68   : > { %8022 = vst [vmem:[#allocation24_spill] sm:$0xff] %v4751_v25  ;;  %v4887_v25 = vld [vmem:[%s4411_s12 + $0x4d0] sm:$0xff]  ;;  %v5131_v17 = vld [vmem:[%s4411_s12 + $0x408] sm:$0xff]  ;;  %8083 = vst [vmem:[#allocation82_spill] sm:$0xff] %v5144_v2 }
  0x69   : > { %8081 = vst [vmem:[#allocation80_spill] sm:$0xff] %v5131_v17  ;;  %8086 = vst [vmem:[#allocation85_spill] sm:$0xff] %v5173_v32  ;;  %v8090_v17 = vunpack.c.h.bf16 %v4610_v60  ;;  %v8105_v63 = vunpack.c.h.bf16 %v4887_v25 }
  0x6a   : > { %1640 = vperm.xlu0 %4099, %v4559_v46  }
  0x6b   : > { %4092 = vset.pattern.permute.xlu1 %v7703_v15 }
  0x6c   : > { %546 = vperm.xlu1 %4092, %v501_v44  }
  0x6e   : > { %1648 = vperm.xlu0 %4099, %v4564_v47  }
  0x70   : > { %4093 = vset.pattern.permute.xlu1 %v7707_v1 }
  0x71   : > { %1015 = vperm.xlu1 %4093, %v501_v44   ;;  %v4730_v44 = vld [vmem:[%s4411_s12 + $0x88] sm:$0xff] }
  0x72   : > { %1656 = vperm.xlu0 %4099, %v4567_v48   ;;  %8018 = vst [vmem:[#allocation20_spill] sm:$0xff] %v4730_v44  ;;  %v5015_v44 = vld [vmem:[%s4411_s12 + $0x3a0] sm:$0xff] }
  0x73   : > { %8063 = vst [vmem:[#allocation63_spill] sm:$0xff] %v5015_v44  ;;  %v5074_v44 = vld [vmem:[%s4411_s12 + $0x628] sm:$0xff] }
  0x74   : > { %8073 = vst [vmem:[#allocation72_spill] sm:$0xff] %v5074_v44  ;;  %v5119_v44 = vld [vmem:[%s4411_s12 + $0x400] sm:$0xff] }
  0x75   : > { %1019 = vperm.xlu1 %4093, %v4499_v29   ;;  %8079 = vst [vmem:[#allocation78_spill] sm:$0xff] %v5119_v44 }
  0x76   : > { %4107 = vset.pattern.permute.xlu0 %v7703_v15 }
  0x77   : > { %581 = vperm.xlu0 %4107, %v4573_v49  }
  0x79   : > { %4094 = vset.pattern.permute.xlu1 %v7705_v0 }
  0x7a   : > { %1628 = vperm.xlu1 %4094, %v4499_v29   ;;  %v4845_v29 = vld [vmem:[%s4411_s12 + $0x10] sm:$0xff] }
  0x7b   : > { %591 = vperm.xlu0 %4107, %v4578_v50   ;;  %8037 = vst [vmem:[#allocation39_spill] sm:$0xff] %v4845_v29  ;;  %v5010_v29 = vld [vmem:[%s4411_s12 + $0x2b8] sm:$0xff] }
  0x7c   : > { %8062 = vst [vmem:[#allocation62_spill] sm:$0xff] %v5010_v29 }
  0x7e   : > { %4095 = vset.pattern.permute.xlu1 %v7703_v15 }
  0x7f   : > { %556 = vperm.xlu1 %4095, %v4554_v45   ;;  %601 = vperm.xlu0 %4107, %v512_v55   ;;  %v4733_v55 = vld [vmem:[%s4411_s12 + $0xa8] sm:$0xff] }
  0x80   : > { %8019 = vst [vmem:[#allocation21_spill] sm:$0xff] %v4733_v55  ;;  %v8067_v55 = vmov 0  }
  0x83   : > { %4096 = vset.pattern.permute.xlu1 %v7707_v1  ;;  %4111 = vset.pattern.permute.xlu0 %v7705_v0 }
  0x84   : > { %1023 = vperm.xlu1 %4096, %v4554_v45   ;;  %1664 = vperm.xlu0 %4111, %v4685_v41   ;;  %v4890_v45 = vld [vmem:[%s4411_s12 + $0x4f0] sm:$0xff] }
  0x88   : > { %1027 = vperm.xlu1 %4096, %v4515_v34   ;;  %4114 = vset.pattern.permute.xlu0 %v7707_v1  ;;  %v4838_v1 = vld [vmem:[%s4411_s12 + $0x108] sm:$0xff] }
  0x89   : > { %1063 = vperm.xlu0 %4114, %v513_v3   ;;  %v4771_v3 = vld [vmem:[%s4411_s12 + $0xc0] sm:$0xff]  ;;  %8036 = vst [vmem:[#allocation38_spill] sm:$0xff] %v4838_v1  ;;  %v4899_v1 = vld [vmem:[%s4411_s12 + $0x128] sm:$0xff] }
  0x8a   : > { %8023 = vst [vmem:[#allocation25_spill] sm:$0xff] %v4771_v3  ;;  %8046 = vst [vmem:[#allocation47_spill] sm:$0xff] %v4899_v1  ;;  %v4917_v3 = vld [vmem:[%s4411_s12 + $0x18] sm:$0xff]  ;;  %v5024_v1 = vld [vmem:[%s4411_s12 + $0x3a8] sm:$0xff] }
  0x8b   : > { %8048 = vst [vmem:[#allocation49_spill] sm:$0xff] %v4917_v3  ;;  %v5021_v3 = vld [vmem:[%s4411_s12 + $0x518] sm:$0xff]  ;;  %8065 = vst [vmem:[#allocation65_spill] sm:$0xff] %v5024_v1  ;;  %v5102_v1 = vld [vmem:[%s4411_s12 + $0x3e8] sm:$0xff] }
  0x8c   : > { %4097 = vset.pattern.permute.xlu1 %v7705_v0  ;;  %8064 = vst [vmem:[#allocation64_spill] sm:$0xff] %v5021_v3  ;;  %8077 = vst [vmem:[#allocation76_spill] sm:$0xff] %v5102_v1  ;;  %v5159_v3 = vld [vmem:[%s4411_s12 + $0x668] sm:$0xff] }
  0x8d   : > { %1636 = vperm.xlu1 %4097, %v4515_v34   ;;  %4116 = vset.pattern.permute.xlu0 %v7705_v0  ;;  %v4835_v0 = vld [vmem:[%s4411_s12 + $0x100] sm:$0xff]  ;;  %v4868_v34 = vld [vmem:[%s4411_s12 + $0x290] sm:$0xff]  ;;  %8085 = vst [vmem:[#allocation84_spill] sm:$0xff] %v5159_v3  ;;  %v5176_v1 = vld [vmem:[%s4411_s12 + $0x688] sm:$0xff] }
  0x8e   : > { %8035 = vst [vmem:[#allocation37_spill] sm:$0xff] %v4835_v0  ;;  %v4920_v0 = vld [vmem:[%s4411_s12 + $0x38] sm:$0xff]  ;;  %8087 = vst [vmem:[#allocation86_spill] sm:$0xff] %v5176_v1 }
  0x8f   : > { %8049 = vst [vmem:[#allocation50_spill] sm:$0xff] %v4920_v0  ;;  %v8088_v0 = vunpack.c.h.bf16 %v4589_v53 }
  0x91   : > { %4098 = vset.pattern.permute.xlu1 %v7703_v15  ;;  %v4865_v15 = vld [vmem:[%s4411_s12 + $0x270] sm:$0xff] }
  0x92   : > { %566 = vperm.xlu1 %4098, %v4559_v46  }
  0x96   : > { %4100 = vset.pattern.permute.xlu1 %v8041_v8 }
  0x97   : > { %1031 = vperm.xlu1 %4100, %v4559_v46   ;;  %v4149_v46 = vld [vmem:[%s7700_s2 + $0x178] sm:$0xff]  }
  0x98   : > { %3868 = vmatprep.subr.bf16.mxu0 %v4149_v46  ;;  %v4970_v46 = vld [vmem:[%s4411_s12 + $0x58] sm:$0xff] }
  0x99   : > { %8054 = vst [vmem:[#allocation55_spill] sm:$0xff] %v4970_v46  ;;  %v5116_v46 = vld [vmem:[%s4411_s12 + $0x1a0] sm:$0xff] }
  0x9a   : > { %8078 = vst [vmem:[#allocation77_spill] sm:$0xff] %v5116_v46  ;;  %v8122_v46 = vunpack.c.h.bf16 %v4923_v30 }
  0x9b   : > { %1035 = vperm.xlu1 %4100, %v4532_v39  }
  0x9f   : > { %4101 = vset.pattern.permute.xlu1 %v8055_v33 }
  0xa0   : > { %1644 = vperm.xlu1 %4101, %v4532_v39   ;;  %v5004_v39 = vld [vmem:[%s4411_s12 + $0x168] sm:$0xff] }
  0xa4   : > { %4102 = vset.pattern.permute.xlu1 %v8067_v55 }
  0xa5   : > { %576 = vperm.xlu1 %4102, %v4564_v47  }
  0xa9   : > { %4103 = vset.pattern.permute.xlu1 %v8041_v8 }
  0xaa   : > { %1039 = vperm.xlu1 %4103, %v4564_v47   ;;  %v5099_v47 = vld [vmem:[%s4411_s12 + $0x3e0] sm:$0xff] }
  0xab   : > { %8076 = vst [vmem:[#allocation75_spill] sm:$0xff] %v5099_v47  ;;  %v5156_v47 = vld [vmem:[%s4411_s12 + $0x660] sm:$0xff] }
  0xac   : > { %8084 = vst [vmem:[#allocation83_spill] sm:$0xff] %v5156_v47  ;;  %v8092_v47 = vunpack.c.l.bf16 %v4589_v53 }
  0xae   : > { %1043 = vperm.xlu1 %4103, %v4573_v49  }
  0xb2   : > { %4104 = vset.pattern.permute.xlu1 %v8055_v33 }
  0xb3   : > { %1652 = vperm.xlu1 %4104, %v4573_v49   ;;  %v992_v18 = vpop.permute.xlu1 %991  ;;  %v5166_v31 = vpop.permute.xlu0 %1600  ;;  %v8089_v49 = vunpack.c.h.bf16 %v4597_v56 }
  0xb4   : > { %v5180_v29 = vmul.f32 %v992_v18, %v8088_v0  ;;  %v5189_v44 = vmul.f32 %v992_v18, %v8090_v17  ;;  %v5194_v3 = vmul.f32 %v5166_v31, %v8091_v43  ;;  %v5198_v2 = vmul.f32 %v992_v18, %v8092_v47 }
  0xb5   : > { %v5185_v23 = vmul.f32 %v5166_v31, %v8089_v49  ;;  %v8093_v0 = vunpack.c.l.bf16 %v4597_v56  ;;  %v8094_v49 = vunpack.c.l.bf16 %v4610_v60  ;;  %v8095_v17 = vunpack.c.l.bf16 %v4620_v4  ;;  %v5222_v60 = vld [vmem:[%s4411_s12 + $0x1c0] sm:$0xff] }
  0xb6   : > { %8097 = vst [vmem:[#allocation88_spill] sm:$0xff] %v5222_v60  ;;  %v8099_v4 = vunpack.c.l.bf16 %v4865_v15  ;;  %v8101_v43 = vunpack.c.h.bf16 %v4865_v15  ;;  %v8103_v47 = vunpack.c.l.bf16 %v4887_v25  ;;  %v5243_v37 = vmul.f32 %v5166_v31, %v8105_v63 }
  0xb7   : > { %v5203_v28 = vmul.f32 %v5166_v31, %v8093_v0  ;;  %v5207_v20 = vmul.f32 %v992_v18, %v8094_v49  ;;  %v5212_v26 = vmul.f32 %v5166_v31, %v8095_v17  ;;  %4105 = vset.pattern.permute.xlu1 %v8067_v55  ;;  %v996_v0 = vpop.permute.xlu1 %995  ;;  %v5219_v24 = vpop.permute.xlu0 %1608  ;;  %v5225_v49 = vld [vmem:[%s4411_s12 + $0x1c8] sm:$0xff]  ;;  %v8108_v15 = vunpack.c.h.bf16 %v4613_v61 }
  0xb8   : > { %8096 = vst [vmem:[#allocation87_spill] sm:$0xff] %v5219_v24  ;;  %8098 = vst [vmem:[#allocation89_spill] sm:$0xff] %v5225_v49  ;;  %v5229_v17 = vmul.f32 %v992_v18, %v8099_v4  ;;  %v5233_v53 = vmul.f32 %v992_v18, %v8101_v43  ;;  %v5238_v56 = vmul.f32 %v5166_v31, %v8103_v47  ;;  %586 = vperm.xlu1 %4105, %v4567_v48  }
  0xb9   : > { %8106 = vst [vmem:[#allocation93_spill] sm:$0xff] %v5243_v37  ;;  %v5248_v4 = vmul.f32 %v996_v0, %v8107_v13  ;;  %v5252_v43 = vmul.f32 %v996_v0, %v8108_v15  ;;  %v8110_v47 = vunpack.c.l.bf16 %v4613_v61  ;;  %v8111_v63 = vunpack.c.h.bf16 %v4648_v19 }
  0xba   : > { %8100 = vst [vmem:[#allocation90_spill] sm:$0xff] %v5229_v17  ;;  %8102 = vst [vmem:[#allocation91_spill] sm:$0xff] %v5233_v53  ;;  %v8109_v17 = vunpack.c.l.bf16 %v4592_v54  ;;  %v8112_v13 = vunpack.c.h.bf16 %v4678_v38  ;;  %v8113_v15 = vunpack.c.l.bf16 %v4648_v19  ;;  %v8116_v19 = vunpack.c.l.bf16 %v4868_v34 }
  0xbb   : > { %8104 = vst [vmem:[#allocation92_spill] sm:$0xff] %v5238_v56  ;;  %v5260_v25 = vmul.f32 %v996_v0, %v8110_v47  ;;  %v5265_v56 = vmul.f32 %v5219_v24, %v8111_v63  ;;  %v8120_v47 = vunpack.c.l.bf16 %v4923_v30  ;;  %v5302_v63 = vmul.f32 %v992_v18, %v8122_v46 }
  0xbc   : > { %v5256_v53 = vmul.f32 %v996_v0, %v8109_v17  ;;  %v5270_v37 = vmul.f32 %v5219_v24, %v8112_v13  ;;  %v5275_v54 = vmul.f32 %v5219_v24, %v8113_v15  ;;  %v8114_v17 = vunpack.c.l.bf16 %v4678_v38  ;;  %v5286_v13 = vpop.permute.xlu0 %1616  ;;  %4106 = vset.pattern.permute.xlu1 %v8041_v8  ;;  %v1605_v1 = vpop.permute.xlu1 %1604 }
  0xbd   : > { %8115 = vst [vmem:[#allocation94_spill] sm:$0xff] %v5286_v13  ;;  %v5290_v15 = vmul.f32 %v996_v0, %v8116_v19  ;;  %v8118_v38 = vunpack.c.h.bf16 %v4868_v34  ;;  %8123 = vst [vmem:[#allocation98_spill] sm:$0xff] %v5302_v63  ;;  %v8124_v49 = vunpack.c.h.bf16 %v4720_v42  ;;  %v8125_v34 = vunpack.c.h.bf16 %v4748_v62  ;;  %1047 = vperm.xlu1 %4106, %v4567_v48   ;;  %v5367_v48 = vld [vmem:[%s4411_s12 + $0x1e0] sm:$0xff] }
  0xbe   : > { %v5280_v61 = vmul.f32 %v5219_v24, %v8114_v17  ;;  %v5298_v24 = vmul.f32 %v992_v18, %v8120_v47  ;;  %v8126_v47 = vunpack.c.l.bf16 %v4720_v42  ;;  %v8127_v18 = vunpack.c.l.bf16 %v4748_v62  ;;  %v5339_v62 = vld [vmem:[%s4411_s12 + $0x420] sm:$0xff] }
  0xbf   : > { %8117 = vst [vmem:[#allocation95_spill] sm:$0xff] %v5290_v15  ;;  %v5294_v17 = vmul.f32 %v996_v0, %v8118_v38  ;;  %v5308_v19 = vmul.f32 %v5286_v13, %v8124_v49  ;;  %v5313_v38 = vmul.f32 %v5286_v13, %v8125_v34  ;;  %v8128_v46 = vunpack.c.h.bf16 %v4600_v57  ;;  %8132 = vst [vmem:[#allocation99_spill] sm:$0xff] %v5339_v62 }
  0xc0   : > { %8121 = vst [vmem:[#allocation97_spill] sm:$0xff] %v5298_v24  ;;  %v5318_v60 = vmul.f32 %v5286_v13, %v8126_v47  ;;  %v5323_v30 = vmul.f32 %v5286_v13, %v8127_v18  ;;  %v8129_v24 = vunpack.c.h.bf16 %v4623_v5  ;;  %v8130_v15 = vunpack.c.l.bf16 %v4600_v57  ;;  %v5342_v18 = vld [vmem:[%s4411_s12 + $0x428] sm:$0xff] }
  0xc1   : > { %8119 = vst [vmem:[#allocation96_spill] sm:$0xff] %v5294_v17  ;;  %v1684_v49 = vmul.f32 %v1605_v1, %v8128_v46  ;;  %v8131_v47 = vunpack.c.l.bf16 %v4623_v5  ;;  %8133 = vst [vmem:[#allocation100_spill] sm:$0xff] %v5342_v18  ;;  %v8134_v57 = vunpack.c.l.bf16 %v4890_v45  ;;  %v8136_v5 = vunpack.c.h.bf16 %v4890_v45  ;;  %1051 = vperm.xlu1 %4106, %v4578_v50   ;;  %v5388_v62 = vpop.permute.xlu1 %526 }
  0xc2   : > { %v1686_v34 = vmul.f32 %v1605_v1, %v8129_v24  ;;  %v5332_v42 = vmul.f32 %v1605_v1, %v8130_v15  ;;  %v8138_v17 = vunpack.c.l.bf16 %v4937_v16  ;;  %v8140_v13 = vunpack.c.h.bf16 %v4937_v16  ;;  %v5364_v24 = vpop.permute.xlu0 %516 }
  0xc3   : > { %v5336_v63 = vmul.f32 %v1605_v1, %v8131_v47  ;;  %v5350_v15 = vmul.f32 %v1605_v1, %v8134_v57  ;;  %v5354_v47 = vmul.f32 %v1605_v1, %v8136_v5  ;;  %8142 = vst [vmem:[#allocation105_spill] sm:$0xff] %v5364_v24  ;;  %v8143_v57 = vunpack.c.l.bf16 %v4944_v7 }
  0xc4   : > { %v5358_v32 = vmul.f32 %v996_v0, %v8138_v17  ;;  %v5362_v46 = vmul.f32 %v996_v0, %v8140_v13  ;;  %v8145_v5 = vunpack.c.h.bf16 %v4944_v7  ;;  %v8147_v17 = vunpack.c.l.bf16 %v4947_v36 }
  0xc5   : > { %8135 = vst [vmem:[#allocation101_spill] sm:$0xff] %v5350_v15  ;;  %8137 = vst [vmem:[#allocation102_spill] sm:$0xff] %v5354_v47  ;;  %v5372_v45 = vmul.f32 %v5166_v31, %v8143_v57  ;;  %v8149_v0 = vunpack.c.h.bf16 %v4947_v36  ;;  %v8151_v57 = vunpack.c.h.bf16 %v4582_v51  ;;  %v8152_v7 = vunpack.c.h.bf16 %v4604_v58  ;;  %4108 = vset.pattern.permute.xlu1 %v8055_v33 }
  0xc6   : > { %8139 = vst [vmem:[#allocation103_spill] sm:$0xff] %v5358_v32  ;;  %8141 = vst [vmem:[#allocation104_spill] sm:$0xff] %v5362_v46  ;;  %v5377_v18 = vmul.f32 %v5166_v31, %v8145_v5  ;;  %v5381_v16 = vmul.f32 %v1605_v1, %v8147_v17  ;;  %v8153_v5 = vunpack.c.l.bf16 %v4582_v51  ;;  %v8154_v36 = vunpack.c.l.bf16 %v4604_v58  ;;  %v5409_v32 = vld [vmem:[%s4411_s12 + $0x448] sm:$0xff]  ;;  %1660 = vperm.xlu1 %4108, %v4578_v50  }
  0xc7   : > { %8144 = vst [vmem:[#allocation106_spill] sm:$0xff] %v5372_v45  ;;  %v5385_v13 = vmul.f32 %v1605_v1, %v8149_v0  ;;  %v610_v45 = vmul.f32 %v5364_v24, %v8151_v57  ;;  %v612_v31 = vmul.f32 %v5364_v24, %v8152_v7  ;;  %v5403_v0 = vld [vmem:[%s4411_s12 + $0x440] sm:$0xff]  ;;  %8156 = vst [vmem:[#allocation111_spill] sm:$0xff] %v5409_v32  ;;  %v8157_v57 = vunpack.c.h.bf16 %v4631_v10 }
  0xc8   : > { %8146 = vst [vmem:[#allocation107_spill] sm:$0xff] %v5377_v18  ;;  %8148 = vst [vmem:[#allocation108_spill] sm:$0xff] %v5381_v16  ;;  %v609_v17 = vmul.f32 %v5364_v24, %v8153_v5  ;;  %v611_v1 = vmul.f32 %v5364_v24, %v8154_v36  ;;  %v5406_v16 = vld [vmem:[%s4411_s12 + $0x1e8] sm:$0xff]  ;;  %v8158_v7 = vunpack.c.h.bf16 %v4654_v21  ;;  %v8159_v5 = vunpack.c.l.bf16 %v4631_v10  ;;  %v5431_v24 = vpop.permute.xlu0 %521  ;;  %v5711_v32 = vld [vmem:[%s4411_s12 + $0x6e0] sm:$0xff] }
  0xc9   : > { %8150 = vst [vmem:[#allocation109_spill] sm:$0xff] %v5385_v13  ;;  %8155 = vst [vmem:[#allocation110_spill] sm:$0xff] %v5403_v0  ;;  %v626_v15 = vmul.f32 %v5388_v62, %v8157_v57  ;;  %v8160_v36 = vunpack.c.l.bf16 %v4654_v21  ;;  %v1219_v18 = vadd.f32 %v5180_v29, %v610_v45  ;;  %v1221_v47 = vadd.f32 %v5189_v44, %v612_v31  ;;  %v8231_v10 = vld [vmem:[#allocation17_spill] sm:$0xff] }
  0xca   : > { %v628_v51 = vmul.f32 %v5388_v62, %v8158_v7  ;;  %v5420_v58 = vmul.f32 %v5388_v62, %v8159_v5  ;;  %v1218_v57 = vadd.f32 %v5198_v2, %v609_v17  ;;  %v1220_v46 = vadd.f32 %v5207_v20, %v611_v1  ;;  %v5447_v17 = vpop.permute.xlu1 %999  ;;  %4109 = vset.pattern.permute.xlu1 %v8067_v55  ;;  %v5693_v5 = vld [vmem:[%s4411_s12 + $0x228] sm:$0xff] }
  0xcb   : > { %v5425_v13 = vmul.f32 %v5388_v62, %v8160_v36  ;;  %v8161_v29 = vunpack.c.h.bf16 %v4585_v52  ;;  %v1828_v2 = vadd.f32 %v5185_v23, %v1219_v18  ;;  %v8162_v20 = vunpack.c.h.bf16 %v4607_v59  ;;  %8163 = vst [vmem:[#allocation112_spill] sm:$0xff] %v5447_v17  ;;  %596 = vperm.xlu1 %4109, %v4685_v41   ;;  %8237 = vst [vmem:[#allocation17_spill] sm:$0xff] %v5711_v32  ;;  %v5714_v0 = vld [vmem:[%s4411_s12 + $0x208] sm:$0xff] }
  0xcc   : > { %v1830_v31 = vadd.f32 %v5194_v3, %v1221_v47  ;;  %v8164_v1 = vunpack.c.l.bf16 %v4585_v52  ;;  %v1827_v21 = vadd.f32 %v5203_v28, %v1218_v57  ;;  %v1829_v18 = vadd.f32 %v5212_v26, %v1220_v46  ;;  %v5465_v28 = vpop.permute.xlu0 %531  ;;  %v5982_v32 = vld [vmem:[%s4411_s12 + $0x248] sm:$0xff] }
  0xcd   : > { %v618_v44 = vmul.f32 %v5431_v24, %v8161_v29  ;;  %v620_v45 = vmul.f32 %v5431_v24, %v8162_v20  ;;  %v8165_v29 = vunpack.c.l.bf16 %v4607_v59  ;;  %v8166_v50 = vunpack.c.h.bf16 %v4637_v12 }
  0xce   : > { %v617_v36 = vmul.f32 %v5431_v24, %v8164_v1  ;;  %v8167_v52 = vunpack.c.h.bf16 %v4664_v27  ;;  %v8168_v26 = vunpack.c.l.bf16 %v4637_v12  ;;  %v8227_v7 = vunpack.c.l.bf16 %v5001_v35 }
  0xcf   : > { %v619_v23 = vmul.f32 %v5431_v24, %v8165_v29  ;;  %v1227_v20 = vadd.f32 %v5248_v4, %v618_v44  ;;  %v1229_v3 = vadd.f32 %v5252_v43, %v620_v45  ;;  %v1083_v47 = vmul.f32 %v5447_v17, %v8166_v50  ;;  %4110 = vset.pattern.permute.xlu1 %v8041_v8  ;;  %v8187_v8 = vld [vmem:[#allocation12_spill] sm:$0xff] }
  0xd0   : > { %v1085_v1 = vmul.f32 %v5447_v17, %v8167_v52  ;;  %v1226_v59 = vadd.f32 %v5256_v53, %v617_v36  ;;  %v1082_v4 = vmul.f32 %v5447_v17, %v8168_v26  ;;  %v8169_v43 = vunpack.c.l.bf16 %v4664_v27  ;;  %v5479_v53 = vpop.permute.xlu1 %1003  ;;  %1055 = vperm.xlu1 %4110, %v4685_v41  }
  0xd1   : > { %v1228_v57 = vadd.f32 %v5260_v25, %v619_v23  ;;  %v1836_v44 = vadd.f32 %v1684_v49, %v1227_v20  ;;  %v1838_v45 = vadd.f32 %v1686_v34, %v1229_v3  ;;  %v8170_v29 = vunpack.c.h.bf16 %v4634_v11  ;;  %8171 = vst [vmem:[#allocation113_spill] sm:$0xff] %v5479_v53  ;;  %v5487_v23 = vld [vmem:[%s4411_s12 + $0x6a0] sm:$0xff] }
  0xd2   : > { %v1084_v46 = vmul.f32 %v5447_v17, %v8169_v43  ;;  %v1235_v52 = vadd.f32 %v1083_v47, %v626_v15  ;;  %v1835_v12 = vadd.f32 %v5332_v42, %v1226_v59  ;;  %v8172_v27 = vunpack.c.h.bf16 %v4657_v22  ;;  %8173 = vst [vmem:[#allocation114_spill] sm:$0xff] %v5487_v23  ;;  %v8174_v15 = vld [vmem:[#allocation11_spill] sm:$0xff]  ;;  %v5497_v42 = vld [vmem:[%s4411_s12 + $0x6a8] sm:$0xff]  ;;  %v5708_v23 = vld [vmem:[%s4411_s12 + $0x6c0] sm:$0xff] }
  0xd3   : > { %v634_v50 = vmul.f32 %v5465_v28, %v8170_v29  ;;  %v1837_v25 = vadd.f32 %v5336_v63, %v1228_v57  ;;  %v1237_v49 = vadd.f32 %v1085_v1, %v628_v51  ;;  %v1980_v34 = vpack.c.bf16 %v1836_v44, %v1828_v2  ;;  %8176 = vst [vmem:[#allocation11_spill] sm:$0xff] %v5497_v42  ;;  %v8177_v57 = vld [vmem:[#allocation13_spill] sm:$0xff]  ;;  %v5503_v29 = vpop.permute.xlu0 %541 }
  0xd4   : > { %v636_v36 = vmul.f32 %v5465_v28, %v8172_v27  ;;  %v1982_v20 = vpack.c.bf16 %v1838_v45, %v1830_v31  ;;  %v8175_v3 = vunpack.c.h.bf16 %v8174_v15  ;;  %v5494_v26 = vadd.f32 %v5265_v56, %v1235_v52  ;;  %8179 = vst [vmem:[#allocation13_spill] sm:$0xff] %v5503_v29  ;;  %v5524_v27 = vpop.permute.xlu1 %1612  ;;  %v5665_v45 = vld [vmem:[%s4411_s12 + $0x480] sm:$0xff] }
  0xd5   : > { %v1979_v63 = vpack.c.bf16 %v1835_v12, %v1827_v21  ;;  %v1981_v59 = vpack.c.bf16 %v1837_v25, %v1829_v18  ;;  %v8178_v43 = vunpack.c.h.bf16 %v8177_v57  ;;  %v1846_v1 = vadd.f32 %v5270_v37, %v1237_v49  ;;  %2610 = vmatprep.mubr.bf16.mxu0 %v1980_v34  ;;  %v4150_v18 = vld [vmem:[%s7700_s2 + $0x138] sm:$0xff]   ;;  %8183 = vst [vmem:[#allocation115_spill] sm:$0xff] %v5524_v27  ;;  %v5662_v25 = vld [vmem:[%s4411_s12 + $0x460] sm:$0xff] }
  0xd6   : > { %v1091_v47 = vmul.f32 %v5479_v53, %v8175_v3  ;;  %2722 = vmatprep.mubr.bf16.mxu1 %v1982_v20  ;;  %v8180_v31 = vunpack.c.l.bf16 %v4634_v11  ;;  %v8181_v44 = vunpack.c.l.bf16 %v8174_v15  ;;  %v1234_v52 = vadd.f32 %v1082_v4, %v5420_v58  ;;  %v4152_v12 = vld [vmem:[%s7700_s2 + $0x1b8] sm:$0xff]   ;;  %v4153_v15 = vld [vmem:[%s7700_s2 + $0x170] sm:$0xff]  }
  0xd7   : > { %v1093_v51 = vmul.f32 %v5479_v53, %v8178_v43  ;;  %2611 = vmatmul.mubr.bf16.vlgmr.msra.gmra.mxu0 %v1979_v63  ;;  %2723 = vmatmul.mubr.bf16.vlgmr.msra.gmra.mxu1 %v1981_v59  ;;  %v8184_v34 = vunpack.c.l.bf16 %v8177_v57  ;;  %v1236_v58 = vadd.f32 %v1084_v46, %v5425_v13  ;;  %v8188_v3 = vunpack.c.h.bf16 %v8187_v8  ;;  %v8189_v63 = vld [vmem:[#allocation14_spill] sm:$0xff] }
  0xd8   : > { %v1243_v2 = vadd.f32 %v1091_v47, %v634_v50  ;;  %v633_v56 = vmul.f32 %v5465_v28, %v8180_v31  ;;  %v1090_v21 = vmul.f32 %v5479_v53, %v8181_v44  ;;  %v8182_v50 = vunpack.c.l.bf16 %v4657_v22  ;;  %v8185_v22 = vld [vmem:[#allocation16_spill] sm:$0xff]  ;;  %3869 = vmatpush3.bf16.msra.mxu0 %v4150_v18  ;;  %3945 = vmatpush3.bf16.msra.mxu1 %v4152_v12  ;;  %v8198_v18 = vld [vmem:[#allocation31_spill] sm:$0xff]  ;;  %v5584_v12 = vpop.permute.xlu1 %536 }
  0xd9   : > { %v1245_v37 = vadd.f32 %v1093_v51, %v636_v36  ;;  %v1092_v36 = vmul.f32 %v5479_v53, %v8184_v34  ;;  %v8186_v4 = vunpack.c.h.bf16 %v8185_v22  ;;  %v1700_v47 = vmul.f32 %v5524_v27, %v8188_v3  ;;  %v5549_v51 = vpop.permute.xlu0 %551  ;;  %3870 = vmatprep.subr.bf16.mxu0 %v4153_v15  ;;  %8202 = vst [vmem:[#allocation12_spill] sm:$0xff] %v5584_v12 }
  0xda   : > { %v635_v11 = vmul.f32 %v5465_v28, %v8182_v50  ;;  %v1242_v49 = vadd.f32 %v1090_v21, %v633_v56  ;;  %v8190_v59 = vunpack.c.h.bf16 %v8189_v63  ;;  %v8191_v13 = vunpack.c.l.bf16 %v8187_v8  ;;  %8192 = vst [vmem:[#allocation16_spill] sm:$0xff] %v5549_v51  ;;  %v8194_v21 = vld [vmem:[#allocation21_spill] sm:$0xff] }
  0xdb   : > { %v5533_v20 = vmul.f32 %v5503_v29, %v8186_v4  ;;  %v1843_v43 = vadd.f32 %v5275_v54, %v1234_v52  ;;  %v8193_v56 = vunpack.c.l.bf16 %v8189_v63  ;;  %v1845_v44 = vadd.f32 %v5280_v61, %v1236_v58  ;;  %v4154_v54 = vld [vmem:[%s7700_s2 + $0x130] sm:$0xff]  }
  0xdc   : > { %v1702_v57 = vmul.f32 %v5524_v27, %v8190_v59  ;;  %v1699_v46 = vmul.f32 %v5524_v27, %v8191_v13  ;;  %v1244_v31 = vadd.f32 %v1092_v36, %v635_v11  ;;  %v8195_v50 = vunpack.c.h.bf16 %v8194_v21  ;;  %3871 = vmatpush3.bf16.msra.mxu0 %v4154_v54  ;;  %v4156_v54 = vld [vmem:[%s7700_s2 + $0x1b0] sm:$0xff]  }
  0xdd   : > { %v1701_v41 = vmul.f32 %v5524_v27, %v8193_v56  ;;  %v1852_v52 = vadd.f32 %v1700_v47, %v1243_v2  ;;  %v8196_v36 = vunpack.c.l.bf16 %v8185_v22  ;;  %v8197_v58 = vunpack.c.l.bf16 %v8194_v21  ;;  %v8200_v2 = vld [vmem:[#allocation33_spill] sm:$0xff]  ;;  %v8205_v21 = vld [vmem:[#allocation15_spill] sm:$0xff] }
  0xde   : > { %v5558_v34 = vmul.f32 %v5503_v29, %v8195_v50  ;;  %v1854_v4 = vadd.f32 %v1702_v57, %v1245_v37  ;;  %v1851_v11 = vadd.f32 %v1699_v46, %v1242_v49  ;;  %v8199_v63 = vunpack.c.h.bf16 %v8198_v18  ;;  %v4219_v22 = vld [vmem:[%s4423_s14 + $0x88] sm:$0xff]  ;;  %v5587_v46 = vpop.permute.xlu0 %561  ;;  %8220 = vst [vmem:[#allocation33_spill] sm:$0xff] %v5662_v25  ;;  %8221 = vst [vmem:[#allocation15_spill] sm:$0xff] %v5665_v45 }
  0xdf   : > { %v5566_v8 = vmul.f32 %v5503_v29, %v8196_v36  ;;  %v1853_v61 = vadd.f32 %v1701_v41, %v1244_v31  ;;  %v5571_v3 = vmul.f32 %v5503_v29, %v8197_v58  ;;  %v8201_v37 = vunpack.c.h.bf16 %v8200_v2  ;;  %1059 = vperm.xlu1 %4110, %v4219_v22   ;;  %8203 = vst [vmem:[#allocation14_spill] sm:$0xff] %v5587_v46  ;;  %v4155_v41 = vld [vmem:[%s7700_s2 + $0x1f0] sm:$0xff]   ;;  %v8207_v58 = vld [vmem:[#allocation20_spill] sm:$0xff] }
  0xe0   : > { %v5576_v59 = vmul.f32 %v5549_v51, %v8199_v63  ;;  %v1988_v47 = vpack.c.bf16 %v1852_v52, %v5494_v26  ;;  %v1990_v57 = vpack.c.bf16 %v1854_v4, %v1846_v1  ;;  %v1987_v13 = vpack.c.bf16 %v1851_v11, %v1843_v43  ;;  %3946 = vmatprep.subr.bf16.mxu1 %v4155_v41 }
  0xe1   : > { %v5581_v49 = vmul.f32 %v5549_v51, %v8201_v37  ;;  %v8204_v31 = vunpack.c.l.bf16 %v8198_v18  ;;  %v1989_v15 = vpack.c.bf16 %v1853_v61, %v1845_v44  ;;  %v8206_v50 = vunpack.c.h.bf16 %v8205_v21  ;;  %v8212_v18 = vld [vmem:[#allocation45_spill] sm:$0xff]  ;;  %3947 = vmatpush3.bf16.msra.mxu1 %v4156_v54  ;;  %v4163_v54 = vld [vmem:[%s7700_s2 + $0x1e0] sm:$0xff]  }
  0xe2   : > { %v8208_v26 = vunpack.c.h.bf16 %v8207_v58  ;;  %v8209_v43 = vunpack.c.l.bf16 %v8205_v21  ;;  %2618 = vmatprep.mubr.bf16.mxu0 %v1988_v47  ;;  %2730 = vmatprep.mubr.bf16.mxu1 %v1990_v57  ;;  %v8210_v4 = vunpack.c.l.bf16 %v8207_v58  ;;  %v8211_v11 = vunpack.c.l.bf16 %v8200_v2  ;;  %v4157_v47 = vld [vmem:[%s7700_s2 + $0x168] sm:$0xff]   ;;  %v8214_v2 = vld [vmem:[#allocation47_spill] sm:$0xff] }
  0xe3   : > { %v5592_v56 = vmul.f32 %v5549_v51, %v8204_v31  ;;  %v642_v36 = vmul.f32 %v5584_v12, %v8206_v50  ;;  %v8213_v63 = vunpack.c.h.bf16 %v8212_v18  ;;  %2619 = vmatmul.mubr.bf16.gmra.mxu0 %v1987_v13  ;;  %2731 = vmatmul.mubr.bf16.gmra.mxu1 %v1989_v15  ;;  %v8215_v31 = vunpack.c.h.bf16 %v8214_v2  ;;  %v4158_v13 = vld [vmem:[%s7700_s2 + $0x128] sm:$0xff]  }
  0xe4   : > { %v644_v1 = vmul.f32 %v5584_v12, %v8208_v26  ;;  %v641_v52 = vmul.f32 %v5584_v12, %v8209_v43  ;;  %v643_v44 = vmul.f32 %v5584_v12, %v8210_v4  ;;  %v5612_v61 = vmul.f32 %v5549_v51, %v8211_v11  ;;  %v4159_v15 = vld [vmem:[%s7700_s2 + $0x1e8] sm:$0xff]   ;;  %v5649_v11 = vld [vmem:[%s4411_s12 + $0x220] sm:$0xff]  ;;  %4112 = vset.pattern.permute.xlu1 %v8055_v33  ;;  %v5667_v4 = vpop.permute.xlu1 %1007  ;;  %v8233_v51 = vld [vmem:[#allocation22_spill] sm:$0xff] }
  0xe5   : > { %v5617_v37 = vmul.f32 %v5587_v46, %v8213_v63  ;;  %v5629_v21 = vmul.f32 %v5587_v46, %v8215_v31  ;;  %v8216_v50 = vunpack.c.l.bf16 %v8212_v18  ;;  %v8217_v26 = vunpack.c.l.bf16 %v8214_v2  ;;  %v5652_v18 = vpop.permute.xlu0 %571  ;;  %1668 = vperm.xlu1 %4112, %v4219_v22   ;;  %8222 = vst [vmem:[#allocation20_spill] sm:$0xff] %v5667_v4  ;;  %8238 = vst [vmem:[#allocation22_spill] sm:$0xff] %v5714_v0 }
  0xe6   : > { %8218 = vst [vmem:[#allocation21_spill] sm:$0xff] %v5652_v18  ;;  %v8223_v41 = vunpack.c.h.bf16 %v5001_v35  ;;  %v8225_v31 = vunpack.c.h.bf16 %v5004_v39  ;;  %v5682_v2 = vmul.f32 %v5652_v18, %v8227_v7  ;;  %v8229_v57 = vunpack.c.l.bf16 %v5004_v39  ;;  %3872 = vmatprep.subr.bf16.mxu0 %v4157_v47  ;;  %3948 = vmatprep.subr.bf16.mxu1 %v4159_v15  ;;  %v4162_v47 = vld [vmem:[%s7700_s2 + $0x120] sm:$0xff]  }
  0xe7   : > { %v5634_v58 = vmul.f32 %v5587_v46, %v8216_v50  ;;  %v5639_v43 = vmul.f32 %v5587_v46, %v8217_v26  ;;  %v5659_v26 = vld [vmem:[%s4411_s12 + $0x200] sm:$0xff]  ;;  %v8232_v46 = vunpack.c.h.bf16 %v8231_v10  ;;  %v8234_v35 = vunpack.c.h.bf16 %v8233_v51  ;;  %3873 = vmatpush3.bf16.msra.mxu0 %v4158_v13  ;;  %v4220_v13 = vld [vmem:[%s4423_s14 + $0x90] sm:$0xff]  ;;  %s4227_s14 = scalar_lea.vmem %s4226_s11, 2432 }
  0xe8   : > { %8219 = vst [vmem:[#allocation31_spill] sm:$0xff] %v5659_v26  ;;  %v5672_v63 = vmul.f32 %v5652_v18, %v8223_v41  ;;  %v5677_v50 = vmul.f32 %v5652_v18, %v8225_v31  ;;  %8228 = vst [vmem:[#allocation116_spill] sm:$0xff] %v5682_v2  ;;  %v5687_v22 = vmul.f32 %v5652_v18, %v8229_v57  ;;  %v4161_v41 = vld [vmem:[%s7700_s2 + $0x160] sm:$0xff]   ;;  %v8235_v42 = vunpack.c.l.bf16 %v8231_v10  ;;  %v5727_v15 = vpop.permute.xlu1 %1011 }
  0xe9   : > { %v1099_v31 = vmul.f32 %v5667_v4, %v8232_v46  ;;  %v1101_v7 = vmul.f32 %v5667_v4, %v8234_v35  ;;  %v8236_v57 = vunpack.c.l.bf16 %v8233_v51  ;;  %v4160_v46 = vld [vmem:[%s7700_s2 + $0x1a8] sm:$0xff]   ;;  %4113 = vset.pattern.permute.xlu1 %v8067_v55  ;;  %8239 = vst [vmem:[#allocation118_spill] sm:$0xff] %v5727_v15  ;;  %v5729_v10 = vpop.permute.xlu0 %1624  ;;  %3874 = vmatprep.subr.bf16.mxu0 %v4161_v41  ;;  %v8241_v55 = vld [vmem:[#allocation18_spill] sm:$0xff] }
  0xea   : > { %8224 = vst [vmem:[#allocation45_spill] sm:$0xff] %v5672_v63  ;;  %8226 = vst [vmem:[#allocation47_spill] sm:$0xff] %v5677_v50  ;;  %v1098_v39 = vmul.f32 %v5667_v4, %v8235_v42  ;;  %606 = vperm.xlu1 %4113, %v4220_v13   ;;  %3949 = vmatpush3.bf16.msra.mxu1 %v4160_v46  ;;  %v4165_v46 = vld [vmem:[%s7700_s2 + $0x158] sm:$0xff]   ;;  %v5802_v42 = vld [vmem:[%s4411_s12 + $0x488] sm:$0xff] }
  0xeb   : > { %8230 = vst [vmem:[#allocation117_spill] sm:$0xff] %v5687_v22  ;;  %v1100_v18 = vmul.f32 %v5667_v4, %v8236_v57  ;;  %v1251_v35 = vadd.f32 %v1099_v31, %v642_v36  ;;  %v1253_v57 = vadd.f32 %v1101_v7, %v644_v1  ;;  %8240 = vst [vmem:[#allocation119_spill] sm:$0xff] %v5729_v10  ;;  %v8243_v7 = vld [vmem:[#allocation23_spill] sm:$0xff]  ;;  %3875 = vmatpush3.bf16.msra.mxu0 %v4162_v47  ;;  %v8266_v50 = vld [vmem:[#allocation24_spill] sm:$0xff] }
  0xec   : > { %v1250_v4 = vadd.f32 %v1098_v39, %v641_v52  ;;  %v8244_v39 = vunpack.c.h.bf16 %v8243_v7  ;;  %v8245_v52 = vunpack.c.l.bf16 %v8241_v55  ;;  %3950 = vmatprep.subr.bf16.mxu1 %v4163_v54  ;;  %v8264_v22 = vld [vmem:[#allocation19_spill] sm:$0xff]  ;;  %v8267_v63 = vunpack.c.h.bf16 %v8266_v50  ;;  %3876 = vmatprep.subr.bf16.mxu0 %v4165_v46 }
  0xed   : > { %v1252_v29 = vadd.f32 %v1100_v18, %v643_v44  ;;  %v8242_v18 = vunpack.c.h.bf16 %v8241_v55  ;;  %v5743_v41 = vadd.f32 %v5308_v19, %v1251_v35  ;;  %v5749_v1 = vadd.f32 %v5313_v38, %v1253_v57  ;;  %v4164_v38 = vld [vmem:[%s7700_s2 + $0x1a0] sm:$0xff]  }
  0xee   : > { %v1109_v51 = vmul.f32 %v5727_v15, %v8244_v39  ;;  %v1106_v36 = vmul.f32 %v5727_v15, %v8245_v52  ;;  %v5755_v44 = vadd.f32 %v5318_v60, %v1250_v4  ;;  %v8247_v4 = vld [vmem:[#allocation29_spill] sm:$0xff]  ;;  %4115 = vset.pattern.permute.xlu1 %v8055_v33  ;;  %v8265_v2 = vunpack.c.h.bf16 %v8264_v22  ;;  %3951 = vmatpush3.bf16.msra.mxu1 %v4164_v38 }
  0xef   : > { %v1107_v31 = vmul.f32 %v5727_v15, %v8242_v18  ;;  %v8246_v18 = vunpack.c.l.bf16 %v8243_v7  ;;  %v5761_v35 = vadd.f32 %v5323_v30, %v1252_v29  ;;  %v8248_v52 = vunpack.c.h.bf16 %v8247_v4  ;;  %v8249_v7 = vld [vmem:[#allocation30_spill] sm:$0xff]  ;;  %8255 = vst [vmem:[#allocation29_spill] sm:$0xff] %v5802_v42  ;;  %1672 = vperm.xlu1 %4115, %v4220_v13  }
  0xf0   : > { %v1261_v60 = vadd.f32 %v1109_v51, %v5558_v34  ;;  %v8250_v30 = vunpack.c.h.bf16 %v8249_v7  ;;  %v5785_v34 = vld [vmem:[%s4411_s12 + $0x468] sm:$0xff]  ;;  %v1258_v51 = vadd.f32 %v1106_v36, %v5566_v8  ;;  %v8252_v39 = vunpack.c.l.bf16 %v8247_v4  ;;  %v8258_v36 = vld [vmem:[#allocation43_spill] sm:$0xff]  ;;  %v4169_v13 = vld [vmem:[%s7700_s2 + $0x150] sm:$0xff]  }
  0xf1   : > { %v1108_v19 = vmul.f32 %v5727_v15, %v8246_v18  ;;  %v1259_v57 = vadd.f32 %v1107_v31, %v5533_v20  ;;  %v5771_v55 = vmul.f32 %v5729_v10, %v8248_v52  ;;  %v4166_v20 = vld [vmem:[%s7700_s2 + $0x118] sm:$0xff]   ;;  %8251 = vst [vmem:[#allocation18_spill] sm:$0xff] %v5785_v34  ;;  %v8253_v47 = vunpack.c.l.bf16 %v8249_v7  ;;  %v5805_v15 = vld [vmem:[%s4411_s12 + $0x6c8] sm:$0xff]  ;;  %v8260_v7 = vld [vmem:[#allocation44_spill] sm:$0xff] }
  0xf2   : > { %v5776_v29 = vmul.f32 %v5729_v10, %v8250_v30  ;;  %v5792_v18 = vmul.f32 %v5729_v10, %v8252_v39  ;;  %v5799_v30 = vpop.permute.xlu0 %1632  ;;  %v5808_v8 = vld [vmem:[%s4411_s12 + $0x6e8] sm:$0xff]  ;;  %v8261_v39 = vunpack.c.h.bf16 %v8260_v7  ;;  %v8262_v54 = vunpack.c.l.bf16 %v8258_v36  ;;  %3877 = vmatpush3.bf16.msra.mxu0 %v4166_v20 }
  0xf3   : > { %v1260_v31 = vadd.f32 %v1108_v19, %v5571_v3  ;;  %v5797_v52 = vmul.f32 %v5729_v10, %v8253_v47  ;;  %8254 = vst [vmem:[#allocation23_spill] sm:$0xff] %v5799_v30  ;;  %8256 = vst [vmem:[#allocation30_spill] sm:$0xff] %v5808_v8  ;;  %v5811_v3 = vpop.permute.xlu1 %1620  ;;  %v8259_v19 = vunpack.c.h.bf16 %v8258_v36  ;;  %v8263_v12 = vunpack.c.l.bf16 %v8260_v7  ;;  %3878 = vmatprep.subr.bf16.mxu0 %v4169_v13  ;;  %v4172_v13 = vld [vmem:[%s7700_s2 + $0x190] sm:$0xff]   ;;  %v5979_v8 = vld [vmem:[%s4411_s12 + $0x700] sm:$0xff] }
  0xf4   : > { %8257 = vst [vmem:[#allocation120_spill] sm:$0xff] %v5811_v3  ;;  %v5821_v47 = vmul.f32 %v5799_v30, %v8261_v39  ;;  %v5826_v10 = vmul.f32 %v5799_v30, %v8262_v54  ;;  %v1716_v39 = vmul.f32 %v5811_v3, %v8265_v2  ;;  %v1718_v36 = vmul.f32 %v5811_v3, %v8267_v63  ;;  %v4168_v2 = vld [vmem:[%s7700_s2 + $0x198] sm:$0xff]  }
  0xf5   : > { %v5816_v4 = vmul.f32 %v5799_v30, %v8259_v19  ;;  %v5831_v33 = vmul.f32 %v5799_v30, %v8263_v12  ;;  %v4167_v19 = vld [vmem:[%s7700_s2 + $0x1d8] sm:$0xff]   ;;  %v8268_v54 = vunpack.c.l.bf16 %v8264_v22  ;;  %v8269_v12 = vunpack.c.l.bf16 %v8266_v50 }
  0xf6   : > { %v1868_v27 = vadd.f32 %v1716_v39, %v1259_v57  ;;  %v5858_v17 = vpop.permute.xlu0 %1640  ;;  %v8271_v38 = vunpack.c.h.bf16 %v5036_v6  ;;  %v8272_v63 = vunpack.c.h.bf16 %v5040_v40  ;;  %3952 = vmatprep.subr.bf16.mxu1 %v4167_v19  ;;  %v8276_v19 = vld [vmem:[#allocation25_spill] sm:$0xff]  ;;  %v8289_v50 = vld [vmem:[#allocation27_spill] sm:$0xff] }
  0xf7   : > { %v1715_v7 = vmul.f32 %v5811_v3, %v8268_v54  ;;  %v1717_v30 = vmul.f32 %v5811_v3, %v8269_v12  ;;  %v1870_v12 = vadd.f32 %v1718_v36, %v1261_v60  ;;  %8270 = vst [vmem:[#allocation43_spill] sm:$0xff] %v5858_v17  ;;  %v8273_v54 = vunpack.c.l.bf16 %v5036_v6  ;;  %v5880_v20 = vpop.permute.xlu1 %546  ;;  %v4170_v6 = vld [vmem:[%s7700_s2 + $0x110] sm:$0xff]   ;;  %3953 = vmatpush3.bf16.msra.mxu1 %v4168_v2 }
  0xf8   : > { %v5863_v46 = vmul.f32 %v5858_v17, %v8271_v38  ;;  %v5868_v22 = vmul.f32 %v5858_v17, %v8272_v63  ;;  %v8274_v60 = vunpack.c.l.bf16 %v5040_v40  ;;  %8275 = vst [vmem:[#allocation44_spill] sm:$0xff] %v5880_v20  ;;  %v4171_v40 = vld [vmem:[%s7700_s2 + $0x1d0] sm:$0xff]   ;;  %v4175_v38 = vld [vmem:[%s7700_s2 + $0x1c8] sm:$0xff]   ;;  %3879 = vmatpush3.bf16.msra.mxu0 %v4170_v6  ;;  %8296 = vst [vmem:[#allocation27_spill] sm:$0xff] %v5979_v8 }
  0xf9   : > { %v1867_v3 = vadd.f32 %v1715_v7, %v1258_v51  ;;  %v1869_v53 = vadd.f32 %v1717_v30, %v1260_v31  ;;  %v5873_v57 = vmul.f32 %v5858_v17, %v8273_v54  ;;  %v1996_v31 = vpack.c.bf16 %v1868_v27, %v5743_v41  ;;  %v8278_v27 = vld [vmem:[#allocation26_spill] sm:$0xff]  ;;  %v4173_v54 = vld [vmem:[%s7700_s2 + $0x148] sm:$0xff]   ;;  %3954 = vmatprep.subr.bf16.mxu1 %v4171_v40 }
  0xfa   : > { %v5878_v51 = vmul.f32 %v5858_v17, %v8274_v60  ;;  %v1998_v30 = vpack.c.bf16 %v1870_v12, %v5749_v1  ;;  %v8277_v7 = vunpack.c.h.bf16 %v8276_v19  ;;  %v8279_v41 = vunpack.c.h.bf16 %v8278_v27  ;;  %v5910_v12 = vpop.permute.xlu0 %1648  ;;  %3880 = vmatprep.subr.bf16.mxu0 %v4173_v54  ;;  %v5962_v60 = vld [vmem:[%s4411_s12 + $0x4a0] sm:$0xff]  ;;  %v8370_v8 = vld [vmem:[#allocation90_spill] sm:$0xff] }
  0xfb   : > { %v1995_v39 = vpack.c.bf16 %v1867_v3, %v5755_v44  ;;  %v1997_v36 = vpack.c.bf16 %v1869_v53, %v5761_v35  ;;  %v8280_v44 = vunpack.c.l.bf16 %v8276_v19  ;;  %v8281_v35 = vunpack.c.l.bf16 %v8278_v27  ;;  %2626 = vmatprep.mubr.bf16.mxu0 %v1996_v31  ;;  %8282 = vst [vmem:[#allocation19_spill] sm:$0xff] %v5910_v12  ;;  %3955 = vmatpush3.bf16.msra.mxu1 %v4172_v13  ;;  %v4177_v19 = vld [vmem:[%s7700_s2 + $0x140] sm:$0xff]  }
  0xfc   : > { %v658_v63 = vmul.f32 %v5880_v20, %v8277_v7  ;;  %v660_v1 = vmul.f32 %v5880_v20, %v8279_v41  ;;  %2738 = vmatprep.mubr.bf16.mxu1 %v1998_v30  ;;  %v8283_v27 = vunpack.c.h.bf16 %v5107_v14  ;;  %v8284_v30 = vunpack.c.h.bf16 %v5110_v9  ;;  %3956 = vmatprep.subr.bf16.mxu1 %v4175_v38 }
  0xfd   : > { %v657_v53 = vmul.f32 %v5880_v20, %v8280_v44  ;;  %v659_v3 = vmul.f32 %v5880_v20, %v8281_v35  ;;  %2627 = vmatmul.mubr.bf16.gmra.mxu0 %v1995_v39  ;;  %2739 = vmatmul.mubr.bf16.gmra.mxu1 %v1997_v36  ;;  %v8285_v44 = vunpack.c.l.bf16 %v5107_v14  ;;  %v8286_v39 = vunpack.c.l.bf16 %v5110_v9  ;;  %v4176_v9 = vld [vmem:[%s7700_s2 + $0x188] sm:$0xff]  }
  0xfe   : > { %v5922_v31 = vmul.f32 %v5910_v12, %v8283_v27  ;;  %v5927_v41 = vmul.f32 %v5910_v12, %v8284_v30  ;;  %v4174_v27 = vld [vmem:[%s7700_s2 + $0x108] sm:$0xff]   ;;  %v5959_v30 = vld [vmem:[%s4411_s12 + $0x240] sm:$0xff]  ;;  %v8290_v13 = vunpack.c.h.bf16 %v8289_v50  ;;  %v8293_v14 = vunpack.c.l.bf16 %v8289_v50  ;;  %v5976_v17 = vpop.permute.xlu0 %1656 }
  0xff   : > { %v5932_v35 = vmul.f32 %v5910_v12, %v8285_v44  ;;  %v5938_v36 = vmul.f32 %v5910_v12, %v8286_v39  ;;  %v5949_v39 = vpop.permute.xlu1 %1015  ;;  %8288 = vst [vmem:[#allocation25_spill] sm:$0xff] %v5959_v30  ;;  %v8291_v44 = vld [vmem:[#allocation28_spill] sm:$0xff]  ;;  %8295 = vst [vmem:[#allocation26_spill] sm:$0xff] %v5976_v17  ;;  %3881 = vmatpush3.bf16.msra.mxu0 %v4174_v27  ;;  %3957 = vmatpush3.bf16.msra.mxu1 %v4176_v9  ;;  %v8310_v27 = vld [vmem:[#allocation34_spill] sm:$0xff] }
 0x100   : > { %8287 = vst [vmem:[#allocation24_spill] sm:$0xff] %v5949_v39  ;;  %v1115_v54 = vmul.f32 %v5949_v39, %v8290_v13  ;;  %v8292_v6 = vunpack.c.h.bf16 %v8291_v44  ;;  %v1114_v7 = vmul.f32 %v5949_v39, %v8293_v14  ;;  %v8294_v2 = vunpack.c.l.bf16 %v8291_v44  ;;  %8297 = vst [vmem:[#allocation28_spill] sm:$0xff] %v5982_v32  ;;  %v4179_v13 = vld [vmem:[%s7700_s2 + $0x1c0] sm:$0xff]   ;;  %v8300_v14 = vld [vmem:[#allocation86_spill] sm:$0xff]  ;;  %3882 = vmatprep.subr.bf16.mxu0 %v4177_v19 }
 0x101   : > { %v8301_v44 = vunpack.c.h.bf16 %v8300_v14  ;;  %v8305_v34 = vunpack.c.l.bf16 %v8300_v14  ;;  %v8311_v9 = vunpack.c.h.bf16 %v8310_v27  ;;  %3958 = vmatprep.subr.bf16.mxu1 %v4179_v13  ;;  %v8316_v13 = vld [vmem:[#allocation77_spill] sm:$0xff] }
 0x102   : > { %v1117_v40 = vmul.f32 %v5949_v39, %v8292_v6  ;;  %v1116_v12 = vmul.f32 %v5949_v39, %v8294_v2  ;;  %v8298_v6 = vld [vmem:[#allocation85_spill] sm:$0xff]  ;;  %v1267_v0 = vadd.f32 %v1115_v54, %v658_v63  ;;  %v1266_v39 = vadd.f32 %v1114_v7, %v657_v53  ;;  %v4180_v53 = vld [vmem:[%s7700_s2 + $0x180] sm:$0xff]  }
 0x103   : > { %v8299_v42 = vunpack.c.h.bf16 %v8298_v6  ;;  %v5995_v2 = vmul.f32 %v5976_v17, %v8301_v44  ;;  %v8303_v38 = vunpack.c.l.bf16 %v8298_v6  ;;  %v6005_v25 = vmul.f32 %v5976_v17, %v8305_v34  ;;  %v4178_v44 = vld [vmem:[%s7700_s2 + $0x100] sm:$0xff]   ;;  %v6010_v20 = vpop.permute.xlu1 %1019  ;;  %3959 = vmatpush3.bf16.msra.mxu1 %v4180_v53  ;;  %v8371_v32 = vld [vmem:[#allocation41_spill] sm:$0xff] }
 0x104   : > { %v1269_v26 = vadd.f32 %v1117_v40, %v660_v1  ;;  %8307 = vst [vmem:[#allocation122_spill] sm:$0xff] %v6010_v20  ;;  %v1876_v19 = vadd.f32 %v5771_v55, %v1267_v0  ;;  %v1125_v40 = vmul.f32 %v6010_v20, %v8311_v9  ;;  %v1875_v63 = vadd.f32 %v5792_v18, %v1266_v39  ;;  %v6035_v0 = vpop.permute.xlu0 %581  ;;  %v6038_v55 = vld [vmem:[%s4411_s12 + $0x4a8] sm:$0xff]  ;;  %v8318_v39 = vld [vmem:[#allocation79_spill] sm:$0xff] }
 0x105   : > { %v5990_v50 = vmul.f32 %v5976_v17, %v8299_v42  ;;  %8302 = vst [vmem:[#allocation85_spill] sm:$0xff] %v5995_v2  ;;  %v6000_v45 = vmul.f32 %v5976_v17, %v8303_v38  ;;  %8306 = vst [vmem:[#allocation121_spill] sm:$0xff] %v6005_v25  ;;  %v1268_v42 = vadd.f32 %v1116_v12, %v659_v3  ;;  %v8308_v3 = vld [vmem:[#allocation32_spill] sm:$0xff]  ;;  %v8313_v1 = vunpack.c.l.bf16 %v8310_v27  ;;  %v6041_v9 = vld [vmem:[%s4411_s12 + $0x708] sm:$0xff] }
 0x106   : > { %v8309_v12 = vunpack.c.h.bf16 %v8308_v3  ;;  %v1878_v54 = vadd.f32 %v5776_v29, %v1269_v26  ;;  %v8312_v14 = vunpack.c.l.bf16 %v8308_v3  ;;  %8314 = vst [vmem:[#allocation32_spill] sm:$0xff] %v6035_v0  ;;  %8315 = vst [vmem:[#allocation34_spill] sm:$0xff] %v6041_v9  ;;  %v1277_v29 = vadd.f32 %v1125_v40, %v5581_v49  ;;  %3883 = vmatpush3.bf16.msra.mxu0 %v4178_v44 }
 0x107   : > { %8304 = vst [vmem:[#allocation86_spill] sm:$0xff] %v6000_v45  ;;  %v1124_v6 = vmul.f32 %v6010_v20, %v8313_v1  ;;  %v8317_v3 = vunpack.c.h.bf16 %v8316_v13  ;;  %v8319_v27 = vunpack.c.h.bf16 %v8318_v39  ;;  %v8321_v49 = vunpack.c.l.bf16 %v8318_v39  ;;  %v6067_v40 = vpop.permute.xlu1 %1628 }
 0x108   : > { %v1123_v7 = vmul.f32 %v6010_v20, %v8309_v12  ;;  %v1122_v38 = vmul.f32 %v6010_v20, %v8312_v14  ;;  %v1877_v12 = vadd.f32 %v5797_v52, %v1268_v42  ;;  %v8320_v14 = vunpack.c.l.bf16 %v8316_v13  ;;  %8322 = vst [vmem:[#allocation77_spill] sm:$0xff] %v6067_v40 }
 0x109   : > { %v6048_v18 = vmul.f32 %v6035_v0, %v8317_v3  ;;  %v6053_v1 = vmul.f32 %v6035_v0, %v8319_v27  ;;  %v1276_v42 = vadd.f32 %v1124_v6, %v5612_v61  ;;  %v8323_v6 = vld [vmem:[#allocation35_spill] sm:$0xff]  ;;  %v8325_v27 = vld [vmem:[#allocation36_spill] sm:$0xff]  ;;  %v8330_v61 = vunpack.c.h.bf16 %v5367_v48 }
 0x10a   : > { %v1275_v26 = vadd.f32 %v1123_v7, %v5576_v59  ;;  %v1274_v52 = vadd.f32 %v1122_v38, %v5592_v56  ;;  %v6060_v59 = vmul.f32 %v6035_v0, %v8320_v14  ;;  %v6065_v7 = vmul.f32 %v6035_v0, %v8321_v49  ;;  %v6085_v56 = vpop.permute.xlu0 %591 }
 0x10b   : > { %v8324_v38 = vunpack.c.h.bf16 %v8323_v6  ;;  %v8326_v39 = vunpack.c.h.bf16 %v8325_v27  ;;  %v8327_v53 = vunpack.c.l.bf16 %v8323_v6  ;;  %v8328_v3 = vunpack.c.l.bf16 %v8325_v27  ;;  %8329 = vst [vmem:[#allocation79_spill] sm:$0xff] %v6085_v56 }
 0x10c   : > { %v6090_v34 = vmul.f32 %v6085_v56, %v8330_v61  ;;  %v8334_v6 = vunpack.c.l.bf16 %v5367_v48  ;;  %v8336_v27 = vunpack.c.l.bf16 %v5406_v16 }
 0x10d   : > { %v1732_v13 = vmul.f32 %v6067_v40, %v8324_v38  ;;  %v1734_v14 = vmul.f32 %v6067_v40, %v8326_v39  ;;  %v1731_v49 = vmul.f32 %v6067_v40, %v8327_v53  ;;  %v1733_v44 = vmul.f32 %v6067_v40, %v8328_v3 }
 0x10e   : > { %8331 = vst [vmem:[#allocation35_spill] sm:$0xff] %v6090_v34  ;;  %v8332_v38 = vunpack.c.h.bf16 %v5406_v16  ;;  %v6100_v53 = vmul.f32 %v6085_v56, %v8334_v6  ;;  %v6105_v3 = vmul.f32 %v6085_v56, %v8336_v27  ;;  %v6112_v6 = vld [vmem:[%s4411_s12 + $0xb0] sm:$0xff] }
 0x10f   : > { %v1884_v17 = vadd.f32 %v1732_v13, %v1275_v26  ;;  %v1886_v0 = vadd.f32 %v1734_v14, %v1277_v29  ;;  %v1883_v61 = vadd.f32 %v1731_v49, %v1274_v52  ;;  %v1885_v30 = vadd.f32 %v1733_v44, %v1276_v42  ;;  %v6116_v26 = vpop.permute.xlu0 %601  ;;  %v6119_v29 = vld [vmem:[%s4411_s12 + $0x2f0] sm:$0xff]  ;;  %v8340_v52 = vld [vmem:[#allocation37_spill] sm:$0xff] }
 0x110   : > { %v6095_v39 = vmul.f32 %v6085_v56, %v8332_v38  ;;  %8335 = vst [vmem:[#allocation123_spill] sm:$0xff] %v6100_v53  ;;  %8337 = vst [vmem:[#allocation124_spill] sm:$0xff] %v6105_v3  ;;  %v6114_v53 = vpop.permute.xlu1 %556  ;;  %v8341_v42 = vunpack.c.h.bf16 %v8340_v52  ;;  %v8342_v13 = vld [vmem:[#allocation38_spill] sm:$0xff]  ;;  %v8344_v48 = vunpack.c.l.bf16 %v8340_v52  ;;  %v8354_v52 = vld [vmem:[#allocation39_spill] sm:$0xff] }
 0x111   : > { %8338 = vst [vmem:[#allocation125_spill] sm:$0xff] %v6114_v53  ;;  %v2004_v16 = vpack.c.bf16 %v1884_v17, %v1876_v19  ;;  %v2006_v27 = vpack.c.bf16 %v1886_v0, %v1878_v54  ;;  %v2003_v56 = vpack.c.bf16 %v1883_v61, %v1875_v63  ;;  %v2005_v3 = vpack.c.bf16 %v1885_v30, %v1877_v12  ;;  %v8391_v34 = vld [vmem:[#allocation46_spill] sm:$0xff] }
 0x112   : > { %8333 = vst [vmem:[#allocation36_spill] sm:$0xff] %v6095_v39  ;;  %8339 = vst [vmem:[#allocation126_spill] sm:$0xff] %v6116_v26  ;;  %v674_v44 = vmul.f32 %v6114_v53, %v8341_v42  ;;  %v8343_v14 = vunpack.c.h.bf16 %v8342_v13  ;;  %v673_v40 = vmul.f32 %v6114_v53, %v8344_v48  ;;  %v8345_v17 = vunpack.c.l.bf16 %v8342_v13  ;;  %v8356_v13 = vld [vmem:[#allocation105_spill] sm:$0xff] }
 0x113   : > { %2634 = vmatprep.mubr.bf16.mxu0 %v2004_v16  ;;  %2746 = vmatprep.mubr.bf16.mxu1 %v2006_v27  ;;  %v8346_v63 = vunpack.c.h.bf16 %v5649_v11  ;;  %v8348_v54 = vunpack.c.h.bf16 %v5693_v5  ;;  %v8350_v0 = vunpack.c.l.bf16 %v5649_v11  ;;  %v8352_v16 = vunpack.c.l.bf16 %v5693_v5 }
 0x114   : > { %v676_v49 = vmul.f32 %v6114_v53, %v8343_v14  ;;  %v675_v30 = vmul.f32 %v6114_v53, %v8345_v17  ;;  %2635 = vmatmul.mubr.bf16.gmra.mxu0 %v2003_v56  ;;  %2747 = vmatmul.mubr.bf16.gmra.mxu1 %v2005_v3  ;;  %v8355_v42 = vunpack.c.l.bf16 %v8354_v52  ;;  %v8357_v17 = vunpack.c.h.bf16 %v8354_v52  ;;  %v6173_v20 = vpop.permute.xlu1 %1023  ;;  %v8367_v53 = vld [vmem:[#allocation50_spill] sm:$0xff] }
 0x115   : > { %v6136_v19 = vmul.f32 %v6116_v26, %v8346_v63  ;;  %v6141_v12 = vmul.f32 %v6116_v26, %v8348_v54  ;;  %v6146_v61 = vmul.f32 %v6116_v26, %v8350_v0  ;;  %v6152_v27 = vmul.f32 %v6116_v26, %v8352_v16  ;;  %v8358_v54 = vld [vmem:[#allocation40_spill] sm:$0xff]  ;;  %v8361_v16 = vld [vmem:[#allocation49_spill] sm:$0xff]  ;;  %8364 = vst [vmem:[#allocation39_spill] sm:$0xff] %v6173_v20  ;;  %v8366_v63 = vld [vmem:[#allocation91_spill] sm:$0xff] }
 0x116   : > { %v613_v14 = vmul.f32 %v8356_v13, %v8355_v42  ;;  %v614_v11 = vmul.f32 %v8356_v13, %v8357_v17  ;;  %v8359_v0 = vunpack.c.l.bf16 %v8358_v54  ;;  %v8360_v3 = vunpack.c.h.bf16 %v8358_v54  ;;  %v6175_v17 = vpop.permute.xlu0 %1664 }
 0x117   : > { %8347 = vst [vmem:[#allocation37_spill] sm:$0xff] %v6136_v19  ;;  %8349 = vst [vmem:[#allocation38_spill] sm:$0xff] %v6141_v12  ;;  %v8362_v38 = vunpack.c.l.bf16 %v8361_v16  ;;  %v8363_v42 = vunpack.c.h.bf16 %v8361_v16  ;;  %v8372_v16 = vunpack.c.h.bf16 %v8371_v32  ;;  %v8386_v19 = vld [vmem:[#allocation96_spill] sm:$0xff] }
 0x118   : > { %8351 = vst [vmem:[#allocation127_spill] sm:$0xff] %v6146_v61  ;;  %8353 = vst [vmem:[#allocation128_spill] sm:$0xff] %v6152_v27  ;;  %v621_v56 = vmul.f32 %v5431_v24, %v8359_v0  ;;  %v622_v5 = vmul.f32 %v5431_v24, %v8360_v3  ;;  %v1223_v26 = vadd.f32 %v8366_v63, %v614_v11  ;;  %v8368_v0 = vunpack.c.l.bf16 %v8367_v53  ;;  %v6217_v12 = vpop.permute.xlu1 %1027 }
 0x119   : > { %v615_v48 = vmul.f32 %v8356_v13, %v8362_v38  ;;  %v616_v52 = vmul.f32 %v8356_v13, %v8363_v42  ;;  %8365 = vst [vmem:[#allocation105_spill] sm:$0xff] %v6175_v17  ;;  %v8369_v3 = vunpack.c.h.bf16 %v8367_v53  ;;  %v1222_v38 = vadd.f32 %v8370_v8, %v613_v14  ;;  %v8373_v42 = vld [vmem:[#allocation42_spill] sm:$0xff]  ;;  %8385 = vst [vmem:[#allocation90_spill] sm:$0xff] %v6217_v12 }
 0x11a   : > { %v623_v54 = vmul.f32 %v5431_v24, %v8368_v0  ;;  %v1131_v13 = vmul.f32 %v6173_v20, %v8372_v16  ;;  %v8374_v27 = vunpack.c.h.bf16 %v8373_v42  ;;  %v8375_v11 = vunpack.c.l.bf16 %v8371_v32 }
 0x11b   : > { %v624_v9 = vmul.f32 %v5431_v24, %v8369_v3  ;;  %v8376_v0 = vunpack.c.l.bf16 %v8373_v42  ;;  %v8377_v24 = vunpack.c.h.bf16 %v5708_v23  ;;  %v8379_v14 = vunpack.c.h.bf16 %v5805_v15 }
 0x11c   : > { %v1133_v61 = vmul.f32 %v6173_v20, %v8374_v27  ;;  %v1130_v63 = vmul.f32 %v6173_v20, %v8375_v11  ;;  %v8381_v27 = vunpack.c.l.bf16 %v5708_v23  ;;  %v8383_v16 = vunpack.c.l.bf16 %v5805_v15  ;;  %v8389_v23 = vld [vmem:[#allocation98_spill] sm:$0xff] }
 0x11d   : > { %v1132_v53 = vmul.f32 %v6173_v20, %v8376_v0  ;;  %v6200_v8 = vmul.f32 %v6175_v17, %v8377_v24  ;;  %v6205_v3 = vmul.f32 %v6175_v17, %v8379_v14  ;;  %v1283_v11 = vadd.f32 %v1131_v13, %v674_v44  ;;  %v8387_v14 = vld [vmem:[#allocation93_spill] sm:$0xff] }
 0x11e   : > { %v6210_v32 = vmul.f32 %v6175_v17, %v8381_v27  ;;  %v6215_v42 = vmul.f32 %v6175_v17, %v8383_v16  ;;  %v1285_v0 = vadd.f32 %v1133_v61, %v676_v49  ;;  %v1282_v20 = vadd.f32 %v1130_v63, %v673_v40  ;;  %v8390_v27 = vld [vmem:[#allocation104_spill] sm:$0xff] }
 0x11f   : > { %8378 = vst [vmem:[#allocation40_spill] sm:$0xff] %v6200_v8  ;;  %8380 = vst [vmem:[#allocation49_spill] sm:$0xff] %v6205_v3  ;;  %v1284_v24 = vadd.f32 %v1132_v53, %v675_v30  ;;  %v1231_v8 = vadd.f32 %v8386_v19, %v622_v5  ;;  %v6221_v3 = vadd.f32 %v8387_v14, %v1223_v26  ;;  %v8392_v15 = vunpack.c.h.bf16 %v8391_v34  ;;  %v8393_v49 = vld [vmem:[#allocation48_spill] sm:$0xff]  ;;  %v6233_v19 = vpop.permute.xlu0 %1063  ;;  %v6267_v14 = vpop.permute.xlu1 %1636 }
 0x120   : > { %8382 = vst [vmem:[#allocation91_spill] sm:$0xff] %v6210_v32  ;;  %8384 = vst [vmem:[#allocation50_spill] sm:$0xff] %v6215_v42  ;;  %v1225_v39 = vadd.f32 %v8389_v23, %v616_v52  ;;  %v1233_v32 = vadd.f32 %v8390_v27, %v624_v9  ;;  %v1892_v44 = vadd.f32 %v5816_v4, %v1283_v11  ;;  %v8394_v40 = vunpack.c.h.bf16 %v8393_v49  ;;  %v8407_v23 = vld [vmem:[#allocation102_spill] sm:$0xff] }
 0x121   : > { %8388 = vst [vmem:[#allocation41_spill] sm:$0xff] %v6221_v3  ;;  %v1139_v16 = vmul.f32 %v6217_v12, %v8392_v15  ;;  %v1894_v61 = vadd.f32 %v5821_v47, %v1285_v0  ;;  %8395 = vst [vmem:[#allocation42_spill] sm:$0xff] %v6233_v19  ;;  %v8396_v26 = vunpack.c.l.bf16 %v8391_v34  ;;  %v1891_v9 = vadd.f32 %v5826_v10, %v1282_v20  ;;  %v8409_v15 = vld [vmem:[#allocation107_spill] sm:$0xff] }
 0x122   : > { %v1141_v30 = vmul.f32 %v6217_v12, %v8394_v40  ;;  %v8397_v52 = vunpack.c.l.bf16 %v8393_v49  ;;  %v1893_v4 = vadd.f32 %v5831_v33, %v1284_v24  ;;  %v8398_v47 = vunpack.c.h.bf16 %v5962_v60  ;;  %8406 = vst [vmem:[#allocation46_spill] sm:$0xff] %v6267_v14  ;;  %v8414_v40 = vld [vmem:[#allocation51_spill] sm:$0xff] }
 0x123   : > { %v1138_v5 = vmul.f32 %v6217_v12, %v8396_v26  ;;  %v1291_v63 = vadd.f32 %v1139_v16, %v5617_v37  ;;  %v8400_v34 = vunpack.c.h.bf16 %v6038_v55  ;;  %v8402_v33 = vunpack.c.l.bf16 %v5962_v60  ;;  %v8413_v60 = vld [vmem:[#allocation95_spill] sm:$0xff]  ;;  %v8416_v26 = vld [vmem:[#allocation52_spill] sm:$0xff] }
 0x124   : > { %v1140_v13 = vmul.f32 %v6217_v12, %v8397_v52  ;;  %v1293_v53 = vadd.f32 %v1141_v30, %v5629_v21  ;;  %v6248_v11 = vmul.f32 %v6233_v19, %v8398_v47  ;;  %v8404_v21 = vunpack.c.l.bf16 %v6038_v55 }
 0x125   : > { %v6253_v0 = vmul.f32 %v6233_v19, %v8400_v34  ;;  %v1290_v10 = vadd.f32 %v1138_v5, %v5634_v58  ;;  %v6260_v37 = vmul.f32 %v6233_v19, %v8402_v33  ;;  %v6270_v27 = vadd.f32 %v8407_v23, %v1231_v8  ;;  %v8411_v58 = vld [vmem:[#allocation109_spill] sm:$0xff]  ;;  %v8420_v34 = vld [vmem:[#allocation92_spill] sm:$0xff] }
 0x126   : > { %8399 = vst [vmem:[#allocation96_spill] sm:$0xff] %v6248_v11  ;;  %v1292_v20 = vadd.f32 %v1140_v13, %v5639_v43  ;;  %v6265_v24 = vmul.f32 %v6233_v19, %v8404_v21  ;;  %v6273_v16 = vadd.f32 %v8409_v15, %v1225_v39  ;;  %v6276_v43 = vadd.f32 %v8411_v58, %v1233_v32  ;;  %v8422_v21 = vld [vmem:[#allocation101_spill] sm:$0xff]  ;;  %v6311_v19 = vpop.permute.xlu1 %566 }
 0x127   : > { %8401 = vst [vmem:[#allocation93_spill] sm:$0xff] %v6253_v0  ;;  %8403 = vst [vmem:[#allocation98_spill] sm:$0xff] %v6260_v37  ;;  %v1230_v49 = vadd.f32 %v8413_v60, %v621_v56  ;;  %v8415_v30 = vunpack.c.h.bf16 %v8414_v40  ;;  %v8417_v5 = vunpack.c.h.bf16 %v8416_v26  ;;  %v8418_v8 = vunpack.c.l.bf16 %v8414_v40  ;;  %v8426_v56 = vld [vmem:[#allocation53_spill] sm:$0xff] }
 0x128   : > { %8405 = vst [vmem:[#allocation104_spill] sm:$0xff] %v6265_v24  ;;  %8408 = vst [vmem:[#allocation48_spill] sm:$0xff] %v6270_v27  ;;  %v8419_v39 = vunpack.c.l.bf16 %v8416_v26  ;;  %v6296_v33 = vadd.f32 %v8420_v34, %v1222_v38  ;;  %v8424_v26 = vld [vmem:[#allocation97_spill] sm:$0xff]  ;;  %v8427_v47 = vunpack.c.h.bf16 %v8426_v56  ;;  %v6309_v34 = vld [vmem:[%s4411_s12 + $0x310] sm:$0xff] }
 0x129   : > { %8410 = vst [vmem:[#allocation102_spill] sm:$0xff] %v6273_v16  ;;  %8412 = vst [vmem:[#allocation107_spill] sm:$0xff] %v6276_v43  ;;  %v1748_v55 = vmul.f32 %v6267_v14, %v8415_v30  ;;  %v1750_v52 = vmul.f32 %v6267_v14, %v8417_v5  ;;  %v1747_v13 = vmul.f32 %v6267_v14, %v8418_v8  ;;  %v8425_v8 = vld [vmem:[#allocation103_spill] sm:$0xff]  ;;  %v8457_v30 = vld [vmem:[#allocation62_spill] sm:$0xff] }
 0x12a   : > { %v1749_v32 = vmul.f32 %v6267_v14, %v8419_v39  ;;  %8421 = vst [vmem:[#allocation109_spill] sm:$0xff] %v6296_v33  ;;  %v6299_v23 = vadd.f32 %v8422_v21, %v1230_v49  ;;  %v1224_v5 = vadd.f32 %v8424_v26, %v615_v48  ;;  %v1232_v39 = vadd.f32 %v8425_v8, %v623_v54  ;;  %v8450_v8 = vld [vmem:[#allocation66_spill] sm:$0xff]  ;;  %v6359_v16 = vpop.permute.xlu1 %1031  ;;  %v8461_v27 = vld [vmem:[#allocation63_spill] sm:$0xff]  ;;  %v8463_v24 = vld [vmem:[#allocation65_spill] sm:$0xff] }
 0x12b   : > { %v1900_v15 = vadd.f32 %v1748_v55, %v1291_v63  ;;  %v1902_v58 = vadd.f32 %v1750_v52, %v1293_v53  ;;  %v1899_v60 = vadd.f32 %v1747_v13, %v1290_v10  ;;  %v630_v38 = vmul.f32 %v5388_v62, %v8427_v47  ;;  %8428 = vst [vmem:[#allocation51_spill] sm:$0xff] %v6311_v19  ;;  %v8429_v55 = vld [vmem:[#allocation56_spill] sm:$0xff]  ;;  %v8431_v13 = vld [vmem:[#allocation57_spill] sm:$0xff] }
 0x12c   : > { %8423 = vst [vmem:[#allocation95_spill] sm:$0xff] %v6299_v23  ;;  %v1901_v40 = vadd.f32 %v1749_v32, %v1292_v20  ;;  %v6314_v20 = vld [vmem:[%s4411_s12 + $0x550] sm:$0xff]  ;;  %v8430_v52 = vunpack.c.h.bf16 %v8429_v55  ;;  %v8432_v54 = vunpack.c.h.bf16 %v8431_v13  ;;  %v8433_v47 = vunpack.c.l.bf16 %v8429_v55  ;;  %v8455_v23 = vld [vmem:[#allocation61_spill] sm:$0xff] }
 0x12d   : > { %v2012_v49 = vpack.c.bf16 %v1900_v15, %v1892_v44  ;;  %v2014_v63 = vpack.c.bf16 %v1902_v58, %v1894_v61  ;;  %v2011_v53 = vpack.c.bf16 %v1899_v60, %v1891_v9  ;;  %v8434_v26 = vunpack.c.l.bf16 %v8431_v13  ;;  %v8435_v61 = vld [vmem:[#allocation106_spill] sm:$0xff]  ;;  %v8439_v58 = vld [vmem:[#allocation59_spill] sm:$0xff]  ;;  %v8443_v13 = vld [vmem:[#allocation112_spill] sm:$0xff] }
 0x12e   : > { %v2013_v10 = vpack.c.bf16 %v1901_v40, %v1893_v4  ;;  %v690_v48 = vmul.f32 %v6311_v19, %v8430_v52  ;;  %v692_v32 = vmul.f32 %v6311_v19, %v8432_v54  ;;  %v689_v21 = vmul.f32 %v6311_v19, %v8433_v47  ;;  %v8437_v4 = vld [vmem:[#allocation108_spill] sm:$0xff]  ;;  %v8441_v55 = vld [vmem:[#allocation54_spill] sm:$0xff]  ;;  %v8446_v47 = vld [vmem:[#allocation113_spill] sm:$0xff]  ;;  %v6383_v2 = vpop.permute.xlu1 %1035 }
 0x12f   : > { %v691_v44 = vmul.f32 %v6311_v19, %v8434_v26  ;;  %2642 = vmatprep.mubr.bf16.mxu0 %v2012_v49  ;;  %2754 = vmatprep.mubr.bf16.mxu1 %v2014_v63  ;;  %v6329_v9 = vadd.f32 %v8435_v61, %v1224_v5  ;;  %v6332_v15 = vadd.f32 %v8437_v4, %v1232_v39  ;;  %v8440_v60 = vunpack.c.h.bf16 %v8439_v58  ;;  %v8444_v49 = vld [vmem:[#allocation60_spill] sm:$0xff]  ;;  %v8447_v26 = vld [vmem:[#allocation58_spill] sm:$0xff]  ;;  %v8449_v39 = vld [vmem:[#allocation87_spill] sm:$0xff] }
 0x130   : > { %2643 = vmatmul.mubr.bf16.gmra.mxu0 %v2011_v53  ;;  %2755 = vmatmul.mubr.bf16.gmra.mxu1 %v2013_v10  ;;  %v8442_v52 = vunpack.c.h.bf16 %v8441_v55  ;;  %v8445_v63 = vunpack.c.h.bf16 %v8444_v49  ;;  %v8448_v61 = vunpack.c.h.bf16 %v8447_v26  ;;  %v8451_v53 = vunpack.c.h.bf16 %v8450_v8  ;;  %v8452_v10 = vld [vmem:[#allocation115_spill] sm:$0xff] }
 0x131   : > { %8436 = vst [vmem:[#allocation52_spill] sm:$0xff] %v6329_v9  ;;  %8438 = vst [vmem:[#allocation92_spill] sm:$0xff] %v6332_v15  ;;  %v638_v40 = vmul.f32 %v5465_v28, %v8440_v60  ;;  %v8453_v19 = vld [vmem:[#allocation55_spill] sm:$0xff]  ;;  %v8456_v14 = vunpack.c.h.bf16 %v8455_v23  ;;  %v8458_v3 = vunpack.c.h.bf16 %v8457_v30  ;;  %v8462_v12 = vunpack.c.h.bf16 %v8461_v27 }
 0x132   : > { %v1087_v54 = vmul.f32 %v8443_v13, %v8442_v52  ;;  %v1095_v5 = vmul.f32 %v8446_v47, %v8445_v63  ;;  %v1696_v4 = vmul.f32 %v8449_v39, %v8448_v61  ;;  %v1704_v17 = vmul.f32 %v8452_v10, %v8451_v53  ;;  %v8459_v9 = vld [vmem:[#allocation67_spill] sm:$0xff] }
 0x133   : > { %v8454_v33 = vunpack.c.h.bf16 %v8453_v19  ;;  %v640_v63 = vmul.f32 %v5465_v28, %v8456_v14  ;;  %v1089_v60 = vmul.f32 %v8443_v13, %v8458_v3  ;;  %v8460_v15 = vunpack.c.h.bf16 %v8459_v9 }
 0x134   : > { %v1239_v61 = vadd.f32 %v1087_v54, %v630_v38  ;;  %v1247_v43 = vadd.f32 %v1095_v5, %v638_v40  ;;  %v8464_v37 = vunpack.c.h.bf16 %v8463_v24  ;;  %v8465_v0 = vunpack.c.l.bf16 %v8461_v27 }
 0x135   : > { %v632_v52 = vmul.f32 %v5388_v62, %v8454_v33  ;;  %v1097_v53 = vmul.f32 %v8446_v47, %v8460_v15  ;;  %v1147_v33 = vmul.f32 %v6359_v16, %v8462_v12  ;;  %v8466_v40 = vunpack.c.l.bf16 %v8463_v24 }
 0x136   : > { %v1149_v14 = vmul.f32 %v6359_v16, %v8464_v37  ;;  %v1146_v38 = vmul.f32 %v6359_v16, %v8465_v0  ;;  %v6379_v54 = vadd.f32 %v1696_v4, %v1239_v61  ;;  %v6381_v5 = vadd.f32 %v1704_v17, %v1247_v43  ;;  %v8467_v0 = vld [vmem:[#allocation64_spill] sm:$0xff] }
 0x137   : > { %v1148_v3 = vmul.f32 %v6359_v16, %v8466_v40  ;;  %v1241_v15 = vadd.f32 %v1089_v60, %v632_v52  ;;  %v1249_v11 = vadd.f32 %v1097_v53, %v640_v63  ;;  %v1299_v42 = vadd.f32 %v1147_v33, %v690_v48  ;;  %v8469_v40 = vld [vmem:[#allocation71_spill] sm:$0xff]  ;;  %v8474_v52 = vld [vmem:[#allocation69_spill] sm:$0xff] }
 0x138   : > { %v1301_v12 = vadd.f32 %v1149_v14, %v692_v32  ;;  %v1298_v25 = vadd.f32 %v1146_v38, %v689_v21  ;;  %v8468_v27 = vunpack.c.h.bf16 %v8467_v0  ;;  %v8470_v4 = vunpack.c.h.bf16 %v8469_v40  ;;  %v8472_v32 = vld [vmem:[#allocation68_spill] sm:$0xff] }
 0x139   : > { %v1300_v45 = vadd.f32 %v1148_v3, %v691_v44  ;;  %v8471_v43 = vunpack.c.l.bf16 %v8426_v56  ;;  %v8473_v21 = vunpack.c.h.bf16 %v8472_v32  ;;  %v1908_v60 = vadd.f32 %v5863_v46, %v1299_v42  ;;  %v8479_v42 = vld [vmem:[#allocation47_spill] sm:$0xff] }
 0x13a   : > { %v1698_v24 = vmul.f32 %v8449_v39, %v8468_v27  ;;  %v1706_v17 = vmul.f32 %v8452_v10, %v8470_v4  ;;  %v8475_v63 = vunpack.c.h.bf16 %v8474_v52  ;;  %v1910_v53 = vadd.f32 %v5868_v22, %v1301_v12  ;;  %v8478_v4 = vld [vmem:[#allocation45_spill] sm:$0xff]  ;;  %v8480_v22 = vld [vmem:[#allocation116_spill] sm:$0xff] }
 0x13b   : > { %v629_v48 = vmul.f32 %v5388_v62, %v8471_v43  ;;  %v1155_v44 = vmul.f32 %v6383_v2, %v8473_v21  ;;  %v8476_v33 = vunpack.c.l.bf16 %v8472_v32  ;;  %v1907_v56 = vadd.f32 %v5873_v57, %v1298_v25  ;;  %v8481_v32 = vld [vmem:[#allocation117_spill] sm:$0xff] }
 0x13c   : > { %v1157_v61 = vmul.f32 %v6383_v2, %v8475_v63  ;;  %v8477_v38 = vunpack.c.l.bf16 %v8474_v52  ;;  %v1909_v27 = vadd.f32 %v5878_v51, %v1300_v45  ;;  %v6414_v21 = vadd.f32 %v1698_v24, %v1241_v15  ;;  %v6426_v51 = vpop.permute.xlu1 %1644 }
 0x13d   : > { %v1154_v14 = vmul.f32 %v6383_v2, %v8476_v33  ;;  %v1307_v46 = vadd.f32 %v1155_v44, %v8478_v4  ;;  %v6416_v63 = vadd.f32 %v1706_v17, %v1249_v11  ;;  %v8482_v25 = vunpack.c.l.bf16 %v8439_v58 }
 0x13e   : > { %v1156_v3 = vmul.f32 %v6383_v2, %v8477_v38  ;;  %v1309_v43 = vadd.f32 %v1157_v61, %v8479_v42  ;;  %v8483_v52 = vunpack.c.l.bf16 %v8441_v55  ;;  %v8484_v11 = vunpack.c.l.bf16 %v8444_v49  ;;  %v8487_v55 = vld [vmem:[#allocation70_spill] sm:$0xff] }
 0x13f   : > { %v1306_v12 = vadd.f32 %v1154_v14, %v8480_v22  ;;  %v637_v57 = vmul.f32 %v5465_v28, %v8482_v25  ;;  %v8485_v17 = vunpack.c.l.bf16 %v8447_v26  ;;  %v8486_v58 = vunpack.c.l.bf16 %v8450_v8 }
 0x140   : > { %v1308_v33 = vadd.f32 %v1156_v3, %v8481_v32  ;;  %v1086_v45 = vmul.f32 %v8443_v13, %v8483_v52  ;;  %v1094_v24 = vmul.f32 %v8446_v47, %v8484_v11  ;;  %v8488_v14 = vunpack.c.h.bf16 %v8487_v55  ;;  %v8489_v3 = vld [vmem:[#allocation72_spill] sm:$0xff] }
 0x141   : > { %v1695_v44 = vmul.f32 %v8449_v39, %v8485_v17  ;;  %v1703_v61 = vmul.f32 %v8452_v10, %v8486_v58  ;;  %v8490_v4 = vunpack.c.h.bf16 %v8489_v3  ;;  %v8491_v49 = vunpack.c.l.bf16 %v8487_v55 }
 0x142   : > { %v1764_v38 = vmul.f32 %v6426_v51, %v8488_v14  ;;  %v8492_v26 = vunpack.c.l.bf16 %v8489_v3  ;;  %v1238_v8 = vadd.f32 %v1086_v45, %v629_v48  ;;  %v1246_v25 = vadd.f32 %v1094_v24, %v637_v57  ;;  %v6470_v45 = vpop.permute.xlu1 %576  ;;  %v8498_v24 = vld [vmem:[#allocation73_spill] sm:$0xff] }
 0x143   : > { %v1766_v42 = vmul.f32 %v6426_v51, %v8490_v4  ;;  %v1763_v22 = vmul.f32 %v6426_v51, %v8491_v49  ;;  %v8493_v52 = vunpack.c.l.bf16 %v8453_v19  ;;  %v8494_v17 = vunpack.c.l.bf16 %v8455_v23  ;;  %v6468_v23 = vld [vmem:[%s4411_s12 + $0x570] sm:$0xff]  ;;  %8497 = vst [vmem:[#allocation101_spill] sm:$0xff] %v6470_v45 }
 0x144   : > { %v1765_v32 = vmul.f32 %v6426_v51, %v8492_v26  ;;  %v1916_v14 = vadd.f32 %v1764_v38, %v1307_v46  ;;  %v6457_v49 = vadd.f32 %v1695_v44, %v1238_v8  ;;  %v6459_v3 = vadd.f32 %v1703_v61, %v1246_v25  ;;  %v8500_v61 = vld [vmem:[#allocation74_spill] sm:$0xff]  ;;  %v8506_v25 = vld [vmem:[#allocation81_spill] sm:$0xff] }
 0x145   : > { %v631_v11 = vmul.f32 %v5388_v62, %v8493_v52  ;;  %v639_v58 = vmul.f32 %v5465_v28, %v8494_v17  ;;  %v1918_v4 = vadd.f32 %v1766_v42, %v1309_v43  ;;  %v1915_v55 = vadd.f32 %v1763_v22, %v1306_v12  ;;  %v8508_v17 = vld [vmem:[#allocation12_spill] sm:$0xff] }
 0x146   : > { %v1917_v15 = vadd.f32 %v1765_v32, %v1308_v33  ;;  %v8495_v48 = vunpack.c.l.bf16 %v8457_v30  ;;  %v8496_v19 = vunpack.c.l.bf16 %v8459_v9  ;;  %v2020_v28 = vpack.c.bf16 %v1916_v14, %v1908_v60  ;;  %v6473_v33 = vld [vmem:[%s4411_s12 + $0xb8] sm:$0xff] }
 0x147   : > { %v2022_v46 = vpack.c.bf16 %v1918_v4, %v1910_v53  ;;  %v2019_v43 = vpack.c.bf16 %v1915_v55, %v1907_v56  ;;  %v8499_v44 = vunpack.c.h.bf16 %v8498_v24  ;;  %v8503_v42 = vunpack.c.l.bf16 %v8500_v61  ;;  %v8510_v4 = vld [vmem:[#allocation13_spill] sm:$0xff] }
 0x148   : > { %v1088_v57 = vmul.f32 %v8443_v13, %v8495_v48  ;;  %v1096_v62 = vmul.f32 %v8446_v47, %v8496_v19  ;;  %v2021_v12 = vpack.c.bf16 %v1917_v15, %v1909_v27  ;;  %v8501_v13 = vunpack.c.h.bf16 %v8500_v61  ;;  %2650 = vmatprep.mubr.bf16.mxu0 %v2020_v28  ;;  %v8512_v48 = vld [vmem:[#allocation20_spill] sm:$0xff]  ;;  %v8519_v61 = vld [vmem:[#allocation82_spill] sm:$0xff] }
 0x149   : > { %v706_v30 = vmul.f32 %v6470_v45, %v8499_v44  ;;  %v8502_v47 = vunpack.c.l.bf16 %v8498_v24  ;;  %v707_v60 = vmul.f32 %v6470_v45, %v8503_v42  ;;  %2762 = vmatprep.mubr.bf16.mxu1 %v2022_v46  ;;  %v1492_v15 = vunpack.c.h.bf16 %v6468_v23  ;;  %2651 = vmatmul.mubr.bf16.gmra.mxu0 %v2019_v43  ;;  %v6512_v46 = vpop.permute.xlu1 %1039  ;;  %v8518_v24 = vld [vmem:[#allocation120_spill] sm:$0xff]  ;;  %v8521_v42 = vld [vmem:[#allocation75_spill] sm:$0xff] }
 0x14a   : > { %v708_v9 = vmul.f32 %v6470_v45, %v8501_v13  ;;  %v1240_v56 = vadd.f32 %v1088_v57, %v631_v11  ;;  %v1248_v27 = vadd.f32 %v1096_v62, %v639_v58  ;;  %2763 = vmatmul.mubr.bf16.gmra.mxu1 %v2021_v12  ;;  %v8504_v22 = vunpack.c.l.bf16 %v8467_v0  ;;  %v8514_v57 = vld [vmem:[#allocation118_spill] sm:$0xff]  ;;  %8517 = vst [vmem:[#allocation97_spill] sm:$0xff] %v6512_v46 }
 0x14b   : > { %v705_v38 = vmul.f32 %v6470_v45, %v8502_v47  ;;  %v8505_v32 = vunpack.c.l.bf16 %v8469_v40  ;;  %v8507_v52 = vunpack.c.h.bf16 %v8506_v25  ;;  %v390_v11 = vunpack.c.h.bf16 %v6473_v33  ;;  %v8516_v62 = vld [vmem:[#allocation94_spill] sm:$0xff] }
 0x14c   : > { %v1697_v26 = vmul.f32 %v8449_v39, %v8504_v22  ;;  %v8509_v58 = vunpack.c.h.bf16 %v6112_v6  ;;  %v8511_v0 = vunpack.c.h.bf16 %v6119_v29  ;;  %v8513_v40 = vunpack.c.h.bf16 %v6309_v34 }
 0x14d   : > { %v1705_v8 = vmul.f32 %v8452_v10, %v8505_v32  ;;  %v646_v14 = vmul.f32 %v8508_v17, %v8507_v52  ;;  %v8515_v19 = vunpack.c.h.bf16 %v6314_v20  ;;  %v1720_v44 = vmul.f32 %v8518_v24, %v1492_v15  ;;  %v8523_v52 = vld [vmem:[#allocation76_spill] sm:$0xff] }
 0x14e   : > { %v654_v55 = vmul.f32 %v8510_v4, %v8509_v58  ;;  %v1103_v39 = vmul.f32 %v8512_v48, %v8511_v0  ;;  %v1111_v10 = vmul.f32 %v8514_v57, %v8513_v40  ;;  %v6514_v43 = vadd.f32 %v1697_v26, %v1240_v56  ;;  %v6535_v26 = vld [vmem:[%s4411_s12 + $0x2f8] sm:$0xff] }
 0x14f   : > { %v1712_v28 = vmul.f32 %v8516_v62, %v8515_v19  ;;  %v6516_v12 = vadd.f32 %v1705_v8, %v1248_v27  ;;  %v8520_v13 = vunpack.c.h.bf16 %v8519_v61  ;;  %v8522_v22 = vunpack.c.h.bf16 %v8521_v42  ;;  %v6538_v8 = vld [vmem:[%s4411_s12 + $0x318] sm:$0xff] }
 0x150   : > { %v8524_v58 = vunpack.c.h.bf16 %v8523_v52  ;;  %v8525_v40 = vunpack.c.l.bf16 %v8521_v42  ;;  %v8526_v27 = vunpack.c.l.bf16 %v8523_v52  ;;  %v6543_v52 = vpop.permute.xlu1 %1043  ;;  %v877_v45 = vunpack.c.h.bf16 %v6535_v26 }
 0x151   : > { %v648_v47 = vmul.f32 %v8508_v17, %v8520_v13  ;;  %v1163_v32 = vmul.f32 %v6512_v46, %v8522_v22  ;;  %v1255_v13 = vadd.f32 %v1103_v39, %v646_v14  ;;  %v1263_v22 = vadd.f32 %v1111_v10, %v654_v55  ;;  %8527 = vst [vmem:[#allocation103_spill] sm:$0xff] %v6543_v52  ;;  %v8528_v14 = vld [vmem:[#allocation78_spill] sm:$0xff]  ;;  %v6560_v10 = vld [vmem:[%s4411_s12 + $0x558] sm:$0xff] }
 0x152   : > { %v1165_v0 = vmul.f32 %v6512_v46, %v8524_v58  ;;  %v1162_v56 = vmul.f32 %v6512_v46, %v8525_v40  ;;  %v1164_v15 = vmul.f32 %v6512_v46, %v8526_v27  ;;  %v656_v58 = vmul.f32 %v8510_v4, %v390_v11 }
 0x153   : > { %v1315_v53 = vadd.f32 %v1163_v32, %v706_v30  ;;  %v6545_v27 = vadd.f32 %v1712_v28, %v1255_v13  ;;  %v6547_v46 = vadd.f32 %v1720_v44, %v1263_v22  ;;  %v885_v19 = vunpack.c.h.bf16 %v6538_v8 }
 0x154   : > { %v1317_v42 = vadd.f32 %v1165_v0, %v708_v9  ;;  %v1314_v37 = vadd.f32 %v1162_v56, %v705_v38  ;;  %v1316_v40 = vadd.f32 %v1164_v15, %v707_v60  ;;  %v8529_v39 = vunpack.c.h.bf16 %v8528_v14  ;;  %v8530_v9 = vld [vmem:[#allocation80_spill] sm:$0xff] }
 0x155   : > { %v1924_v30 = vadd.f32 %v5922_v31, %v1315_v53  ;;  %v8531_v38 = vunpack.c.h.bf16 %v8530_v9  ;;  %v8532_v28 = vunpack.c.l.bf16 %v8528_v14  ;;  %v8533_v0 = vunpack.c.l.bf16 %v8530_v9  ;;  %v6571_v53 = vld [vmem:[%s4411_s12 + $0x578] sm:$0xff] }
 0x156   : > { %v1171_v55 = vmul.f32 %v6543_v52, %v8529_v39  ;;  %v1926_v11 = vadd.f32 %v5927_v41, %v1317_v42  ;;  %v1923_v32 = vadd.f32 %v5932_v35, %v1314_v37  ;;  %v1925_v31 = vadd.f32 %v5938_v36, %v1316_v40  ;;  %v6582_v36 = vpop.permute.xlu1 %1652 }
 0x157   : > { %v1173_v60 = vmul.f32 %v6543_v52, %v8531_v38  ;;  %v1170_v44 = vmul.f32 %v6543_v52, %v8532_v28  ;;  %v1172_v56 = vmul.f32 %v6543_v52, %v8533_v0  ;;  %v1105_v22 = vmul.f32 %v8512_v48, %v877_v45  ;;  %8534 = vst [vmem:[#allocation53_spill] sm:$0xff] %v6582_v36  ;;  %v8536_v45 = vld [vmem:[#allocation83_spill] sm:$0xff] }
 0x158   : > { %v1323_v15 = vadd.f32 %v1171_v55, %v6048_v18  ;;  %v1113_v37 = vmul.f32 %v8514_v57, %v885_v19  ;;  %v1486_v14 = vunpack.c.h.bf16 %v6560_v10  ;;  %v1494_v18 = vunpack.c.h.bf16 %v6571_v53 }
 0x159   : > { %v1325_v41 = vadd.f32 %v1173_v60, %v6053_v1  ;;  %v1322_v42 = vadd.f32 %v1170_v44, %v6060_v59  ;;  %v1324_v35 = vadd.f32 %v1172_v56, %v6065_v7  ;;  %v1257_v40 = vadd.f32 %v1105_v22, %v648_v47  ;;  %v8538_v7 = vld [vmem:[#allocation84_spill] sm:$0xff] }
 0x15a   : > { %v387_v1 = vunpack.c.l.bf16 %v6112_v6  ;;  %v8535_v39 = vunpack.c.l.bf16 %v8506_v25  ;;  %v8537_v9 = vunpack.c.h.bf16 %v8536_v45  ;;  %v8539_v38 = vunpack.c.h.bf16 %v8538_v7 }
 0x15b   : > { %v8540_v60 = vunpack.c.l.bf16 %v8536_v45  ;;  %v8541_v28 = vunpack.c.l.bf16 %v8538_v7  ;;  %v1265_v44 = vadd.f32 %v1113_v37, %v656_v58  ;;  %v1714_v25 = vmul.f32 %v8516_v62, %v1486_v14 }
 0x15c   : > { %v645_v55 = vmul.f32 %v8508_v17, %v8535_v39  ;;  %v1780_v59 = vmul.f32 %v6582_v36, %v8537_v9  ;;  %v1782_v19 = vmul.f32 %v6582_v36, %v8539_v38  ;;  %v1722_v0 = vmul.f32 %v8518_v24, %v1494_v18 }
 0x15d   : > { %v1779_v47 = vmul.f32 %v6582_v36, %v8540_v60  ;;  %v1781_v6 = vmul.f32 %v6582_v36, %v8541_v28  ;;  %v653_v56 = vmul.f32 %v8510_v4, %v387_v1  ;;  %v6604_v38 = vadd.f32 %v1714_v25, %v1257_v40  ;;  %v6610_v28 = vpop.permute.xlu1 %586  ;;  %v8543_v36 = vld [vmem:[#allocation88_spill] sm:$0xff] }
 0x15e   : > { %v1932_v22 = vadd.f32 %v1780_v59, %v1323_v15  ;;  %v1934_v39 = vadd.f32 %v1782_v19, %v1325_v41  ;;  %v6606_v45 = vadd.f32 %v1722_v0, %v1265_v44  ;;  %v874_v60 = vunpack.c.l.bf16 %v6119_v29  ;;  %8542 = vst [vmem:[#allocation56_spill] sm:$0xff] %v6610_v28  ;;  %v8545_v41 = vld [vmem:[#allocation89_spill] sm:$0xff] }
 0x15f   : > { %v1931_v9 = vadd.f32 %v1779_v47, %v1322_v42  ;;  %v1933_v13 = vadd.f32 %v1781_v6, %v1324_v35  ;;  %v882_v7 = vunpack.c.l.bf16 %v6309_v34  ;;  %v8544_v1 = vunpack.c.h.bf16 %v8543_v36 }
 0x160   : > { %v2028_v58 = vpack.c.bf16 %v1932_v22, %v1924_v30  ;;  %v2030_v37 = vpack.c.bf16 %v1934_v39, %v1926_v11  ;;  %v8546_v42 = vunpack.c.h.bf16 %v8545_v41  ;;  %v8547_v40 = vunpack.c.l.bf16 %v8543_v36 }
 0x161   : > { %v2027_v14 = vpack.c.bf16 %v1931_v9, %v1923_v32  ;;  %v2029_v18 = vpack.c.bf16 %v1933_v13, %v1925_v31  ;;  %v722_v15 = vmul.f32 %v6610_v28, %v8544_v1  ;;  %v8548_v34 = vunpack.c.l.bf16 %v8545_v41  ;;  %v6637_v39 = vpop.permute.xlu1 %1047  ;;  %v8551_v9 = vld [vmem:[#allocation99_spill] sm:$0xff] }
 0x162   : > { %v724_v35 = vmul.f32 %v6610_v28, %v8546_v42  ;;  %v721_v29 = vmul.f32 %v6610_v28, %v8547_v40  ;;  %2658 = vmatprep.mubr.bf16.mxu0 %v2028_v58  ;;  %2770 = vmatprep.mubr.bf16.mxu1 %v2030_v37  ;;  %v1102_v11 = vmul.f32 %v8512_v48, %v874_v60  ;;  %v1483_v31 = vunpack.c.l.bf16 %v6314_v20 }
 0x163   : > { %v723_v59 = vmul.f32 %v6610_v28, %v8548_v34  ;;  %v1110_v32 = vmul.f32 %v8514_v57, %v882_v7  ;;  %2659 = vmatmul.mubr.bf16.gmra.mxu0 %v2027_v14  ;;  %2771 = vmatmul.mubr.bf16.gmra.mxu1 %v2029_v18  ;;  %v1491_v13 = vunpack.c.l.bf16 %v6468_v23  ;;  %v389_v36 = vunpack.c.l.bf16 %v6473_v33  ;;  %8550 = vst [vmem:[#allocation57_spill] sm:$0xff] %v6637_v39  ;;  %v8585_v34 = vld [vmem:[#allocation119_spill] sm:$0xff] }
 0x164   : > { %v8549_v19 = vunpack.c.l.bf16 %v8519_v61  ;;  %v876_v6 = vunpack.c.l.bf16 %v6535_v26  ;;  %v1254_v44 = vadd.f32 %v1102_v11, %v645_v55  ;;  %v1711_v0 = vmul.f32 %v8516_v62, %v1483_v31  ;;  %v8553_v55 = vld [vmem:[#allocation100_spill] sm:$0xff] }
 0x165   : > { %v1262_v25 = vadd.f32 %v1110_v32, %v653_v56  ;;  %v884_v22 = vunpack.c.l.bf16 %v6538_v8  ;;  %v1719_v20 = vmul.f32 %v8518_v24, %v1491_v13  ;;  %v655_v23 = vmul.f32 %v8510_v4, %v389_v36  ;;  %v6660_v40 = vpop.permute.xlu1 %1051 }
 0x166   : > { %v647_v47 = vmul.f32 %v8508_v17, %v8549_v19  ;;  %v1104_v33 = vmul.f32 %v8512_v48, %v876_v6  ;;  %v1485_v61 = vunpack.c.l.bf16 %v6560_v10  ;;  %v8552_v17 = vunpack.c.h.bf16 %v8551_v9  ;;  %8558 = vst [vmem:[#allocation108_spill] sm:$0xff] %v6660_v40  ;;  %v8563_v19 = vld [vmem:[#allocation85_spill] sm:$0xff]  ;;  %v6675_v6 = vld [vmem:[%s4411_s12 + $0xd0] sm:$0xff] }
 0x167   : > { %v8554_v56 = vunpack.c.h.bf16 %v8553_v55  ;;  %v8555_v8 = vunpack.c.l.bf16 %v8551_v9  ;;  %v8556_v58 = vunpack.c.l.bf16 %v8553_v55  ;;  %v6655_v37 = vadd.f32 %v1711_v0, %v1254_v44  ;;  %v6678_v44 = vld [vmem:[%s4411_s12 + $0xf0] sm:$0xff]  ;;  %v8569_v55 = vld [vmem:[#allocation36_spill] sm:$0xff] }
 0x168   : > { %v1179_v26 = vmul.f32 %v6637_v39, %v8552_v17  ;;  %v6657_v48 = vadd.f32 %v1719_v20, %v1262_v25  ;;  %v1112_v10 = vmul.f32 %v8514_v57, %v884_v22  ;;  %v1256_v14 = vadd.f32 %v1104_v33, %v647_v47  ;;  %v8559_v57 = vld [vmem:[#allocation110_spill] sm:$0xff]  ;;  %v8567_v20 = vld [vmem:[#allocation121_spill] sm:$0xff]  ;;  %v8568_v17 = vld [vmem:[#allocation35_spill] sm:$0xff] }
 0x169   : > { %v1181_v60 = vmul.f32 %v6637_v39, %v8554_v56  ;;  %v1178_v7 = vmul.f32 %v6637_v39, %v8555_v8  ;;  %v1180_v4 = vmul.f32 %v6637_v39, %v8556_v58  ;;  %8557 = vst [vmem:[#allocation106_spill] sm:$0xff] %v6655_v37  ;;  %v1493_v32 = vunpack.c.l.bf16 %v6571_v53  ;;  %v8565_v25 = vld [vmem:[#allocation86_spill] sm:$0xff] }
 0x16a   : > { %v1331_v18 = vadd.f32 %v1179_v26, %v722_v15  ;;  %v1264_v11 = vadd.f32 %v1112_v10, %v655_v23  ;;  %v1713_v31 = vmul.f32 %v8516_v62, %v1485_v61  ;;  %v8560_v13 = vunpack.c.h.bf16 %v8559_v57  ;;  %v6689_v33 = vld [vmem:[%s4411_s12 + $0x330] sm:$0xff] }
 0x16b   : > { %v1333_v1 = vadd.f32 %v1181_v60, %v724_v35  ;;  %v1330_v41 = vadd.f32 %v1178_v7, %v721_v29  ;;  %v1332_v42 = vadd.f32 %v1180_v4, %v723_v59  ;;  %v8561_v29 = vld [vmem:[#allocation111_spill] sm:$0xff]  ;;  %v8564_v53 = vunpack.c.l.bf16 %v8559_v57  ;;  %v6692_v61 = vld [vmem:[%s4411_s12 + $0x350] sm:$0xff]  ;;  %v8572_v4 = vld [vmem:[#allocation124_spill] sm:$0xff] }
 0x16c   : > { %v1187_v15 = vmul.f32 %v6660_v40, %v8560_v13  ;;  %v1940_v35 = vadd.f32 %v5990_v50, %v1331_v18  ;;  %v8562_v59 = vunpack.c.h.bf16 %v8561_v29  ;;  %v8566_v22 = vunpack.c.l.bf16 %v8561_v29  ;;  %v6695_v9 = vld [vmem:[%s4411_s12 + $0x590] sm:$0xff]  ;;  %v8571_v7 = vld [vmem:[#allocation123_spill] sm:$0xff] }
 0x16d   : > { %v1942_v47 = vadd.f32 %v8563_v19, %v1333_v1  ;;  %v1186_v62 = vmul.f32 %v6660_v40, %v8564_v53  ;;  %v1939_v0 = vadd.f32 %v8565_v25, %v1330_v41  ;;  %v1941_v23 = vadd.f32 %v8567_v20, %v1332_v42  ;;  %v6706_v41 = vpop.permute.xlu1 %1660  ;;  %v8582_v20 = vld [vmem:[#allocation16_spill] sm:$0xff] }
 0x16e   : > { %v1189_v36 = vmul.f32 %v6660_v40, %v8562_v59  ;;  %v1188_v50 = vmul.f32 %v6660_v40, %v8566_v22  ;;  %v1339_v26 = vadd.f32 %v1187_v15, %v8568_v17  ;;  %v1721_v60 = vmul.f32 %v8518_v24, %v1493_v32  ;;  %8573 = vst [vmem:[#allocation54_spill] sm:$0xff] %v6706_v41  ;;  %v8577_v15 = vld [vmem:[#allocation11_spill] sm:$0xff]  ;;  %v8581_v22 = vld [vmem:[#allocation44_spill] sm:$0xff] }
 0x16f   : > { %v6700_v8 = vadd.f32 %v1713_v31, %v1256_v14  ;;  %v1338_v58 = vadd.f32 %v1186_v62, %v8571_v7  ;;  %v396_v18 = vunpack.c.h.bf16 %v6675_v6  ;;  %v404_v1 = vunpack.c.h.bf16 %v6678_v44  ;;  %v8575_v14 = vld [vmem:[#allocation114_spill] sm:$0xff] }
 0x170   : > { %v1341_v56 = vadd.f32 %v1189_v36, %v8569_v55  ;;  %v1340_v10 = vadd.f32 %v1188_v50, %v8572_v4  ;;  %v6708_v42 = vadd.f32 %v1721_v60, %v1264_v11  ;;  %v891_v57 = vunpack.c.h.bf16 %v6689_v33  ;;  %v6726_v62 = vld [vmem:[%s4411_s12 + $0x5b0] sm:$0xff]  ;;  %v8583_v55 = vld [vmem:[#allocation24_spill] sm:$0xff] }
 0x171   : > { %8570 = vst [vmem:[#allocation59_spill] sm:$0xff] %v6700_v8  ;;  %v899_v13 = vunpack.c.h.bf16 %v6692_v61  ;;  %v1500_v24 = vunpack.c.h.bf16 %v6695_v9  ;;  %v8576_v32 = vunpack.c.h.bf16 %v8575_v14  ;;  %v8578_v29 = vunpack.c.h.bf16 %v8577_v15 }
 0x172   : > { %8574 = vst [vmem:[#allocation112_spill] sm:$0xff] %v6708_v42  ;;  %v8579_v36 = vunpack.c.l.bf16 %v8575_v14  ;;  %v8580_v19 = vunpack.c.l.bf16 %v8577_v15  ;;  %v662_v50 = vmul.f32 %v8581_v22, %v396_v18  ;;  %v670_v17 = vmul.f32 %v8582_v20, %v404_v1  ;;  %v8584_v15 = vld [vmem:[#allocation122_spill] sm:$0xff]  ;;  %v6737_v18 = vld [vmem:[%s4411_s12 + $0xd8] sm:$0xff] }
 0x173   : > { %v1796_v31 = vmul.f32 %v6706_v41, %v8576_v32  ;;  %v1798_v59 = vmul.f32 %v6706_v41, %v8578_v29  ;;  %v1119_v60 = vmul.f32 %v8583_v55, %v891_v57  ;;  %v1127_v29 = vmul.f32 %v8584_v15, %v899_v13  ;;  %v6740_v1 = vld [vmem:[%s4411_s12 + $0x338] sm:$0xff]  ;;  %v6742_v57 = vpop.permute.xlu1 %596 }
 0x174   : > { %v1795_v11 = vmul.f32 %v6706_v41, %v8579_v36  ;;  %v1797_v53 = vmul.f32 %v6706_v41, %v8580_v19  ;;  %v1508_v19 = vunpack.c.h.bf16 %v6726_v62  ;;  %v1728_v25 = vmul.f32 %v8585_v34, %v1500_v24  ;;  %8586 = vst [vmem:[#allocation60_spill] sm:$0xff] %v6742_v57  ;;  %v6751_v13 = vld [vmem:[%s4411_s12 + $0x598] sm:$0xff] }
 0x175   : > { %v1948_v7 = vadd.f32 %v1796_v31, %v1339_v26  ;;  %v1950_v4 = vadd.f32 %v1798_v59, %v1341_v56  ;;  %v1271_v36 = vadd.f32 %v1119_v60, %v662_v50  ;;  %v8589_v50 = vld [vmem:[#allocation22_spill] sm:$0xff] }
 0x176   : > { %v1947_v14 = vadd.f32 %v1795_v11, %v1338_v58  ;;  %v1949_v32 = vadd.f32 %v1797_v53, %v1340_v10  ;;  %v6745_v58 = vld [vmem:[%s4411_s12 + $0xf8] sm:$0xff]  ;;  %v8590_v60 = vunpack.c.h.bf16 %v8589_v50 }
 0x177   : > { %v2036_v26 = vpack.c.bf16 %v1948_v7, %v1940_v35  ;;  %v2038_v31 = vpack.c.bf16 %v1950_v4, %v1942_v47  ;;  %v6748_v10 = vld [vmem:[%s4411_s12 + $0x358] sm:$0xff]  ;;  %v8592_v47 = vunpack.c.l.bf16 %v8589_v50  ;;  %v1279_v7 = vadd.f32 %v1127_v29, %v670_v17  ;;  %v8593_v4 = vld [vmem:[#allocation77_spill] sm:$0xff] }
 0x178   : > { %v2035_v56 = vpack.c.bf16 %v1947_v14, %v1939_v0  ;;  %v2037_v59 = vpack.c.bf16 %v1949_v32, %v1941_v23  ;;  %v8587_v11 = vld [vmem:[#allocation31_spill] sm:$0xff]  ;;  %v740_v30 = vmul.f32 %v6742_v57, %v8590_v60  ;;  %v1736_v14 = vmul.f32 %v8593_v4, %v1508_v19 }
 0x179   : > { %v8588_v53 = vunpack.c.h.bf16 %v8587_v11  ;;  %v8591_v41 = vunpack.c.l.bf16 %v8587_v11  ;;  %v739_v0 = vmul.f32 %v6742_v57, %v8592_v47  ;;  %v6766_v23 = vld [vmem:[%s4411_s12 + $0x5b8] sm:$0xff]  ;;  %2666 = vmatprep.mubr.bf16.mxu0 %v2036_v26  ;;  %2778 = vmatprep.mubr.bf16.mxu1 %v2038_v31  ;;  %v6769_v32 = vadd.f32 %v1728_v25, %v1271_v36  ;;  %v6781_v36 = vpop.permute.xlu1 %1055 }
 0x17a   : > { %2667 = vmatmul.mubr.bf16.gmra.mxu0 %v2035_v56  ;;  %2779 = vmatmul.mubr.bf16.gmra.mxu1 %v2037_v59  ;;  %v406_v11 = vunpack.c.h.bf16 %v6745_v58  ;;  %v901_v50 = vunpack.c.h.bf16 %v6748_v10  ;;  %v1502_v60 = vunpack.c.h.bf16 %v6751_v13  ;;  %v6776_v47 = vadd.f32 %v1736_v14, %v1279_v7  ;;  %8594 = vst [vmem:[#allocation113_spill] sm:$0xff] %v6781_v36  ;;  %v8595_v59 = vld [vmem:[#allocation33_spill] sm:$0xff]  ;;  %v8597_v14 = vld [vmem:[#allocation18_spill] sm:$0xff] }
 0x17b   : > { %v738_v24 = vmul.f32 %v6742_v57, %v8588_v53  ;;  %v737_v35 = vmul.f32 %v6742_v57, %v8591_v41  ;;  %v398_v53 = vunpack.c.h.bf16 %v6737_v18  ;;  %v893_v41 = vunpack.c.h.bf16 %v6740_v1 }
 0x17c   : > { %v1510_v29 = vunpack.c.h.bf16 %v6766_v23  ;;  %v395_v25 = vunpack.c.l.bf16 %v6675_v6  ;;  %v672_v19 = vmul.f32 %v8582_v20, %v406_v11  ;;  %v1129_v31 = vmul.f32 %v8584_v15, %v901_v50 }
 0x17d   : > { %v664_v17 = vmul.f32 %v8581_v22, %v398_v53  ;;  %v1121_v26 = vmul.f32 %v8583_v55, %v893_v41  ;;  %v1730_v56 = vmul.f32 %v8585_v34, %v1502_v60  ;;  %v8596_v57 = vunpack.c.h.bf16 %v8595_v59 }
 0x17e   : > { %v8598_v53 = vunpack.c.h.bf16 %v8597_v14  ;;  %v8599_v6 = vunpack.c.l.bf16 %v8595_v59  ;;  %v8600_v11 = vunpack.c.l.bf16 %v8597_v14  ;;  %v1281_v28 = vadd.f32 %v1129_v31, %v672_v19  ;;  %v8605_v19 = vld [vmem:[#allocation40_spill] sm:$0xff]  ;;  %v8612_v31 = vld [vmem:[#allocation50_spill] sm:$0xff] }
 0x17f   : > { %v1195_v7 = vmul.f32 %v6781_v36, %v8596_v57  ;;  %v1273_v60 = vadd.f32 %v1121_v26, %v664_v17  ;;  %v1738_v52 = vmul.f32 %v8593_v4, %v1510_v29  ;;  %v403_v14 = vunpack.c.l.bf16 %v6678_v44 }
 0x180   : > { %v1197_v40 = vmul.f32 %v6781_v36, %v8598_v53  ;;  %v1194_v39 = vmul.f32 %v6781_v36, %v8599_v6  ;;  %v1196_v41 = vmul.f32 %v6781_v36, %v8600_v11  ;;  %v6802_v53 = vpop.permute.xlu1 %1059  ;;  %v661_v11 = vmul.f32 %v8581_v22, %v395_v25  ;;  %v8603_v36 = vld [vmem:[#allocation15_spill] sm:$0xff] }
 0x181   : > { %v1347_v57 = vadd.f32 %v1195_v7, %v738_v24  ;;  %8601 = vst [vmem:[#allocation58_spill] sm:$0xff] %v6802_v53  ;;  %v6804_v59 = vadd.f32 %v1730_v56, %v1273_v60  ;;  %v6806_v6 = vadd.f32 %v1738_v52, %v1281_v28  ;;  %v8604_v50 = vunpack.c.h.bf16 %v8603_v36  ;;  %v8606_v24 = vld [vmem:[#allocation29_spill] sm:$0xff]  ;;  %v8610_v28 = vld [vmem:[#allocation91_spill] sm:$0xff] }
 0x182   : > { %v1349_v8 = vadd.f32 %v1197_v40, %v740_v30  ;;  %v1346_v42 = vadd.f32 %v1194_v39, %v737_v35  ;;  %v1348_v37 = vadd.f32 %v1196_v41, %v739_v0  ;;  %v8607_v30 = vunpack.c.h.bf16 %v8606_v24  ;;  %v8608_v40 = vld [vmem:[#allocation49_spill] sm:$0xff] }
 0x183   : > { %8602 = vst [vmem:[#allocation87_spill] sm:$0xff] %v6804_v59  ;;  %v1203_v17 = vmul.f32 %v6802_v53, %v8604_v50  ;;  %v1956_v29 = vadd.f32 %v8605_v19, %v1347_v57  ;;  %v8609_v0 = vunpack.c.l.bf16 %v8603_v36  ;;  %v8611_v25 = vunpack.c.l.bf16 %v8606_v24  ;;  %v8613_v7 = vld [vmem:[#allocation37_spill] sm:$0xff]  ;;  %v8614_v50 = vld [vmem:[#allocation38_spill] sm:$0xff]  ;;  %v8615_v36 = vld [vmem:[#allocation127_spill] sm:$0xff] }
 0x184   : > { %v1205_v39 = vmul.f32 %v6802_v53, %v8607_v30  ;;  %v1958_v35 = vadd.f32 %v8608_v40, %v1349_v8  ;;  %v1955_v44 = vadd.f32 %v8610_v28, %v1346_v42  ;;  %v1957_v56 = vadd.f32 %v8612_v31, %v1348_v37  ;;  %v8616_v30 = vld [vmem:[#allocation128_spill] sm:$0xff]  ;;  %v8620_v31 = vld [vmem:[#allocation30_spill] sm:$0xff]  ;;  %v8624_v59 = vld [vmem:[#allocation25_spill] sm:$0xff] }
 0x185   : > { %v1202_v52 = vmul.f32 %v6802_v53, %v8609_v0  ;;  %v1204_v26 = vmul.f32 %v6802_v53, %v8611_v25  ;;  %v1355_v41 = vadd.f32 %v1203_v17, %v8613_v7  ;;  %v669_v8 = vmul.f32 %v8582_v20, %v403_v14  ;;  %v6835_v0 = vpop.permute.xlu1 %1668  ;;  %v8618_v25 = vld [vmem:[#allocation17_spill] sm:$0xff] }
 0x186   : > { %v1357_v60 = vadd.f32 %v1205_v39, %v8614_v50  ;;  %v890_v42 = vunpack.c.l.bf16 %v6689_v33  ;;  %v898_v24 = vunpack.c.l.bf16 %v6692_v61  ;;  %8617 = vst [vmem:[#allocation66_spill] sm:$0xff] %v6835_v0  ;;  %v1499_v37 = vunpack.c.l.bf16 %v6695_v9 }
 0x187   : > { %v1354_v19 = vadd.f32 %v1202_v52, %v8615_v36  ;;  %v1356_v40 = vadd.f32 %v1204_v26, %v8616_v30  ;;  %v1507_v17 = vunpack.c.l.bf16 %v6726_v62  ;;  %v397_v39 = vunpack.c.l.bf16 %v6737_v18 }
 0x188   : > { %v405_v28 = vunpack.c.l.bf16 %v6745_v58  ;;  %v8619_v14 = vunpack.c.h.bf16 %v8618_v25  ;;  %v8621_v26 = vunpack.c.h.bf16 %v8620_v31  ;;  %v8622_v61 = vunpack.c.l.bf16 %v8618_v25 }
 0x189   : > { %v8623_v9 = vunpack.c.l.bf16 %v8620_v31  ;;  %v1118_v18 = vmul.f32 %v8583_v55, %v890_v42  ;;  %v1126_v58 = vmul.f32 %v8584_v15, %v898_v24  ;;  %v1727_v50 = vmul.f32 %v8585_v34, %v1499_v37 }
 0x18a   : > { %v1812_v52 = vmul.f32 %v6835_v0, %v8619_v14  ;;  %v1814_v33 = vmul.f32 %v6835_v0, %v8621_v26  ;;  %v1811_v7 = vmul.f32 %v6835_v0, %v8622_v61  ;;  %v1735_v36 = vmul.f32 %v8593_v4, %v1507_v17 }
 0x18b   : > { %v1813_v62 = vmul.f32 %v6835_v0, %v8623_v9  ;;  %v1270_v53 = vadd.f32 %v1118_v18, %v661_v11  ;;  %v1278_v25 = vadd.f32 %v1126_v58, %v669_v8  ;;  %v663_v61 = vmul.f32 %v8581_v22, %v397_v39  ;;  %v6859_v9 = vpop.permute.xlu1 %606  ;;  %v6883_v39 = vld [vmem:[%s4411_s12 + $0x130] sm:$0xff]  ;;  %v8633_v18 = vld [vmem:[#allocation104_spill] sm:$0xff] }
 0x18c   : > { %v1964_v30 = vadd.f32 %v1812_v52, %v1355_v41  ;;  %v1966_v14 = vadd.f32 %v1814_v33, %v1357_v60  ;;  %v1963_v57 = vadd.f32 %v1811_v7, %v1354_v19  ;;  %v671_v31 = vmul.f32 %v8582_v20, %v405_v28  ;;  %v8626_v60 = vld [vmem:[#allocation28_spill] sm:$0xff]  ;;  %v8631_v52 = vld [vmem:[#allocation93_spill] sm:$0xff]  ;;  %v8632_v7 = vld [vmem:[#allocation98_spill] sm:$0xff] }
 0x18d   : > { %v1965_v26 = vadd.f32 %v1813_v62, %v1356_v40  ;;  %v8625_v17 = vunpack.c.h.bf16 %v8624_v59  ;;  %v8627_v19 = vunpack.c.h.bf16 %v8626_v60  ;;  %v8628_v22 = vunpack.c.l.bf16 %v8624_v59  ;;  %v8630_v59 = vld [vmem:[#allocation96_spill] sm:$0xff] }
 0x18e   : > { %v2044_v42 = vpack.c.bf16 %v1964_v30, %v1956_v29  ;;  %v2046_v24 = vpack.c.bf16 %v1966_v14, %v1958_v35  ;;  %v2043_v0 = vpack.c.bf16 %v1963_v57, %v1955_v44  ;;  %v8629_v8 = vunpack.c.l.bf16 %v8626_v60  ;;  %v6880_v57 = vld [vmem:[%s4411_s12 + $0x110] sm:$0xff] }
 0x18f   : > { %v2045_v37 = vpack.c.bf16 %v1965_v26, %v1957_v56  ;;  %v754_v41 = vmul.f32 %v6859_v9, %v8625_v17  ;;  %v756_v11 = vmul.f32 %v6859_v9, %v8627_v19  ;;  %v753_v20 = vmul.f32 %v6859_v9, %v8628_v22  ;;  %v8635_v26 = vld [vmem:[#allocation27_spill] sm:$0xff]  ;;  %v8641_v22 = vld [vmem:[#allocation125_spill] sm:$0xff] }
 0x190   : > { %v755_v40 = vmul.f32 %v6859_v9, %v8629_v8  ;;  %2674 = vmatprep.mubr.bf16.mxu0 %v2044_v42  ;;  %2786 = vmatprep.mubr.bf16.mxu1 %v2046_v24  ;;  %v6873_v29 = vadd.f32 %v1727_v50, %v1270_v53  ;;  %v6875_v35 = vadd.f32 %v1735_v36, %v1278_v25  ;;  %v892_v44 = vunpack.c.l.bf16 %v6740_v1  ;;  %v8652_v1 = vld [vmem:[#allocation46_spill] sm:$0xff] }
 0x191   : > { %v900_v56 = vunpack.c.l.bf16 %v6748_v10  ;;  %2675 = vmatmul.mubr.bf16.gmra.mxu0 %v2043_v0  ;;  %2787 = vmatmul.mubr.bf16.gmra.mxu1 %v2045_v37  ;;  %v1363_v28 = vadd.f32 %v8630_v59, %v754_v41  ;;  %v1365_v33 = vadd.f32 %v8631_v52, %v756_v11  ;;  %v1362_v53 = vadd.f32 %v8632_v7, %v753_v20  ;;  %v6894_v0 = vpop.permute.xlu1 %1672  ;;  %v6913_v41 = vld [vmem:[%s4411_s12 + $0x370] sm:$0xff]  ;;  %v6922_v7 = vld [vmem:[%s4411_s12 + $0x118] sm:$0xff] }
 0x192   : > { %v1501_v62 = vunpack.c.l.bf16 %v6751_v13  ;;  %v1364_v58 = vadd.f32 %v8633_v18, %v755_v40  ;;  %v1120_v10 = vmul.f32 %v8583_v55, %v892_v44  ;;  %8634 = vst [vmem:[#allocation115_spill] sm:$0xff] %v6894_v0  ;;  %v1509_v36 = vunpack.c.l.bf16 %v6766_v23  ;;  %v8637_v55 = vld [vmem:[#allocation34_spill] sm:$0xff] }
 0x193   : > { %v1128_v50 = vmul.f32 %v8584_v15, %v900_v56  ;;  %v412_v14 = vunpack.c.h.bf16 %v6880_v57  ;;  %v420_v13 = vunpack.c.h.bf16 %v6883_v39  ;;  %v8636_v25 = vunpack.c.h.bf16 %v8635_v26  ;;  %v3420_v59 = vld [vmem:[%s4411_s12 + $0x390] sm:$0xff] }
 0x194   : > { %v1729_v30 = vmul.f32 %v8585_v34, %v1501_v62  ;;  %v8638_v24 = vunpack.c.h.bf16 %v8637_v55  ;;  %v8639_v37 = vunpack.c.l.bf16 %v8635_v26  ;;  %v8640_v34 = vunpack.c.l.bf16 %v8637_v55  ;;  %v6919_v52 = vld [vmem:[%s4411_s12 + $0x5d0] sm:$0xff]  ;;  %v6947_v55 = vld [vmem:[%s4411_s12 + $0x5d8] sm:$0xff] }
 0x195   : > { %v1820_v42 = vmul.f32 %v6894_v0, %v8636_v25  ;;  %v1272_v60 = vadd.f32 %v1120_v10, %v663_v61  ;;  %v1280_v19 = vadd.f32 %v1128_v50, %v671_v31  ;;  %v1737_v11 = vmul.f32 %v8593_v4, %v1509_v36  ;;  %v8642_v31 = vld [vmem:[#allocation14_spill] sm:$0xff]  ;;  %v8643_v25 = vld [vmem:[#allocation39_spill] sm:$0xff] }
 0x196   : > { %v1822_v15 = vmul.f32 %v6894_v0, %v8638_v24  ;;  %v1819_v23 = vmul.f32 %v6894_v0, %v8639_v37  ;;  %v1821_v17 = vmul.f32 %v6894_v0, %v8640_v34  ;;  %v678_v20 = vmul.f32 %v8641_v22, %v412_v14  ;;  %v6931_v10 = vld [vmem:[%s4411_s12 + $0x5f0] sm:$0xff]  ;;  %v6940_v14 = vld [vmem:[%s4411_s12 + $0x398] sm:$0xff] }
 0x197   : > { %v1972_v8 = vadd.f32 %v1820_v42, %v1363_v28  ;;  %v6924_v62 = vadd.f32 %v1729_v30, %v1272_v60  ;;  %v6926_v61 = vadd.f32 %v1737_v11, %v1280_v19  ;;  %v686_v18 = vmul.f32 %v8642_v31, %v420_v13  ;;  %v6934_v28 = vld [vmem:[%s4411_s12 + $0x138] sm:$0xff]  ;;  %v8644_v34 = vld [vmem:[#allocation90_spill] sm:$0xff] }
 0x198   : > { %v1974_v40 = vadd.f32 %v1822_v15, %v1365_v33  ;;  %v1971_v44 = vadd.f32 %v1819_v23, %v1362_v53  ;;  %v1973_v56 = vadd.f32 %v1821_v17, %v1364_v58  ;;  %v907_v4 = vunpack.c.h.bf16 %v6913_v41  ;;  %v6937_v33 = vld [vmem:[%s4411_s12 + $0x378] sm:$0xff] }
 0x199   : > { %v2052_v53 = vpack.c.bf16 %v1972_v8, %v1972_v8  ;;  %v915_v26 = vunpack.c.h.bf16 %v3420_v59  ;;  %v1516_v42 = vunpack.c.h.bf16 %v6919_v52  ;;  %v1524_v24 = vunpack.c.h.bf16 %v6931_v10  ;;  %v8645_v19 = vld [vmem:[#allocation23_spill] sm:$0xff] }
 0x19a   : > { %v2054_v58 = vpack.c.bf16 %v1974_v40, %v1974_v40  ;;  %v2051_v50 = vpack.c.bf16 %v1971_v44, %v1971_v44  ;;  %v2053_v36 = vpack.c.bf16 %v1973_v56, %v1973_v56  ;;  %v1135_v13 = vmul.f32 %v8643_v25, %v907_v4  ;;  %v6957_v40 = vld [vmem:[%s4411_s12 + $0x5f8] sm:$0xff]  ;;  %v8646_v44 = vld [vmem:[#allocation48_spill] sm:$0xff]  ;;  %v8647_v56 = vld [vmem:[#allocation41_spill] sm:$0xff] }
 0x19b   : > { %2682 = vmatprep.mubr.bf16.mxu0 %v2052_v53  ;;  %v414_v15 = vunpack.c.h.bf16 %v6922_v7  ;;  %v422_v37 = vunpack.c.h.bf16 %v6934_v28  ;;  %v909_v23 = vunpack.c.h.bf16 %v6937_v33  ;;  %v1143_v17 = vmul.f32 %v8644_v34, %v915_v26  ;;  %v8649_v53 = vld [vmem:[#allocation107_spill] sm:$0xff] }
 0x19c   : > { %2794 = vmatprep.mubr.bf16.mxu1 %v2054_v58  ;;  %2683 = vmatmul.mubr.bf16.gmra.mxu0 %v2051_v50  ;;  %v1287_v60 = vadd.f32 %v1135_v13, %v678_v20  ;;  %v1744_v11 = vmul.f32 %v8645_v19, %v1516_v42  ;;  %v917_v8 = vunpack.c.h.bf16 %v6940_v14  ;;  %v8648_v4 = vpack.c.bf16 %v8646_v44, %v8647_v56  ;;  %v8650_v58 = vld [vmem:[#allocation102_spill] sm:$0xff] }
 0x19d   : > { %2795 = vmatmul.mubr.bf16.gmra.mxu1 %v2053_v36  ;;  %v8651_v30 = vpack.c.bf16 %v8649_v53, %v8650_v58  ;;  %v1752_v50 = vmul.f32 %v8652_v1, %v1524_v24  ;;  %v680_v36 = vmul.f32 %v8641_v22, %v414_v15  ;;  %v688_v20 = vmul.f32 %v8642_v31, %v422_v37 }
 0x19e   : > { %2834 = vmatprep.mubr.bf16.mxu0 %v8648_v4  ;;  %v1518_v26 = vunpack.c.h.bf16 %v6947_v55  ;;  %v1295_v13 = vadd.f32 %v1143_v17, %v686_v18  ;;  %v6969_v42 = vadd.f32 %v1744_v11, %v1287_v60  ;;  %v1137_v0 = vmul.f32 %v8643_v25, %v909_v23 }
 0x19f   : > { %2946 = vmatprep.mubr.bf16.mxu1 %v8651_v30  ;;  %v1145_v44 = vmul.f32 %v8644_v34, %v917_v8  ;;  %v1526_v56 = vunpack.c.h.bf16 %v6957_v40  ;;  %v411_v30 = vunpack.c.l.bf16 %v6880_v57  ;;  %v419_v24 = vunpack.c.l.bf16 %v6883_v39 }
 0x1a0   : > { %v1746_v4 = vmul.f32 %v8645_v19, %v1518_v26  ;;  %v6977_v15 = vadd.f32 %v1752_v50, %v1295_v13  ;;  %v1289_v37 = vadd.f32 %v1137_v0, %v680_v36  ;;  %v906_v18 = vunpack.c.l.bf16 %v6913_v41  ;;  %v8653_v36 = vld [vmem:[#allocation95_spill] sm:$0xff]  ;;  %v8656_v13 = vld [vmem:[#allocation92_spill] sm:$0xff] }
 0x1a1   : > { %v1297_v53 = vadd.f32 %v1145_v44, %v688_v20  ;;  %v1754_v17 = vmul.f32 %v8652_v1, %v1526_v56  ;;  %v677_v23 = vmul.f32 %v8641_v22, %v411_v30  ;;  %v685_v60 = vmul.f32 %v8642_v31, %v419_v24  ;;  %v8654_v20 = vld [vmem:[#allocation109_spill] sm:$0xff]  ;;  %v8657_v44 = vld [vmem:[#allocation52_spill] sm:$0xff] }
 0x1a2   : > { %v914_v11 = vunpack.c.l.bf16 %v3420_v59  ;;  %v2016_v8 = vpack.c.bf16 %v6977_v15, %v6969_v42  ;;  %v6985_v58 = vadd.f32 %v1746_v4, %v1289_v37  ;;  %v1134_v57 = vmul.f32 %v8643_v25, %v906_v18 }
 0x1a3   : > { %v1515_v39 = vunpack.c.l.bf16 %v6919_v52  ;;  %v6989_v0 = vadd.f32 %v1754_v17, %v1297_v53  ;;  %v1523_v50 = vunpack.c.l.bf16 %v6931_v10  ;;  %v413_v59 = vunpack.c.l.bf16 %v6922_v7 }
 0x1a4   : > { %v1142_v41 = vmul.f32 %v8644_v34, %v914_v11  ;;  %v8655_v26 = vpack.c.bf16 %v8653_v36, %v8654_v20  ;;  %v8658_v56 = vpack.c.bf16 %v8656_v13, %v8657_v44  ;;  %v1286_v52 = vadd.f32 %v1134_v57, %v677_v23  ;;  %v7049_v20 = vld [vmem:[%s4411_s12 + $0x158] sm:$0xff] }
 0x1a5   : > { %v1743_v4 = vmul.f32 %v8645_v19, %v1515_v39  ;;  %v421_v30 = vunpack.c.l.bf16 %v6934_v28  ;;  %v908_v24 = vunpack.c.l.bf16 %v6937_v33  ;;  %v8659_v10 = vpack.c.bf16 %v6381_v5, %v6379_v54  ;;  %v7014_v28 = vld [vmem:[%s4411_s12 + $0x150] sm:$0xff]  ;;  %v8661_v13 = vld [vmem:[#allocation51_spill] sm:$0xff] }
 0x1a6   : > { %2835 = vmatmul.mubr.bf16.vlgmr.msra.gmra.mxu0 %v8655_v26  ;;  %2947 = vmatmul.mubr.bf16.vlgmr.msra.gmra.mxu1 %v8658_v56  ;;  %v8660_v7 = vpack.c.bf16 %v6416_v63, %v6414_v21  ;;  %v2018_v37 = vpack.c.bf16 %v6989_v0, %v6985_v58  ;;  %v1294_v53 = vadd.f32 %v1142_v41, %v685_v60  ;;  %v916_v17 = vunpack.c.l.bf16 %v6940_v14  ;;  %v7017_v33 = vld [vmem:[%s4411_s12 + $0x170] sm:$0xff]  ;;  %v7052_v26 = vld [vmem:[%s4411_s12 + $0x178] sm:$0xff]  ;;  %v8662_v56 = vld [vmem:[#allocation21_spill] sm:$0xff] }
 0x1a7   : > { %2842 = vmatprep.mubr.bf16.mxu0 %v8659_v10  ;;  %v1751_v18 = vmul.f32 %v8652_v1, %v1523_v50  ;;  %v7020_v54 = vld [vmem:[%s4411_s12 + $0x3b0] sm:$0xff]  ;;  %v7022_v5 = vadd.f32 %v1743_v4, %v1286_v52  ;;  %v679_v21 = vmul.f32 %v8641_v22, %v413_v59  ;;  %v687_v63 = vmul.f32 %v8642_v31, %v421_v30 }
 0x1a8   : > { %2954 = vmatprep.mubr.bf16.mxu1 %v8660_v7  ;;  %v1136_v23 = vmul.f32 %v8643_v25, %v908_v24  ;;  %v1144_v14 = vmul.f32 %v8644_v34, %v916_v17  ;;  %v1517_v11 = vunpack.c.l.bf16 %v6947_v55  ;;  %v1525_v57 = vunpack.c.l.bf16 %v6957_v40  ;;  %v7033_v39 = vld [vmem:[%s4411_s12 + $0x3d0] sm:$0xff]  ;;  %v7059_v24 = vld [vmem:[%s4411_s12 + $0x3b8] sm:$0xff] }
 0x1a9   : > { %v7027_v60 = vadd.f32 %v1751_v18, %v1294_v53  ;;  %v428_v22 = vunpack.c.h.bf16 %v7014_v28  ;;  %v436_v31 = vunpack.c.h.bf16 %v7017_v33  ;;  %v923_v25 = vunpack.c.h.bf16 %v7020_v54  ;;  %v7039_v50 = vld [vmem:[%s4411_s12 + $0x610] sm:$0xff]  ;;  %v7068_v53 = vld [vmem:[%s4411_s12 + $0x3d8] sm:$0xff] }
 0x1aa   : > { %v1288_v41 = vadd.f32 %v1136_v23, %v679_v21  ;;  %v7042_v59 = vld [vmem:[%s4411_s12 + $0x630] sm:$0xff]  ;;  %v1296_v34 = vadd.f32 %v1144_v14, %v687_v63  ;;  %v1745_v40 = vmul.f32 %v8645_v19, %v1517_v11  ;;  %v1753_v36 = vmul.f32 %v8652_v1, %v1525_v57  ;;  %v7080_v11 = vld [vmem:[%s4411_s12 + $0x618] sm:$0xff] }
 0x1ab   : > { %v2015_v55 = vpack.c.bf16 %v7027_v60, %v7022_v5  ;;  %v694_v44 = vmul.f32 %v8661_v13, %v428_v22  ;;  %v702_v52 = vmul.f32 %v8662_v56, %v436_v31  ;;  %v931_v4 = vunpack.c.h.bf16 %v7033_v39  ;;  %v7083_v57 = vld [vmem:[%s4411_s12 + $0x638] sm:$0xff] }
 0x1ac   : > { %v1151_v30 = vmul.f32 %v6359_v16, %v923_v25  ;;  %v7061_v10 = vadd.f32 %v1745_v40, %v1288_v41  ;;  %v7063_v19 = vadd.f32 %v1753_v36, %v1296_v34  ;;  %v1532_v1 = vunpack.c.h.bf16 %v7039_v50 }
 0x1ad   : > { %v1540_v7 = vunpack.c.h.bf16 %v7042_v59  ;;  %v8663_v18 = vpack.c.bf16 %v6459_v3, %v6457_v49  ;;  %v8664_v17 = vpack.c.bf16 %v6516_v12, %v6514_v43  ;;  %v1159_v21 = vmul.f32 %v6383_v2, %v931_v4  ;;  %v8667_v43 = vld [vmem:[#allocation43_spill] sm:$0xff] }
 0x1ae   : > { %v1303_v63 = vadd.f32 %v1151_v30, %v694_v44  ;;  %v430_v23 = vunpack.c.h.bf16 %v7049_v20  ;;  %v438_v14 = vunpack.c.h.bf16 %v7052_v26  ;;  %v8665_v41 = vpack.c.bf16 %v6547_v46, %v6545_v27 }
 0x1af   : > { %2843 = vmatmul.mubr.bf16.gmra.mxu0 %v8663_v18  ;;  %2955 = vmatmul.mubr.bf16.gmra.mxu1 %v8664_v17  ;;  %v8666_v49 = vpack.c.bf16 %v6606_v45, %v6604_v38  ;;  %v2017_v3 = vpack.c.bf16 %v7063_v19, %v7061_v10  ;;  %v1760_v12 = vmul.f32 %v8667_v43, %v1532_v1  ;;  %v925_v31 = vunpack.c.h.bf16 %v7059_v24  ;;  %v7269_v19 = vld [vmem:[%s7701_s3] ss:$0 sm:$0xff] }
 0x1b0   : > { %2850 = vmatprep.mubr.bf16.mxu0 %v8665_v41  ;;  %v1768_v22 = vmul.f32 %v6426_v51, %v1540_v7  ;;  %v1311_v25 = vadd.f32 %v1159_v21, %v702_v52  ;;  %v696_v34 = vmul.f32 %v8661_v13, %v430_v23  ;;  %v704_v40 = vmul.f32 %v8662_v56, %v438_v14 }
 0x1b1   : > { %2962 = vmatprep.mubr.bf16.mxu1 %v8666_v49  ;;  %v933_v46 = vunpack.c.h.bf16 %v7068_v53  ;;  %v7099_v27 = vadd.f32 %v1760_v12, %v1303_v63  ;;  %v1153_v38 = vmul.f32 %v6359_v16, %v925_v31  ;;  %v1534_v45 = vunpack.c.h.bf16 %v7080_v11  ;;  %v8671_v31 = vld [vmem:[#allocation59_spill] sm:$0xff] }
 0x1b2   : > { %v1542_v36 = vunpack.c.h.bf16 %v7083_v57  ;;  %v7104_v44 = vadd.f32 %v1768_v22, %v1311_v25  ;;  %v427_v52 = vunpack.c.l.bf16 %v7014_v28  ;;  %v435_v30 = vunpack.c.l.bf16 %v7017_v33  ;;  %v8670_v22 = vld [vmem:[#allocation112_spill] sm:$0xff] }
 0x1b3   : > { %v1161_v4 = vmul.f32 %v6383_v2, %v933_v46  ;;  %v1305_v1 = vadd.f32 %v1153_v38, %v696_v34  ;;  %v1762_v7 = vmul.f32 %v8667_v43, %v1534_v45  ;;  %v922_v17 = vunpack.c.l.bf16 %v7020_v54  ;;  %v8668_v54 = vld [vmem:[#allocation106_spill] sm:$0xff] }
 0x1b4   : > { %v1770_v18 = vmul.f32 %v6426_v51, %v1542_v36  ;;  %v2024_v21 = vpack.c.bf16 %v7104_v44, %v7099_v27  ;;  %v693_v23 = vmul.f32 %v8661_v13, %v427_v52  ;;  %v701_v14 = vmul.f32 %v8662_v56, %v435_v30  ;;  %v7153_v30 = vld [vmem:[%s4411_s12 + $0x3f0] sm:$0xff] }
 0x1b5   : > { %v1313_v63 = vadd.f32 %v1161_v4, %v704_v40  ;;  %v7116_v41 = vadd.f32 %v1762_v7, %v1305_v1  ;;  %v930_v28 = vunpack.c.l.bf16 %v7033_v39  ;;  %v1150_v33 = vmul.f32 %v6359_v16, %v922_v17 }
 0x1b6   : > { %v1531_v49 = vunpack.c.l.bf16 %v7039_v50  ;;  %v8669_v12 = vpack.c.bf16 %v6657_v48, %v8668_v54  ;;  %v8672_v25 = vpack.c.bf16 %v8670_v22, %v8671_v31  ;;  %v1539_v40 = vunpack.c.l.bf16 %v7042_v59  ;;  %v8674_v48 = vld [vmem:[#allocation87_spill] sm:$0xff]  ;;  %v7142_v59 = vld [vmem:[%s4411_s12 + $0x190] sm:$0xff]  ;;  %v8677_v31 = vld [vmem:[#allocation32_spill] sm:$0xff] }
 0x1b7   : > { %v7127_v34 = vadd.f32 %v1770_v18, %v1313_v63  ;;  %v429_v39 = vunpack.c.l.bf16 %v7049_v20  ;;  %v437_v46 = vunpack.c.l.bf16 %v7052_v26  ;;  %v8673_v50 = vpack.c.bf16 %v6776_v47, %v6769_v32  ;;  %v7145_v20 = vld [vmem:[%s4411_s12 + $0x1b0] sm:$0xff] }
 0x1b8   : > { %2851 = vmatmul.mubr.bf16.gmra.mxu0 %v8669_v12  ;;  %2963 = vmatmul.mubr.bf16.gmra.mxu1 %v8672_v25  ;;  %v8675_v38 = vpack.c.bf16 %v6806_v6, %v8674_v48  ;;  %v1158_v45 = vmul.f32 %v6383_v2, %v930_v28  ;;  %v1302_v36 = vadd.f32 %v1150_v33, %v693_v23  ;;  %v924_v52 = vunpack.c.l.bf16 %v7059_v24  ;;  %v7164_v23 = vld [vmem:[%s4411_s12 + $0x410] sm:$0xff]  ;;  %v8676_v12 = vld [vmem:[#allocation101_spill] sm:$0xff] }
 0x1b9   : > { %2858 = vmatprep.mubr.bf16.mxu0 %v8673_v50  ;;  %v1759_v4 = vmul.f32 %v8667_v43, %v1531_v49  ;;  %v2026_v32 = vpack.c.bf16 %v7127_v34, %v7116_v41  ;;  %v1767_v47 = vmul.f32 %v6426_v51, %v1539_v40  ;;  %v695_v6 = vmul.f32 %v8661_v13, %v429_v39  ;;  %v7177_v49 = vld [vmem:[%s4411_s12 + $0x198] sm:$0xff]  ;;  %v8678_v50 = vld [vmem:[#allocation97_spill] sm:$0xff] }
 0x1ba   : > { %2970 = vmatprep.mubr.bf16.mxu1 %v8675_v38  ;;  %v703_v26 = vmul.f32 %v8662_v56, %v437_v46  ;;  %v1310_v24 = vadd.f32 %v1158_v45, %v701_v14  ;;  %v932_v7 = vunpack.c.l.bf16 %v7068_v53  ;;  %v1152_v18 = vmul.f32 %v6359_v16, %v924_v52  ;;  %v7171_v16 = vld [vmem:[%s4411_s12 + $0x650] sm:$0xff]  ;;  %v7184_v40 = vld [vmem:[%s4411_s12 + $0x1b8] sm:$0xff] }
 0x1bb   : > { %v7155_v1 = vadd.f32 %v1759_v4, %v1302_v36  ;;  %v1533_v17 = vunpack.c.l.bf16 %v7080_v11  ;;  %v1541_v63 = vunpack.c.l.bf16 %v7083_v57  ;;  %v444_v13 = vunpack.c.h.bf16 %v7142_v59  ;;  %v7174_v11 = vld [vmem:[%s4411_s12 + $0x670] sm:$0xff] }
 0x1bc   : > { %v452_v56 = vunpack.c.h.bf16 %v7145_v20  ;;  %v7166_v28 = vadd.f32 %v1767_v47, %v1310_v24  ;;  %v1160_v14 = vmul.f32 %v6383_v2, %v932_v7  ;;  %v1304_v33 = vadd.f32 %v1152_v18, %v695_v6  ;;  %v7205_v47 = vld [vmem:[%s4411_s12 + $0x418] sm:$0xff] }
 0x1bd   : > { %v939_v53 = vunpack.c.h.bf16 %v7153_v30  ;;  %v1761_v57 = vmul.f32 %v8667_v43, %v1533_v17  ;;  %v1769_v54 = vmul.f32 %v6426_v51, %v1541_v63  ;;  %v710_v22 = vmul.f32 %v8676_v12, %v444_v13  ;;  %v7191_v43 = vld [vmem:[%s4411_s12 + $0x3f8] sm:$0xff]  ;;  %v8683_v17 = vld [vmem:[#allocation53_spill] sm:$0xff] }
 0x1be   : > { %v718_v25 = vmul.f32 %v8677_v31, %v452_v56  ;;  %v2023_v2 = vpack.c.bf16 %v7166_v28, %v7155_v1  ;;  %v1312_v39 = vadd.f32 %v1160_v14, %v703_v26  ;;  %v947_v46 = vunpack.c.h.bf16 %v7164_v23  ;;  %v7218_v26 = vld [vmem:[%s4411_s12 + $0x658] sm:$0xff] }
 0x1bf   : > { %v1167_v48 = vmul.f32 %v8678_v50, %v939_v53  ;;  %v8679_v51 = vpack.c.bf16 %v6875_v35, %v6873_v29  ;;  %v8680_v38 = vpack.c.bf16 %v6926_v61, %v6924_v62  ;;  %v7199_v45 = vadd.f32 %v1761_v57, %v1304_v33  ;;  %v8681_v35 = vld [vmem:[#allocation103_spill] sm:$0xff] }
 0x1c0   : > { %v1548_v36 = vunpack.c.h.bf16 %v7171_v16  ;;  %v1556_v4 = vunpack.c.h.bf16 %v7174_v11  ;;  %v446_v52 = vunpack.c.h.bf16 %v7177_v49  ;;  %v7213_v29 = vadd.f32 %v1769_v54, %v1312_v39  ;;  %v7221_v24 = vld [vmem:[%s4411_s12 + $0x678] sm:$0xff] }
 0x1c1   : > { %2859 = vmatmul.mubr.bf16.gmra.mxu0 %v8679_v51  ;;  %2971 = vmatmul.mubr.bf16.gmra.mxu1 %v8680_v38  ;;  %v1175_v62 = vmul.f32 %v8681_v35, %v947_v46  ;;  %v1319_v61 = vadd.f32 %v1167_v48, %v710_v22  ;;  %v454_v6 = vunpack.c.h.bf16 %v7184_v40  ;;  %v8682_v7 = vld [vmem:[#allocation19_spill] sm:$0xff]  ;;  %v949_v63 = vunpack.c.h.bf16 %v7205_v47 }
 0x1c2   : > { %2866 = vmatprep.mubr.bf16.mxu0 %v2016_v8  ;;  %2978 = vmatprep.mubr.bf16.mxu1 %v2018_v37  ;;  %v1776_v18 = vmul.f32 %v8682_v7, %v1548_v36  ;;  %v1784_v42 = vmul.f32 %v8683_v17, %v1556_v4  ;;  %v712_v15 = vmul.f32 %v8676_v12, %v446_v52  ;;  %v941_v8 = vunpack.c.h.bf16 %v7191_v43  ;;  %v3732_v52 = vpop.f32.mrf.mxu0 }
 0x1c3   : > { %v2025_v58 = vpack.c.bf16 %v7213_v29, %v7199_v45  ;;  %v1327_v0 = vadd.f32 %v1175_v62, %v718_v25  ;;  %v720_v37 = vmul.f32 %v8677_v31, %v454_v6  ;;  %v1550_v14 = vunpack.c.h.bf16 %v7218_v26  ;;  %v3808_v62 = vpop.f32.mrf.mxu1 }
 0x1c4   : > { %v7231_v13 = vadd.f32 %v1776_v18, %v1319_v61  ;;  %v1169_v56 = vmul.f32 %v8678_v50, %v941_v8  ;;  %v1558_v33 = vunpack.c.h.bf16 %v7221_v24  ;;  %v1177_v57 = vmul.f32 %v8681_v35, %v949_v63 }
 0x1c5   : > { %v7236_v53 = vadd.f32 %v1784_v42, %v1327_v0  ;;  %v443_v54 = vunpack.c.l.bf16 %v7142_v59  ;;  %v451_v22 = vunpack.c.l.bf16 %v7145_v20  ;;  %v1778_v39 = vmul.f32 %v8682_v7, %v1550_v14  ;;  %v3809_v27 = vpop.f32.mrf.mxu1 }
 0x1c6   : > { %v1321_v25 = vadd.f32 %v1169_v56, %v712_v15  ;;  %v1786_v46 = vmul.f32 %v8683_v17, %v1558_v33  ;;  %v938_v48 = vunpack.c.l.bf16 %v7153_v30  ;;  %v1329_v38 = vadd.f32 %v1177_v57, %v720_v37  ;;  %v7290_v56 = vld [vmem:[%s4411_s12 + $0x430] sm:$0xff] }
 0x1c7   : > { %v2032_v51 = vpack.c.bf16 %v7236_v53, %v7231_v13  ;;  %v709_v36 = vmul.f32 %v8676_v12, %v443_v54  ;;  %v717_v4 = vmul.f32 %v8677_v31, %v451_v22  ;;  %v946_v20 = vunpack.c.l.bf16 %v7164_v23  ;;  %v3811_v18 = vpop.f32.mrf.mxu1  ;;  %v7298_v54 = vld [vmem:[%s4411_s12 + $0x450] sm:$0xff] }
 0x1c8   : > { %v1930_v59 = vadd.f32 %v1778_v39, %v1321_v25  ;;  %v1166_v30 = vmul.f32 %v8678_v50, %v938_v48  ;;  %v1547_v61 = vunpack.c.l.bf16 %v7171_v16  ;;  %v1938_v5 = vadd.f32 %v1786_v46, %v1329_v38  ;;  %v7314_v48 = vld [vmem:[%s4411_s12 + $0x690] sm:$0xff]  ;;  %v8684_v38 = vld [vmem:[#allocation56_spill] sm:$0xff] }
 0x1c9   : > { %2867 = vmatmul.mubr.bf16.gmra.mxu0 %v2015_v55  ;;  %2979 = vmatmul.mubr.bf16.gmra.mxu1 %v2017_v3  ;;  %v1555_v60 = vunpack.c.l.bf16 %v7174_v11  ;;  %v445_v55 = vunpack.c.l.bf16 %v7177_v49  ;;  %v453_v10 = vunpack.c.l.bf16 %v7184_v40  ;;  %v3733_v3 = vpop.f32.mrf.mxu0  ;;  %v1174_v44 = vmul.f32 %v8681_v35, %v946_v20  ;;  %v7276_v49 = vld [vmem:[%s4411_s12 + $0x1d0] sm:$0xff]  ;;  %v3812_v33 = vpop.f32.mrf.mxu1 }
 0x1ca   : > { %2874 = vmatprep.mubr.bf16.mxu0 %v2024_v21  ;;  %2986 = vmatprep.mubr.bf16.mxu1 %v2026_v32  ;;  %v1318_v21 = vadd.f32 %v1166_v30, %v709_v36  ;;  %v1775_v41 = vmul.f32 %v8682_v7, %v1547_v61  ;;  %v940_v34 = vunpack.c.l.bf16 %v7191_v43  ;;  %v3734_v32 = vadd.f32 %v3733_v3, %v3732_v52  ;;  %v7279_v40 = vld [vmem:[%s4411_s12 + $0x1f0] sm:$0xff]  ;;  %v7336_v3 = vld [vmem:[%s4411_s12 + $0x438] sm:$0xff] }
 0x1cb   : > { %v3810_v23 = vadd.f32 %v3809_v27, %v3808_v62  ;;  %v2034_v16 = vpack.c.bf16 %v1938_v5, %v1930_v59  ;;  %v1783_v11 = vmul.f32 %v8683_v17, %v1555_v60  ;;  %v3735_v6 = vpop.f32.mrf.mxu0  ;;  %v1326_v42 = vadd.f32 %v1174_v44, %v717_v4  ;;  %v3814_v28 = vpop.f32.mrf.mxu1  ;;  %v8685_v4 = vld [vmem:[#allocation79_spill] sm:$0xff]  ;;  %v8686_v62 = vld [vmem:[#allocation57_spill] sm:$0xff]  ;;  %v8687_v5 = vld [vmem:[#allocation108_spill] sm:$0xff] }
 0x1cc   : > { %v7281_v15 = vadd.f32 %v1775_v41, %v1318_v21  ;;  %v711_v8 = vmul.f32 %v8676_v12, %v445_v55  ;;  %v719_v43 = vmul.f32 %v8677_v31, %v453_v10  ;;  %v2613_v0 = vadd.f32 %v3734_v32, %v7269_v19  ;;  %v7333_v10 = vld [vmem:[%s4411_s12 + $0x1f8] sm:$0xff] }
 0x1cd   : > { %v948_v37 = vunpack.c.l.bf16 %v7205_v47  ;;  %v1168_v63 = vmul.f32 %v8678_v50, %v940_v34  ;;  %v1549_v13 = vunpack.c.l.bf16 %v7218_v26  ;;  %v3736_v14 = vpop.f32.mrf.mxu0  ;;  %v7292_v53 = vadd.f32 %v1783_v11, %v1326_v42  ;;  %v3815_v61 = vpop.f32.mrf.mxu1  ;;  %v7340_v34 = vld [vmem:[%s4411_s12 + $0x458] sm:$0xff] }
 0x1ce   : > { %v1557_v57 = vunpack.c.l.bf16 %v7221_v24  ;;  %v460_v12 = vunpack.c.h.bf16 %v7276_v49  ;;  %v468_v31 = vunpack.c.h.bf16 %v7279_v40  ;;  %v7300_v47 = vadd.f32 %v3810_v23, %v2613_v0  ;;  %v7343_v32 = vld [vmem:[%s4411_s12 + $0x698] sm:$0xff]  ;;  %v8689_v0 = vld [vmem:[#allocation54_spill] sm:$0xff] }
 0x1cf   : > { %v3737_v50 = vadd.f32 %v3736_v14, %v3735_v6  ;;  %v3813_v22 = vadd.f32 %v3812_v33, %v3811_v18  ;;  %v1176_v26 = vmul.f32 %v8681_v35, %v948_v37  ;;  %v2031_v24 = vpack.c.bf16 %v7292_v53, %v7281_v15  ;;  %v3738_v1 = vpop.f32.mrf.mxu0  ;;  %v8688_v18 = vld [vmem:[#allocation26_spill] sm:$0xff] }
 0x1d0   : > { %v1320_v25 = vadd.f32 %v1168_v63, %v711_v8  ;;  %v1777_v39 = vmul.f32 %v8682_v7, %v1549_v13  ;;  %v955_v46 = vunpack.c.h.bf16 %v7290_v56  ;;  %v1785_v45 = vmul.f32 %v8683_v17, %v1557_v57  ;;  %v7348_v8 = vld [vmem:[%s4411_s12 + $0x6b8] sm:$0xff] }
 0x1d1   : > { %2875 = vmatmul.mubr.bf16.gmra.mxu0 %v2023_v2  ;;  %2987 = vmatmul.mubr.bf16.gmra.mxu1 %v2025_v58  ;;  %v2616_v35 = vadd.f32 %v3737_v50, %v7269_v19  ;;  %v1328_v2 = vadd.f32 %v1176_v26, %v719_v43  ;;  %v963_v29 = vunpack.c.h.bf16 %v7298_v54  ;;  %v7320_v58 = vld [vmem:[%s4411_s12 + $0x6b0] sm:$0xff]  ;;  %v726_v36 = vmul.f32 %v8684_v38, %v460_v12  ;;  %v3739_v30 = vpop.f32.mrf.mxu0 }
 0x1d2   : > { %2882 = vmatprep.mubr.bf16.mxu0 %v2032_v51  ;;  %2994 = vmatprep.mubr.bf16.mxu1 %v2034_v16  ;;  %v1929_v7 = vadd.f32 %v1777_v39, %v1320_v25  ;;  %v734_v52 = vmul.f32 %v8685_v4, %v468_v31  ;;  %v1183_v59 = vmul.f32 %v8686_v62, %v955_v46  ;;  %v7326_v51 = vld [vmem:[%s4411_s12 + $0x1d8] sm:$0xff]  ;;  %v1564_v55 = vunpack.c.h.bf16 %v7314_v48  ;;  %v3817_v16 = vpop.f32.mrf.mxu1 }
 0x1d3   : > { %v7328_v20 = vadd.f32 %v3813_v22, %v2616_v35  ;;  %v1937_v17 = vadd.f32 %v1785_v45, %v1328_v2  ;;  %v1191_v60 = vmul.f32 %v8687_v5, %v963_v29  ;;  %v3740_v27 = vadd.f32 %v3739_v30, %v3738_v1  ;;  %v3741_v23 = vpop.f32.mrf.mxu0 }
 0x1d4   : > { %v3816_v44 = vadd.f32 %v3815_v61, %v3814_v28  ;;  %v1335_v21 = vadd.f32 %v1183_v59, %v726_v36  ;;  %v1572_v41 = vunpack.c.h.bf16 %v7320_v58  ;;  %v1792_v42 = vmul.f32 %v8688_v18, %v1564_v55  ;;  %v3818_v33 = vpop.f32.mrf.mxu1 }
 0x1d5   : > { %v2033_v11 = vpack.c.bf16 %v1937_v17, %v1929_v7  ;;  %v1343_v6 = vadd.f32 %v1191_v60, %v734_v52  ;;  %v462_v15 = vunpack.c.h.bf16 %v7326_v51  ;;  %v2621_v43 = vadd.f32 %v3740_v27, %v7269_v19  ;;  %v3742_v14 = vpop.f32.mrf.mxu0 }
 0x1d6   : > { %v1800_v37 = vmul.f32 %v8689_v0, %v1572_v41  ;;  %v470_v63 = vunpack.c.h.bf16 %v7333_v10  ;;  %v957_v13 = vunpack.c.h.bf16 %v7336_v3  ;;  %v1944_v53 = vadd.f32 %v1792_v42, %v1335_v21 }
 0x1d7   : > { %v728_v57 = vmul.f32 %v8684_v38, %v462_v15  ;;  %v965_v12 = vunpack.c.h.bf16 %v7340_v34  ;;  %v1566_v31 = vunpack.c.h.bf16 %v7343_v32  ;;  %v7357_v50 = vadd.f32 %v3816_v44, %v2621_v43 }
 0x1d8   : > { %v3743_v22 = vadd.f32 %v3742_v14, %v3741_v23  ;;  %v3819_v26 = vadd.f32 %v3818_v33, %v3817_v16  ;;  %v1574_v25 = vunpack.c.h.bf16 %v7348_v8  ;;  %v1952_v39 = vadd.f32 %v1800_v37, %v1343_v6  ;;  %v7395_v37 = vld [vmem:[%s4411_s12 + $0x470] sm:$0xff] }
 0x1d9   : > { %2883 = vmatmul.mubr.bf16.gmra.mxu0 %v2031_v24  ;;  %2995 = vmatmul.mubr.bf16.gmra.mxu1 %v2033_v11  ;;  %v736_v46 = vmul.f32 %v8685_v4, %v470_v63  ;;  %v1185_v35 = vmul.f32 %v8686_v62, %v957_v13  ;;  %v1193_v1 = vmul.f32 %v8687_v5, %v965_v12  ;;  %v459_v29 = vunpack.c.l.bf16 %v7276_v49  ;;  %v7383_v11 = vld [vmem:[%s4411_s12 + $0x210] sm:$0xff]  ;;  %v7412_v12 = vld [vmem:[%s4411_s12 + $0x218] sm:$0xff] }
 0x1da   : > { %v2624_v28 = vadd.f32 %v3743_v22, %v7269_v19  ;;  %v1794_v2 = vmul.f32 %v8688_v18, %v1566_v31  ;;  %v1802_v45 = vmul.f32 %v8689_v0, %v1574_v25  ;;  %v2040_v7 = vpack.c.bf16 %v1952_v39, %v1944_v53  ;;  %v7400_v33 = vld [vmem:[%s4411_s12 + $0x490] sm:$0xff]  ;;  %v8690_v22 = vld [vmem:[#allocation60_spill] sm:$0xff]  ;;  %v7421_v39 = vld [vmem:[%s4411_s12 + $0x478] sm:$0xff] }
 0x1db   : > { %v1337_v24 = vadd.f32 %v1185_v35, %v728_v57  ;;  %v1345_v36 = vadd.f32 %v1193_v1, %v736_v46  ;;  %v467_v52 = vunpack.c.l.bf16 %v7279_v40  ;;  %v725_v30 = vmul.f32 %v8684_v38, %v459_v29  ;;  %v7409_v57 = vld [vmem:[%s4411_s12 + $0x6f0] sm:$0xff]  ;;  %v3820_v46 = vpop.f32.mrf.mxu1 }
 0x1dc   : > { %v7368_v59 = vadd.f32 %v3819_v26, %v2624_v28  ;;  %v954_v61 = vunpack.c.l.bf16 %v7290_v56  ;;  %v962_v17 = vunpack.c.l.bf16 %v7298_v54  ;;  %2890 = vmatprep.mubr.bf16.mxu0 %v2040_v7  ;;  %v1563_v27 = vunpack.c.l.bf16 %v7314_v48  ;;  %v8691_v28 = vld [vmem:[#allocation126_spill] sm:$0xff] }
 0x1dd   : > { %v1946_v60 = vadd.f32 %v1794_v2, %v1337_v24  ;;  %v1954_v55 = vadd.f32 %v1802_v45, %v1345_v36  ;;  %v733_v49 = vmul.f32 %v8685_v4, %v467_v52  ;;  %v1571_v21 = vunpack.c.l.bf16 %v7320_v58  ;;  %v7388_v58 = vld [vmem:[%s4411_s12 + $0x230] sm:$0xff]  ;;  %v7430_v52 = vld [vmem:[%s4411_s12 + $0x498] sm:$0xff] }
 0x1de   : > { %v1182_v44 = vmul.f32 %v8686_v62, %v954_v61  ;;  %v1190_v40 = vmul.f32 %v8687_v5, %v962_v17  ;;  %v461_v41 = vunpack.c.l.bf16 %v7326_v51  ;;  %v1791_v54 = vmul.f32 %v8688_v18, %v1563_v27  ;;  %v8693_v61 = vld [vmem:[#allocation58_spill] sm:$0xff]  ;;  %v7439_v27 = vld [vmem:[%s4411_s12 + $0x6f8] sm:$0xff] }
 0x1df   : > { %v2042_v56 = vpack.c.bf16 %v1954_v55, %v1946_v60  ;;  %v469_v23 = vunpack.c.l.bf16 %v7333_v10  ;;  %v956_v16 = vunpack.c.l.bf16 %v7336_v3  ;;  %v1799_v42 = vmul.f32 %v8689_v0, %v1571_v21 }
 0x1e0   : > { %v1334_v48 = vadd.f32 %v1182_v44, %v725_v30  ;;  %v1342_v6 = vadd.f32 %v1190_v40, %v733_v49  ;;  %v727_v15 = vmul.f32 %v8684_v38, %v461_v41  ;;  %v964_v10 = vunpack.c.l.bf16 %v7340_v34  ;;  %v7436_v49 = vld [vmem:[%s4411_s12 + $0x6d8] sm:$0xff]  ;;  %v8694_v40 = vld [vmem:[#allocation105_spill] sm:$0xff]  ;;  %v8695_v41 = vld [vmem:[#allocation66_spill] sm:$0xff] }
 0x1e1   : > { %3002 = vmatprep.mubr.bf16.mxu1 %v2042_v56  ;;  %v735_v51 = vmul.f32 %v8685_v4, %v469_v23  ;;  %v1184_v3 = vmul.f32 %v8686_v62, %v956_v16  ;;  %v1565_v43 = vunpack.c.l.bf16 %v7343_v32  ;;  %v1573_v38 = vunpack.c.l.bf16 %v7348_v8  ;;  %v7406_v32 = vld [vmem:[%s4411_s12 + $0x6d0] sm:$0xff]  ;;  %v3821_v16 = vpop.f32.mrf.mxu1 }
 0x1e2   : > { %v1943_v63 = vadd.f32 %v1791_v54, %v1334_v48  ;;  %v1951_v13 = vadd.f32 %v1799_v42, %v1342_v6  ;;  %v476_v14 = vunpack.c.h.bf16 %v7383_v11  ;;  %v1192_v4 = vmul.f32 %v8687_v5, %v964_v10  ;;  %v7418_v5 = vld [vmem:[%s4411_s12 + $0x238] sm:$0xff] }
 0x1e3   : > { %v1336_v53 = vadd.f32 %v1184_v3, %v727_v15  ;;  %v1793_v34 = vmul.f32 %v8688_v18, %v1565_v43  ;;  %v484_v62 = vunpack.c.h.bf16 %v7388_v58  ;;  %v1801_v8 = vmul.f32 %v8689_v0, %v1573_v38  ;;  %v3744_v18 = vpop.f32.mrf.mxu0  ;;  %v8692_v0 = vld [vmem:[#allocation113_spill] sm:$0xff] }
 0x1e4   : > { %v2039_v31 = vpack.c.bf16 %v1951_v13, %v1943_v63  ;;  %v742_v26 = vmul.f32 %v8690_v22, %v476_v14  ;;  %v971_v25 = vunpack.c.h.bf16 %v7395_v37  ;;  %v1344_v35 = vadd.f32 %v1192_v4, %v735_v51 }
 0x1e5   : > { %v1945_v1 = vadd.f32 %v1793_v34, %v1336_v53  ;;  %v750_v2 = vmul.f32 %v8691_v28, %v484_v62  ;;  %v979_v45 = vunpack.c.h.bf16 %v7400_v33  ;;  %v1580_v7 = vunpack.c.h.bf16 %v7406_v32  ;;  %v3745_v23 = vpop.f32.mrf.mxu0 }
 0x1e6   : > { %2891 = vmatmul.mubr.bf16.gmra.mxu0 %v2039_v31  ;;  %v1199_v29 = vmul.f32 %v8692_v0, %v971_v25  ;;  %v1588_v24 = vunpack.c.h.bf16 %v7409_v57  ;;  %v478_v36 = vunpack.c.h.bf16 %v7412_v12  ;;  %v1953_v30 = vadd.f32 %v1801_v8, %v1344_v35 }
 0x1e7   : > { %v1207_v17 = vmul.f32 %v8693_v61, %v979_v45  ;;  %v486_v60 = vunpack.c.h.bf16 %v7418_v5  ;;  %v973_v55 = vunpack.c.h.bf16 %v7421_v39  ;;  %v1808_v21 = vmul.f32 %v8694_v40, %v1580_v7 }
 0x1e8   : > { %v1351_v44 = vadd.f32 %v1199_v29, %v742_v26  ;;  %v1816_v56 = vmul.f32 %v8695_v41, %v1588_v24  ;;  %v744_v54 = vmul.f32 %v8690_v22, %v478_v36  ;;  %v2041_v48 = vpack.c.bf16 %v1953_v30, %v1945_v1  ;;  %v3823_v30 = vpop.f32.mrf.mxu1 }
 0x1e9   : > { %v1359_v6 = vadd.f32 %v1207_v17, %v750_v2  ;;  %v752_v42 = vmul.f32 %v8691_v28, %v486_v60  ;;  %v981_v15 = vunpack.c.h.bf16 %v7430_v52  ;;  %v1201_v10 = vmul.f32 %v8692_v0, %v973_v55 }
 0x1ea   : > { %v1960_v51 = vadd.f32 %v1808_v21, %v1351_v44  ;;  %v1582_v3 = vunpack.c.h.bf16 %v7436_v49  ;;  %v1590_v43 = vunpack.c.h.bf16 %v7439_v27  ;;  %3003 = vmatmul.mubr.bf16.gmra.mxu1 %v2041_v48  ;;  %v3746_v38 = vadd.f32 %v3745_v23, %v3744_v18 }
 0x1eb   : > { %v1968_v63 = vadd.f32 %v1816_v56, %v1359_v6  ;;  %v1209_v13 = vmul.f32 %v8693_v61, %v981_v15  ;;  %v3822_v14 = vadd.f32 %v3821_v16, %v3820_v46  ;;  %v1353_v4 = vadd.f32 %v1201_v10, %v744_v54  ;;  %v3456_v54 = vld [vmem:[%s4411_s12 + $0x4b0] sm:$0xff] }
 0x1ec   : > { %v1810_v53 = vmul.f32 %v8694_v40, %v1582_v3  ;;  %v1818_v34 = vmul.f32 %v8695_v41, %v1590_v43  ;;  %v475_v62 = vunpack.c.l.bf16 %v7383_v11  ;;  %v2629_v26 = vadd.f32 %v3746_v38, %v7269_v19  ;;  %v3532_v16 = vld [vmem:[%s4411_s12 + $0x710] sm:$0xff] }
 0x1ed   : > { %v2048_v31 = vpack.c.bf16 %v1968_v63, %v1960_v51  ;;  %v1361_v8 = vadd.f32 %v1209_v13, %v752_v42  ;;  %v483_v25 = vunpack.c.l.bf16 %v7388_v58  ;;  %v970_v2 = vunpack.c.l.bf16 %v7395_v37  ;;  %v342_v51 = vld [vmem:[%s4411_s12 + $0x258] sm:$0xff]  ;;  %v3824_v13 = vpop.f32.mrf.mxu1 }
 0x1ee   : > { %v1962_v35 = vadd.f32 %v1810_v53, %v1353_v4  ;;  %v741_v1 = vmul.f32 %v8690_v22, %v475_v62  ;;  %v978_v18 = vunpack.c.l.bf16 %v7400_v33  ;;  %v7458_v45 = vadd.f32 %v3822_v14, %v2629_v26  ;;  %v3747_v33 = vpop.f32.mrf.mxu0  ;;  %v3533_v63 = vld [vmem:[%s4411_s12 + $0x718] sm:$0xff]  ;;  %v8696_v53 = vld [vmem:[#allocation42_spill] sm:$0xff] }
 0x1ef   : > { %2898 = vmatprep.mubr.bf16.mxu0 %v2048_v31  ;;  %v1970_v46 = vadd.f32 %v1818_v34, %v1361_v8  ;;  %v749_v11 = vmul.f32 %v8691_v28, %v483_v25  ;;  %v1579_v29 = vunpack.c.l.bf16 %v7406_v32  ;;  %v1198_v7 = vmul.f32 %v8692_v0, %v970_v2  ;;  %v341_v32 = vld [vmem:[%s4411_s12 + $0x250] sm:$0xff]  ;;  %v3826_v31 = vpop.f32.mrf.mxu1 }
 0x1f0   : > { %v1206_v58 = vmul.f32 %v8693_v61, %v978_v18  ;;  %v1587_v24 = vunpack.c.l.bf16 %v7409_v57  ;;  %v477_v37 = vunpack.c.l.bf16 %v7412_v12  ;;  %v485_v60 = vunpack.c.l.bf16 %v7418_v5 }
 0x1f1   : > { %v2050_v36 = vpack.c.bf16 %v1970_v46, %v1962_v35  ;;  %v1807_v17 = vmul.f32 %v8694_v40, %v1579_v29  ;;  %v972_v55 = vunpack.c.l.bf16 %v7421_v39  ;;  %v1350_v44 = vadd.f32 %v1198_v7, %v741_v1 }
 0x1f2   : > { %v1358_v21 = vadd.f32 %v1206_v58, %v749_v11  ;;  %v1815_v56 = vmul.f32 %v8695_v41, %v1587_v24  ;;  %v743_v57 = vmul.f32 %v8690_v22, %v477_v37  ;;  %v751_v12 = vmul.f32 %v8691_v28, %v485_v60  ;;  %v3457_v28 = vld [vmem:[%s4411_s12 + $0x4b8] sm:$0xff]  ;;  %v3827_v11 = vpop.f32.mrf.mxu1  ;;  %s4022_s12 = smul.u32 76, %s4407_s8 }
 0x1f3   : > { %3010 = vmatprep.mubr.bf16.mxu1 %v2050_v36  ;;  %v980_v23 = vunpack.c.l.bf16 %v7430_v52  ;;  %v1200_v5 = vmul.f32 %v8692_v0, %v972_v55  ;;  %v1581_v39 = vunpack.c.l.bf16 %v7436_v49  ;;  %v1959_v48 = vadd.f32 %v1807_v17, %v1350_v44  ;;  %v3748_v52 = vpop.f32.mrf.mxu0 }
 0x1f4   : > { %v1967_v6 = vadd.f32 %v1815_v56, %v1358_v21  ;;  %v1589_v42 = vunpack.c.l.bf16 %v7439_v27  ;;  %v492_v15 = vunpack.c.h.bf16 %v341_v32  ;;  %v987_v43 = vunpack.c.h.bf16 %v3456_v54  ;;  %s7581_s22 = scalar_lea.vmem [#allocation5], %s4022_s12 }
 0x1f5   : > { %v1208_v22 = vmul.f32 %v8693_v61, %v980_v23  ;;  %v1352_v10 = vadd.f32 %v1200_v5, %v743_v57  ;;  %v1809_v3 = vmul.f32 %v8694_v40, %v1581_v39  ;;  %v1596_v14 = vunpack.c.h.bf16 %v3532_v16  ;;  %v3750_v61 = vpop.f32.mrf.mxu0  ;;  %v8697_v40 = vld [vmem:[#allocation115_spill] sm:$0xff]  ;;  %s3288_s23 = sshll.u32 %s7581_s22, 4  ;;  %s7654_s23 = int_to_ptr.vmem [resolvable:$true] %s3288_s23 }
 0x1f6   : > { %v2047_v0 = vpack.c.bf16 %v1967_v6, %v1959_v48  ;;  %v1817_v49 = vmul.f32 %v8695_v41, %v1589_v42  ;;  %v758_v38 = vmul.f32 %v6859_v9, %v492_v15  ;;  %v1215_v34 = vmul.f32 %v8696_v53, %v987_v43  ;;  %s4221_s9 = scalar_lea.vmem %s7654_s23, 1216  ;;  %p4228_p5 = scmp.lt.s32.totalorder %s7654_s23, %s4226_s11 }
 0x1f7   : > { %v1360_v4 = vadd.f32 %v1208_v22, %v751_v12  ;;  %v1961_v27 = vadd.f32 %v1809_v3, %v1352_v10  ;;  %v494_v62 = vunpack.c.h.bf16 %v342_v51  ;;  %v1824_v8 = vmul.f32 %v8697_v40, %v1596_v14  ;;  %v3751_v46 = vpop.f32.mrf.mxu0  ;;  %p4222_p2 = scmp.ne.s32.totalorder %s7654_s23, %s4221_s9  ;;  %p4229_p6 = scmp.lt.s32.totalorder %s4227_s14, %s4221_s9 }
 0x1f8   : > { %2899 = vmatmul.mubr.bf16.gmra.mxu0 %v2047_v0  ;;  %v989_v26 = vunpack.c.h.bf16 %v3457_v28  ;;  %v1598_v25 = vunpack.c.h.bf16 %v3533_v63  ;;  %v3749_v35 = vadd.f32 %v3748_v52, %v3747_v33  ;;  %v1367_v2 = vadd.f32 %v1215_v34, %v758_v38  ;;  %v3829_v33 = vpop.f32.mrf.mxu1 }
 0x1f9   : > { %v1969_v1 = vadd.f32 %v1817_v49, %v1360_v4  ;;  %v760_v41 = vmul.f32 %v6859_v9, %v494_v62  ;;  %v3825_v18 = vadd.f32 %v3824_v13, %v3823_v30  ;;  %v491_v24 = vunpack.c.l.bf16 %v341_v32  ;;  %v3753_v55 = vpop.f32.mrf.mxu0  ;;  %p4223_p3 = pnand %p4222_p2, %p4372_p9  ;;  %p4230_p7 = por %p4229_p6, %p4228_p5 }
 0x1fa   : > { %v1217_v29 = vmul.f32 %v8696_v53, %v989_v26  ;;  %v1826_v7 = vmul.f32 %v8697_v40, %v1598_v25  ;;  %v2632_v58 = vadd.f32 %v3749_v35, %v7269_v19  ;;  %v1976_v36 = vadd.f32 %v1824_v8, %v1367_v2  ;;  %v3830_v39 = vpop.f32.mrf.mxu1 }
 0x1fb   : > { %v2049_v37 = vpack.c.bf16 %v1969_v1, %v1961_v27  ;;  %v986_v17 = vunpack.c.l.bf16 %v3456_v54  ;;  %v1595_v60 = vunpack.c.l.bf16 %v3532_v16  ;;  %v757_v30 = vmul.f32 %v6859_v9, %v491_v24  ;;  %v3754_v32 = vpop.f32.mrf.mxu0  ;;  %p4224_p4 = pneg %p4223_p3 }
 0x1fc   : > { %v1369_v44 = vadd.f32 %v1217_v29, %v760_v41  ;;  %v7492_v21 = vadd.f32 %v3825_v18, %v2632_v58  ;;  %v493_v56 = vunpack.c.l.bf16 %v342_v51  ;;  %v2056_v57 = vpack.c.bf16 %v1976_v36, %v1976_v36  ;;  %v3832_v27 = vpop.f32.mrf.mxu1 }
 0x1fd   : > { %3011 = vmatmul.mubr.bf16.gmra.mxu1 %v2049_v37  ;;  %v1214_v12 = vmul.f32 %v8696_v53, %v986_v17  ;;  %v1823_v23 = vmul.f32 %v8697_v40, %v1595_v60  ;;  %v988_v5 = vunpack.c.l.bf16 %v3457_v28  ;;  %v1597_v16 = vunpack.c.l.bf16 %v3533_v63  ;;  %v3756_v4 = vpop.f32.mrf.mxu0  ;;  %p4231_p8 = pnand %p4230_p7, %p4224_p4 }
 0x1fe   : > { %v1978_v48 = vadd.f32 %v1826_v7, %v1369_v44  ;;  %v759_v54 = vmul.f32 %v6859_v9, %v493_v56  ;;  %v3752_v6 = vadd.f32 %v3751_v46, %v3750_v61  ;;  %2906 = vmatprep.mubr.bf16.mxu0 %v2056_v57  ;;  %v3828_v22 = vadd.f32 %v3827_v11, %v3826_v31  ;;  %v3833_v34 = vpop.f32.mrf.mxu1 }
 0x1ff   : > { %v1366_v42 = vadd.f32 %v1214_v12, %v757_v30  ;;  %v1216_v15 = vmul.f32 %v8696_v53, %v988_v5  ;;  %v3755_v51 = vadd.f32 %v3754_v32, %v3753_v55  ;;  %v1825_v3 = vmul.f32 %v8697_v40, %v1597_v16  ;;  %v3757_v53 = vpop.f32.mrf.mxu0 }
 0x200   : > { %v2058_v10 = vpack.c.bf16 %v1978_v48, %v1978_v48  ;;  %v2637_v43 = vadd.f32 %v3752_v6, %v7269_v19  ;;  %v3831_v52 = vadd.f32 %v3830_v39, %v3829_v33  ;;  %v3758_v62 = vadd.f32 %v3757_v53, %v3756_v4  ;;  %v3835_v40 = vpop.f32.mrf.mxu1 }
 0x201   : > { %v1975_v28 = vadd.f32 %v1823_v23, %v1366_v42  ;;  %v1368_v13 = vadd.f32 %v1216_v15, %v759_v54  ;;  %v2640_v0 = vadd.f32 %v3755_v51, %v7269_v19  ;;  %v3834_v61 = vadd.f32 %v3833_v34, %v3832_v27  ;;  %v3759_v31 = vpop.f32.mrf.mxu0 }
 0x202   : > { %3018 = vmatprep.mubr.bf16.mxu1 %v2058_v10  ;;  %v7502_v9 = vadd.f32 %v3828_v22, %v2637_v43  ;;  %v2645_v8 = vadd.f32 %v3758_v62, %v7269_v19  ;;  %v3836_v25 = vpop.f32.mrf.mxu1 }
 0x203   : > { %v2055_v63 = vpack.c.bf16 %v1975_v28, %v1975_v28  ;;  %v1977_v49 = vadd.f32 %v1825_v3, %v1368_v13  ;;  %v7504_v38 = vadd.f32 %v3831_v52, %v2640_v0  ;;  %v3760_v26 = vpop.f32.mrf.mxu0  ;;  %v3837_v2 = vadd.f32 %v3836_v25, %v3835_v40 }
 0x204   : > { %v7507_v35 = vadd.f32 %v3834_v61, %v2645_v8  ;;  %v3761_v1 = vadd.f32 %v3760_v26, %v3759_v31 }
 0x205   : > { %2907 = vmatmul.mubr.bf16.gmra.mxu0 %v2055_v63  ;;  %v2057_v14 = vpack.c.bf16 %v1977_v49, %v1977_v49 }
 0x206   : > { %v2648_v41 = vadd.f32 %v3761_v1, %v7269_v19 }
 0x207   : > { %3019 = vmatmul.mubr.bf16.gmra.mxu1 %v2057_v14 }
 0x208   : > { %v7510_v18 = vadd.f32 %v3837_v2, %v2648_v41 }
 0x209   : > { %v3762_v46 = vpop.f32.mrf.mxu0 }
 0x20a   : > { %v3838_v11 = vpop.f32.mrf.mxu1 }
 0x20b   : > { %v3763_v29 = vpop.f32.mrf.mxu0 }
 0x20c   : > { %v3839_v7 = vpop.f32.mrf.mxu1  ;;  %v3764_v58 = vadd.f32 %v3763_v29, %v3762_v46 }
 0x20d   : > { %v3840_v24 = vadd.f32 %v3839_v7, %v3838_v11  ;;  %v3765_v37 = vpop.f32.mrf.mxu0 }
 0x20e   : > { %v3841_v36 = vpop.f32.mrf.mxu1  ;;  %v2653_v17 = vadd.f32 %v3764_v58, %v7269_v19 }
 0x20f   : > { %v3766_v60 = vpop.f32.mrf.mxu0 }
 0x210   : > { %v3842_v55 = vpop.f32.mrf.mxu1  ;;  %v7513_v33 = vadd.f32 %v3840_v24, %v2653_v17  ;;  %v3767_v44 = vadd.f32 %v3766_v60, %v3765_v37 }
 0x211   : > { %v3843_v30 = vadd.f32 %v3842_v55, %v3841_v36 }
 0x212   : > { %v2656_v56 = vadd.f32 %v3767_v44, %v7269_v19 }
 0x214   : > { %v7516_v57 = vadd.f32 %v3843_v30, %v2656_v56 }
 0x223   : > { %v3768_v12 = vpop.f32.mrf.mxu0  ;;  %v3844_v23 = vpop.f32.mrf.mxu1 }
 0x225   : > { %v3769_v5 = vpop.f32.mrf.mxu0  ;;  %v3845_v32 = vpop.f32.mrf.mxu1 }
 0x226   : > { %v3770_v39 = vadd.f32 %v3769_v5, %v3768_v12  ;;  %v3846_v48 = vadd.f32 %v3845_v32, %v3844_v23 }
 0x227   : > { %v3771_v54 = vpop.f32.mrf.mxu0  ;;  %v3847_v16 = vpop.f32.mrf.mxu1 }
 0x228   : > { %v2661_v6 = vadd.f32 %v3770_v39, %v7269_v19 }
 0x229   : > { %v3772_v42 = vpop.f32.mrf.mxu0  ;;  %v3848_v15 = vpop.f32.mrf.mxu1 }
 0x22a   : > { %v7519_v22 = vadd.f32 %v3846_v48, %v2661_v6  ;;  %v3773_v51 = vadd.f32 %v3772_v42, %v3771_v54  ;;  %v3849_v10 = vadd.f32 %v3848_v15, %v3847_v16 }
 0x22c   : > { %v2664_v3 = vadd.f32 %v3773_v51, %v7269_v19 }
 0x22e   : > { %v7522_v43 = vadd.f32 %v3849_v10, %v2664_v3 }
 0x23a   : > { %v3774_v52 = vpop.f32.mrf.mxu0  ;;  %v3850_v28 = vpop.f32.mrf.mxu1 }
 0x23c   : > { %v3775_v13 = vpop.f32.mrf.mxu0  ;;  %v3851_v0 = vpop.f32.mrf.mxu1 }
 0x23d   : > { %v3776_v63 = vadd.f32 %v3775_v13, %v3774_v52  ;;  %v3852_v49 = vadd.f32 %v3851_v0, %v3850_v28 }
 0x23e   : > { %v3777_v14 = vpop.f32.mrf.mxu0  ;;  %v3853_v4 = vpop.f32.mrf.mxu1 }
 0x23f   : > { %v2669_v27 = vadd.f32 %v3776_v63, %v7269_v19 }
 0x240   : > { %v3778_v53 = vpop.f32.mrf.mxu0  ;;  %v3854_v34 = vpop.f32.mrf.mxu1 }
 0x241   : > { %v7525_v62 = vadd.f32 %v3852_v49, %v2669_v27  ;;  %v3779_v61 = vadd.f32 %v3778_v53, %v3777_v14  ;;  %v3855_v31 = vadd.f32 %v3854_v34, %v3853_v4 }
 0x243   : > { %v2672_v40 = vadd.f32 %v3779_v61, %v7269_v19 }
 0x245   : > { %v7528_v8 = vadd.f32 %v3855_v31, %v2672_v40 }
 0x251   : > { %v3780_v26 = vpop.f32.mrf.mxu0  ;;  %v3856_v25 = vpop.f32.mrf.mxu1 }
 0x253   : > { %v3781_v1 = vpop.f32.mrf.mxu0  ;;  %v3857_v2 = vpop.f32.mrf.mxu1 }
 0x254   : > { %v3782_v41 = vadd.f32 %v3781_v1, %v3780_v26  ;;  %v3858_v46 = vadd.f32 %v3857_v2, %v3856_v25 }
 0x255   : > { %v3783_v11 = vpop.f32.mrf.mxu0  ;;  %v3859_v29 = vpop.f32.mrf.mxu1 }
 0x256   : > { %v2677_v7 = vadd.f32 %v3782_v41, %v7269_v19 }
 0x257   : > { %v3784_v58 = vpop.f32.mrf.mxu0  ;;  %v3860_v24 = vpop.f32.mrf.mxu1 }
 0x258   : > { %v7531_v37 = vadd.f32 %v3858_v46, %v2677_v7  ;;  %v3785_v36 = vadd.f32 %v3784_v58, %v3783_v11  ;;  %v3861_v17 = vadd.f32 %v3860_v24, %v3859_v29 }
 0x25a   : > { %v2680_v60 = vadd.f32 %v3785_v36, %v7269_v19 }
 0x25c   : > { %v3786_v55 = vpop.f32.mrf.mxu0  ;;  %v7534_v30 = vadd.f32 %v3861_v17, %v2680_v60 }
 0x25d   : > { %v3862_v44 = vpop.f32.mrf.mxu1 }
 0x25e   : > { %v3787_v56 = vpop.f32.mrf.mxu0 }
 0x25f   : > { %v3863_v12 = vpop.f32.mrf.mxu1  ;;  %v3788_v23 = vadd.f32 %v3787_v56, %v3786_v55 }
 0x260   : > { %v3864_v5 = vadd.f32 %v3863_v12, %v3862_v44  ;;  %v3789_v32 = vpop.f32.mrf.mxu0 }
 0x261   : > { %v3865_v39 = vpop.f32.mrf.mxu1  ;;  %v2685_v48 = vadd.f32 %v3788_v23, %v7269_v19 }
 0x262   : > { %v3790_v54 = vpop.f32.mrf.mxu0 }
 0x263   : > { %v3866_v16 = vpop.f32.mrf.mxu1  ;;  %v7537_v6 = vadd.f32 %v3864_v5, %v2685_v48 }
 0x266   : > { %v3884_v42 = vpop.f32.mrf.mxu0  ;;  %v3960_v15 = vpop.f32.mrf.mxu1 }
 0x268   : > { %v3885_v51 = vpop.f32.mrf.mxu0  ;;  %v3961_v10 = vpop.f32.mrf.mxu1 }
 0x269   : > { %v3886_v3 = vadd.f32 %v3885_v51, %v3884_v42  ;;  %v3962_v0 = vadd.f32 %v3961_v10, %v3960_v15 }
 0x26a   : > { %v3887_v52 = vpop.f32.mrf.mxu0  ;;  %v3963_v28 = vpop.f32.mrf.mxu1 }
 0x26b   : > { %v2837_v13 = vadd.f32 %v3886_v3, %v7300_v47 }
 0x26c   : > { %v3888_v63 = vpop.f32.mrf.mxu0  ;;  %v3964_v49 = vpop.f32.mrf.mxu1 }
 0x26d   : > { %v7540_v14 = vadd.f32 %v3962_v0, %v2837_v13  ;;  %v3889_v4 = vadd.f32 %v3888_v63, %v3887_v52  ;;  %v3965_v61 = vadd.f32 %v3964_v49, %v3963_v28 }
 0x26f   : > { %v3890_v19 = vpop.f32.mrf.mxu0  ;;  %v3966_v27 = vpop.f32.mrf.mxu1  ;;  %v3045_v53 = vmin.f32 %v7540_v14, 0.0  ;;  %v2840_v34 = vadd.f32 %v3889_v4, %v7328_v20  ;;  %vm3026_vm0 = vcmp.gt.f32.partialorder %v7540_v14, 0.0 }
 0x271   : > { %v3891_v31 = vpop.f32.mrf.mxu0  ;;  %v3967_v40 = vpop.f32.mrf.mxu1  ;;  %v3064_v26 = vmul.f32 1.442695, %v3045_v53  ;;  %v7544_v25 = vadd.f32 %v3965_v61, %v2840_v34 }
 0x272   : > { %v3892_v1 = vadd.f32 %v3891_v31, %v3890_v19  ;;  %v3968_v11 = vadd.f32 %v3967_v40, %v3966_v27 }
 0x273   : > { %v3893_v47 = vpop.f32.mrf.mxu0  ;;  %v3969_v2 = vpop.f32.mrf.mxu1  ;;  %4181 = vpow2.f32 %v3064_v26  ;;  %v3046_v41 = vmin.f32 %v7544_v25, 0.0  ;;  %vm3027_vm1 = vcmp.gt.f32.partialorder %v7544_v25, 0.0 }
 0x274   : > { %v2845_v46 = vadd.f32 %v3892_v1, %v7357_v50 }
 0x275   : > { %v3894_v29 = vpop.f32.mrf.mxu0  ;;  %v3970_v7 = vpop.f32.mrf.mxu1  ;;  %v3066_v58 = vmul.f32 1.442695, %v3046_v41 }
 0x276   : > { %v7548_v24 = vadd.f32 %v3968_v11, %v2845_v46  ;;  %v3895_v20 = vadd.f32 %v3894_v29, %v3893_v47  ;;  %v3971_v44 = vadd.f32 %v3970_v7, %v3969_v2 }
 0x277   : > { %4183 = vpow2.f32 %v3066_v58 }
 0x278   : > { %v3896_v36 = vpop.f32.mrf.mxu0  ;;  %v3972_v17 = vpop.f32.mrf.mxu1  ;;  %v3047_v60 = vmin.f32 %v7548_v24, 0.0  ;;  %v2848_v55 = vadd.f32 %v3895_v20, %v7368_v59  ;;  %vm3028_vm2 = vcmp.gt.f32.partialorder %v7548_v24, 0.0 }
 0x27a   : > { %v3897_v56 = vpop.f32.mrf.mxu0  ;;  %v3973_v12 = vpop.f32.mrf.mxu1  ;;  %v3068_v23 = vmul.f32 1.442695, %v3047_v60  ;;  %v7552_v5 = vadd.f32 %v3971_v44, %v2848_v55 }
 0x27b   : > { %v3898_v50 = vadd.f32 %v3897_v56, %v3896_v36  ;;  %v3974_v16 = vadd.f32 %v3973_v12, %v3972_v17 }
 0x27c   : > { %v3899_v32 = vpop.f32.mrf.mxu0  ;;  %v3975_v39 = vpop.f32.mrf.mxu1  ;;  %4185 = vpow2.f32 %v3068_v23  ;;  %v3048_v48 = vmin.f32 %v7552_v5, 0.0  ;;  %vm3029_vm3 = vcmp.gt.f32.partialorder %v7552_v5, 0.0 }
 0x27d   : > { %v2853_v54 = vadd.f32 %v3898_v50, %v7458_v45 }
 0x27e   : > { %v3900_v42 = vpop.f32.mrf.mxu0  ;;  %v3976_v15 = vpop.f32.mrf.mxu1  ;;  %v3070_v51 = vmul.f32 1.442695, %v3048_v48 }
 0x27f   : > { %v7556_v10 = vadd.f32 %v3974_v16, %v2853_v54  ;;  %v3901_v59 = vadd.f32 %v3900_v42, %v3899_v32  ;;  %v3977_v0 = vadd.f32 %v3976_v15, %v3975_v39 }
 0x280   : > { %4187 = vpow2.f32 %v3070_v51  ;;  %v4182_v63 = vpop.eup %4181 }
 0x281   : > { %v3902_v3 = vpop.f32.mrf.mxu0  ;;  %v3978_v52 = vpop.f32.mrf.mxu1  ;;  %v3049_v28 = vmin.f32 %v7556_v10, 0.0  ;;  %v2856_v13 = vadd.f32 %v3901_v59, %v7492_v21  ;;  %v3599_v19 = vadd.f32 -1.0, %v4182_v63  ;;  %vm3030_vm4 = vcmp.gt.f32.partialorder %v7556_v10, 0.0 }
 0x283   : > { %v3903_v49 = vpop.f32.mrf.mxu0  ;;  %v3979_v4 = vpop.f32.mrf.mxu1  ;;  %v3072_v45 = vmul.f32 1.442695, %v3049_v28  ;;  %v7560_v27 = vadd.f32 %v3977_v0, %v2856_v13  ;;  %v3121_v31 = vmul.f32 1.6732632, %v3599_v19 }
 0x284   : > { %v3904_v53 = vadd.f32 %v3903_v49, %v3902_v3  ;;  %v4184_v26 = vpop.eup %4183  ;;  %v3980_v21 = vadd.f32 %v3979_v4, %v3978_v52 }
 0x285   : > { %v3905_v34 = vpop.f32.mrf.mxu0  ;;  %v3981_v61 = vpop.f32.mrf.mxu1  ;;  %4189 = vpow2.f32 %v3072_v45  ;;  %v3050_v40 = vmin.f32 %v7560_v27, 0.0  ;;  %v3600_v41 = vadd.f32 -1.0, %v4184_v26  ;;  %v3140_v29 = vsel %vm3026_vm0, %v7540_v14, %v3121_v31 }
 0x286   : > { %v2861_v1 = vadd.f32 %v3904_v53, %v7502_v9  ;;  %v3159_v32 = vmul.f32 1.050701, %v3140_v29  ;;  %vm3031_vm5 = vcmp.gt.f32.partialorder %v7560_v27, 0.0 }
 0x287   : > { %v3906_v47 = vpop.f32.mrf.mxu0  ;;  %v3982_v2 = vpop.f32.mrf.mxu1  ;;  %v3074_v46 = vmul.f32 1.442695, %v3050_v40  ;;  %v3122_v36 = vmul.f32 1.6732632, %v3600_v41 }
 0x288   : > { %v3907_v11 = vadd.f32 %v3906_v47, %v3905_v34  ;;  %v7566_v7 = vadd.f32 %v3980_v21, %v2861_v1  ;;  %v3983_v9 = vadd.f32 %v3982_v2, %v3981_v61 }
 0x289   : > { %v3908_v58 = vpop.f32.mrf.mxu0  ;;  %v3984_v20 = vpop.f32.mrf.mxu1  ;;  %4191 = vpow2.f32 %v3074_v46  ;;  %v3141_v12 = vsel %vm3027_vm1, %v7544_v25, %v3122_v36 }
 0x28a   : > { %v2864_v17 = vadd.f32 %v3907_v11, %v7504_v38  ;;  %v4186_v60 = vpop.eup %4185  ;;  %v3051_v55 = vmin.f32 %v7566_v7, 0.0  ;;  %v3160_v39 = vmul.f32 1.050701, %v3141_v12  ;;  %vm3032_vm6 = vcmp.gt.f32.partialorder %v7566_v7, 0.0 }
 0x28b   : > { %v3909_v44 = vpop.f32.mrf.mxu0  ;;  %v3985_v56 = vpop.f32.mrf.mxu1  ;;  %v3601_v14 = vadd.f32 -1.0, %v4186_v60 }
 0x28c   : > { %v7573_v23 = vadd.f32 %v3983_v9, %v2864_v17  ;;  %v3910_v50 = vadd.f32 %v3909_v44, %v3908_v58  ;;  %v3076_v48 = vmul.f32 1.442695, %v3051_v55  ;;  %v3986_v51 = vadd.f32 %v3985_v56, %v3984_v20 }
 0x28d   : > { %v3911_v54 = vpop.f32.mrf.mxu0  ;;  %v3987_v38 = vpop.f32.mrf.mxu1  ;;  %v3123_v16 = vmul.f32 1.6732632, %v3601_v14  ;;  %v3665_v3 = vpack.c.bf16 %v3160_v39, %v3159_v32 }
 0x28e   : > { %v3052_v42 = vmin.f32 %v7573_v23, 0.0  ;;  %v2869_v15 = vadd.f32 %v3910_v50, %v7507_v35  ;;  %v4188_v59 = vpop.eup %4187  ;;  %4193 = vpow2.f32 %v3076_v48  ;;  %vm3033_vm7 = vcmp.gt.f32.partialorder %v7573_v23, 0.0 }
 0x28f   : > { %v3912_v25 = vpop.f32.mrf.mxu0  ;;  %v3988_v52 = vpop.f32.mrf.mxu1  ;;  %v3602_v28 = vadd.f32 -1.0, %v4188_v59  ;;  %3666 = vst [vmem:[%s7581_s22] sm:$0xff] %v3665_v3   ;;  %v3142_v4 = vsel %vm3028_vm2, %v7548_v24, %v3123_v16 }
 0x290   : > { %v3078_v13 = vmul.f32 1.442695, %v3052_v42  ;;  %v7577_v0 = vadd.f32 %v3986_v51, %v2869_v15  ;;  %v3913_v63 = vadd.f32 %v3912_v25, %v3911_v54  ;;  %v3989_v61 = vadd.f32 %v3988_v52, %v3987_v38 }
 0x291   : > { %v3914_v49 = vpop.f32.mrf.mxu0  ;;  %v3990_v35 = vpop.f32.mrf.mxu1  ;;  %v3124_v19 = vmul.f32 1.6732632, %v3602_v28  ;;  %v3161_v2 = vmul.f32 1.050701, %v3142_v4 }
 0x292   : > { %4195 = vpow2.f32 %v3078_v13  ;;  %v3053_v45 = vmin.f32 %v7577_v0, 0.0  ;;  %v4190_v53 = vpop.eup %4189  ;;  %v2872_v34 = vadd.f32 %v3913_v63, %v7510_v18  ;;  %vm3034_vm8 = vcmp.gt.f32.partialorder %v7577_v0, 0.0 }
 0x293   : > { %v3915_v31 = vpop.f32.mrf.mxu0  ;;  %v3991_v40 = vpop.f32.mrf.mxu1  ;;  %v3143_v26 = vsel %vm3029_vm3, %v7552_v5, %v3124_v19  ;;  %v3603_v1 = vadd.f32 -1.0, %v4190_v53 }
 0x294   : > { %v3080_v21 = vmul.f32 1.442695, %v3053_v45  ;;  %v3916_v47 = vadd.f32 %v3915_v31, %v3914_v49  ;;  %v3162_v41 = vmul.f32 1.050701, %v3143_v26  ;;  %v7590_v24 = vadd.f32 %v3989_v61, %v2872_v34 }
 0x295   : > { %v3917_v46 = vpop.f32.mrf.mxu0  ;;  %v3993_v11 = vpop.f32.mrf.mxu1  ;;  %v3125_v29 = vmul.f32 1.6732632, %v3603_v1  ;;  %v3992_v18 = vadd.f32 %v3991_v40, %v3990_v35 }
 0x296   : > { %4197 = vpow2.f32 %v3080_v21  ;;  %v2877_v58 = vadd.f32 %v3916_v47, %v7513_v33  ;;  %v4192_v20 = vpop.eup %4191  ;;  %v3670_v36 = vpack.c.bf16 %v3162_v41, %v3161_v2  ;;  %v3054_v17 = vmin.f32 %v7590_v24, 0.0 }
 0x297   : > { %v3918_v5 = vpop.f32.mrf.mxu0  ;;  %v3994_v9 = vpop.f32.mrf.mxu1  ;;  %v3604_v60 = vadd.f32 -1.0, %v4192_v20  ;;  %v3144_v56 = vsel %vm3030_vm4, %v7556_v10, %v3125_v29  ;;  %vm3035_vm9 = vcmp.gt.f32.partialorder %v7590_v24, 0.0 }
 0x298   : > { %v7595_v55 = vadd.f32 %v3992_v18, %v2877_v58  ;;  %v3919_v44 = vadd.f32 %v3918_v5, %v3917_v46  ;;  %3708 = vst [vmem:[%s7581_s22 + $0x8] sm:$0xff] %v3670_v36   ;;  %v3082_v12 = vmul.f32 1.442695, %v3054_v17  ;;  %v3995_v48 = vadd.f32 %v3994_v9, %v3993_v11 }
 0x299   : > { %v3920_v14 = vpop.f32.mrf.mxu0  ;;  %v3996_v50 = vpop.f32.mrf.mxu1  ;;  %v3126_v33 = vmul.f32 1.6732632, %v3604_v60  ;;  %v3163_v59 = vmul.f32 1.050701, %v3144_v56 }
 0x29a   : > { %v3055_v32 = vmin.f32 %v7595_v55, 0.0  ;;  %v2880_v39 = vadd.f32 %v3919_v44, %v7516_v57  ;;  %4199 = vpow2.f32 %v3082_v12  ;;  %vm3036_vm10 = vcmp.gt.f32.partialorder %v7595_v55, 0.0 }
 0x29b   : > { %v3921_v54 = vpop.f32.mrf.mxu0  ;;  %v3997_v38 = vpop.f32.mrf.mxu1  ;;  %v3145_v42 = vsel %vm3031_vm5, %v7560_v27, %v3126_v33 }
 0x29c   : > { %v4194_v16 = vpop.eup %4193  ;;  %v3084_v15 = vmul.f32 1.442695, %v3055_v32  ;;  %v7603_v51 = vadd.f32 %v3995_v48, %v2880_v39  ;;  %v3922_v10 = vadd.f32 %v3921_v54, %v3920_v14  ;;  %v3164_v3 = vmul.f32 1.050701, %v3145_v42 }
 0x29d   : > { %v3605_v25 = vadd.f32 -1.0, %v4194_v16  ;;  %v3923_v52 = vpop.f32.mrf.mxu0  ;;  %v3999_v28 = vpop.f32.mrf.mxu1  ;;  %v3998_v63 = vadd.f32 %v3997_v38, %v3996_v50 }
 0x29e   : > { %4201 = vpow2.f32 %v3084_v15  ;;  %v3056_v57 = vmin.f32 %v7603_v51, 0.0  ;;  %v2885_v13 = vadd.f32 %v3922_v10, %v7519_v22  ;;  %v3675_v35 = vpack.c.bf16 %v3164_v3, %v3163_v59 }
 0x29f   : > { %v4196_v49 = vpop.eup %4195  ;;  %v3127_v4 = vmul.f32 1.6732632, %v3605_v25  ;;  %v3924_v27 = vpop.f32.mrf.mxu0  ;;  %vm3037_vm11 = vcmp.gt.f32.partialorder %v7603_v51, 0.0 }
 0x2a0   : > { %v3606_v19 = vadd.f32 -1.0, %v4196_v49  ;;  %v3086_v45 = vmul.f32 1.442695, %v3056_v57  ;;  %v7607_v53 = vadd.f32 %v3998_v63, %v2885_v13  ;;  %v3925_v34 = vadd.f32 %v3924_v27, %v3923_v52  ;;  %v4000_v61 = vpop.f32.mrf.mxu1  ;;  %3709 = vst [vmem:[%s7581_s22 + $0x10] sm:$0xff] %v3675_v35  }
 0x2a1   : > { %v3146_v31 = vsel %vm3032_vm6, %v7566_v7, %v3127_v4  ;;  %v4001_v21 = vadd.f32 %v4000_v61, %v3999_v28 }
 0x2a2   : > { %v3128_v40 = vmul.f32 1.6732632, %v3606_v19  ;;  %4203 = vpow2.f32 %v3086_v45  ;;  %v3057_v22 = vmin.f32 %v7607_v53, 0.0  ;;  %v2888_v1 = vadd.f32 %v3925_v34, %v7522_v43 }
 0x2a3   : > { %v4198_v26 = vpop.eup %4197  ;;  %v3165_v41 = vmul.f32 1.050701, %v3146_v31  ;;  %vm3038_vm12 = vcmp.gt.f32.partialorder %v7607_v53, 0.0 }
 0x2a4   : > { %v3147_v47 = vsel %vm3033_vm7, %v7573_v23, %v3128_v40  ;;  %v3607_v2 = vadd.f32 -1.0, %v4198_v26  ;;  %v3088_v11 = vmul.f32 1.442695, %v3057_v22  ;;  %v7616_v29 = vadd.f32 %v4001_v21, %v2888_v1 }
 0x2a5   : > { %v3166_v46 = vmul.f32 1.050701, %v3147_v47 }
 0x2a6   : > { %v3129_v58 = vmul.f32 1.6732632, %v3607_v2  ;;  %4205 = vpow2.f32 %v3088_v11  ;;  %v3058_v18 = vmin.f32 %v7616_v29, 0.0  ;;  %v3926_v20 = vpop.f32.mrf.mxu0  ;;  %vm3039_vm13 = vcmp.gt.f32.partialorder %v7616_v29, 0.0 }
 0x2a7   : > { %v3680_v7 = vpack.c.bf16 %v3166_v46, %v3165_v41  ;;  %v4200_v36 = vpop.eup %4199 }
 0x2a8   : > { %v3608_v17 = vadd.f32 -1.0, %v4200_v36  ;;  %v3090_v5 = vmul.f32 1.442695, %v3058_v18  ;;  %v3927_v43 = vpop.f32.mrf.mxu0  ;;  %v3148_v60 = vsel %vm3034_vm8, %v7577_v0, %v3129_v58 }
 0x2a9   : > { %3710 = vst [vmem:[%s7581_s22 + $0x18] sm:$0xff] %v3680_v7   ;;  %v3928_v23 = vadd.f32 %v3927_v43, %v3926_v20  ;;  %v3167_v39 = vmul.f32 1.050701, %v3148_v60 }
 0x2aa   : > { %v3130_v44 = vmul.f32 1.6732632, %v3608_v17  ;;  %4207 = vpow2.f32 %v3090_v5  ;;  %v3929_v56 = vpop.f32.mrf.mxu0  ;;  %v4002_v14 = vpop.f32.mrf.mxu1 }
 0x2ab   : > { %v4202_v9 = vpop.eup %4201  ;;  %v2893_v33 = vadd.f32 %v3928_v23, %v7525_v62 }
 0x2ac   : > { %v3609_v12 = vadd.f32 -1.0, %v4202_v9  ;;  %v3149_v50 = vsel %vm3035_vm9, %v7590_v24, %v3130_v44  ;;  %v3930_v32 = vpop.f32.mrf.mxu0  ;;  %v4003_v38 = vpop.f32.mrf.mxu1 }
 0x2ad   : > { %v3168_v48 = vmul.f32 1.050701, %v3149_v50  ;;  %v3931_v16 = vadd.f32 %v3930_v32, %v3929_v56  ;;  %v4004_v0 = vadd.f32 %v4003_v38, %v4002_v14 }
 0x2ae   : > { %v3131_v54 = vmul.f32 1.6732632, %v3609_v12  ;;  %v4005_v59 = vpop.f32.mrf.mxu1 }
 0x2af   : > { %v4204_v42 = vpop.eup %4203  ;;  %v3685_v15 = vpack.c.bf16 %v3168_v48, %v3167_v39  ;;  %v7627_v25 = vadd.f32 %v4004_v0, %v2893_v33  ;;  %v2896_v62 = vadd.f32 %v3931_v16, %v7528_v8 }
 0x2b0   : > { %v3610_v10 = vadd.f32 -1.0, %v4204_v42  ;;  %v3150_v3 = vsel %vm3036_vm10, %v7595_v55, %v3131_v54  ;;  %v4006_v52 = vpop.f32.mrf.mxu1 }
 0x2b1   : > { %3711 = vst [vmem:[%s7581_s22 + $0x20] sm:$0xff] %v3685_v15   ;;  %v3059_v28 = vmin.f32 %v7627_v25, 0.0  ;;  %v4007_v57 = vadd.f32 %v4006_v52, %v4005_v59  ;;  %v3169_v63 = vmul.f32 1.050701, %v3150_v3  ;;  %vm3040_vm14 = vcmp.gt.f32.partialorder %v7627_v25, 0.0 }
 0x2b2   : > { %v3132_v24 = vmul.f32 1.6732632, %v3610_v10 }
 0x2b3   : > { %v4206_v13 = vpop.eup %4205  ;;  %v3092_v55 = vmul.f32 1.442695, %v3059_v28  ;;  %v3008_v27 = vadd.f32 %v4007_v57, %v2896_v62 }
 0x2b4   : > { %v3151_v49 = vsel %vm3037_vm11, %v7603_v51, %v3132_v24  ;;  %v3611_v4 = vadd.f32 -1.0, %v4206_v13 }
 0x2b5   : > { %v3170_v35 = vmul.f32 1.050701, %v3151_v49  ;;  %4209 = vpow2.f32 %v3092_v55  ;;  %v3060_v34 = vmin.f32 %v3008_v27, 0.0  ;;  %vm3041_vm15 = vcmp.gt.f32.partialorder %v3008_v27, 0.0 }
 0x2b6   : > { %v3133_v45 = vmul.f32 1.6732632, %v3611_v4 }
 0x2b7   : > { %v3690_v19 = vpack.c.bf16 %v3170_v35, %v3169_v63  ;;  %v4208_v8 = vpop.eup %4207  ;;  %v3094_v40 = vmul.f32 1.442695, %v3060_v34 }
 0x2b8   : > { %v3612_v61 = vadd.f32 -1.0, %v4208_v8  ;;  %v3932_v31 = vpop.f32.mrf.mxu0  ;;  %v3152_v26 = vsel %vm3038_vm12, %v7607_v53, %v3133_v45 }
 0x2b9   : > { %3712 = vst [vmem:[%s7581_s22 + $0x28] sm:$0xff] %v3690_v19   ;;  %4211 = vpow2.f32 %v3094_v40  ;;  %v3171_v2 = vmul.f32 1.050701, %v3152_v26 }
 0x2ba   : > { %v3134_v22 = vmul.f32 1.6732632, %v3612_v61  ;;  %v3933_v51 = vpop.f32.mrf.mxu0 }
 0x2bb   : > { %v3934_v1 = vadd.f32 %v3933_v51, %v3932_v31 }
 0x2bc   : > { %v3153_v21 = vsel %vm3039_vm13, %v7616_v29, %v3134_v22  ;;  %v3935_v47 = vpop.f32.mrf.mxu0 }
 0x2bd   : > { %v3172_v41 = vmul.f32 1.050701, %v3153_v21  ;;  %v4008_v46 = vpop.f32.mrf.mxu1  ;;  %v2901_v11 = vadd.f32 %v3934_v1, %v7531_v37 }
 0x2be   : > { %v3936_v7 = vpop.f32.mrf.mxu0 }
 0x2bf   : > { %v3695_v58 = vpack.c.bf16 %v3172_v41, %v3171_v2  ;;  %v4009_v18 = vpop.f32.mrf.mxu1  ;;  %v3937_v20 = vadd.f32 %v3936_v7, %v3935_v47 }
 0x2c0   : > { %v4010_v53 = vadd.f32 %v4009_v18, %v4008_v46 }
 0x2c1   : > { %3713 = vst [vmem:[%s7581_s22 + $0x30] sm:$0xff] %v3695_v58   ;;  %v4011_v36 = vpop.f32.mrf.mxu1  ;;  %v2904_v5 = vadd.f32 %v3937_v20, %v7534_v30 }
 0x2c2   : > { %v3013_v17 = vadd.f32 %v4010_v53, %v2901_v11  ;;  %v4210_v43 = vpop.eup %4209 }
 0x2c3   : > { %v4012_v23 = vpop.f32.mrf.mxu1  ;;  %v3613_v9 = vadd.f32 -1.0, %v4210_v43 }
 0x2c4   : > { %v3061_v29 = vmin.f32 %v3013_v17, 0.0  ;;  %v4013_v60 = vadd.f32 %v4012_v23, %v4011_v36  ;;  %vm3042_vm0 = vcmp.gt.f32.partialorder %v3013_v17, 0.0 }
 0x2c5   : > { %v3938_v44 = vpop.f32.mrf.mxu0  ;;  %v3135_v14 = vmul.f32 1.6732632, %v3613_v9 }
 0x2c6   : > { %v3096_v56 = vmul.f32 1.442695, %v3061_v29  ;;  %v3016_v12 = vadd.f32 %v4013_v60, %v2904_v5  ;;  %v4212_v33 = vpop.eup %4211 }
 0x2c7   : > { %v4014_v37 = vpop.f32.mrf.mxu1  ;;  %v3939_v50 = vpop.f32.mrf.mxu0  ;;  %v3614_v39 = vadd.f32 -1.0, %v4212_v33  ;;  %v3154_v16 = vsel %vm3040_vm14, %v7627_v25, %v3135_v14 }
 0x2c8   : > { %4213 = vpow2.f32 %v3096_v56  ;;  %v3062_v32 = vmin.f32 %v3016_v12, 0.0  ;;  %v3940_v48 = vadd.f32 %v3939_v50, %v3938_v44  ;;  %v3173_v52 = vmul.f32 1.050701, %v3154_v16 }
 0x2c9   : > { %v4015_v54 = vpop.f32.mrf.mxu1  ;;  %v3941_v38 = vpop.f32.mrf.mxu0  ;;  %v3136_v42 = vmul.f32 1.6732632, %v3614_v39  ;;  %vm3043_vm1 = vcmp.gt.f32.partialorder %v3016_v12, 0.0 }
 0x2ca   : > { %v3098_v30 = vmul.f32 1.442695, %v3062_v32  ;;  %v2909_v0 = vadd.f32 %v3940_v48, %v7537_v6  ;;  %v4016_v15 = vadd.f32 %v4015_v54, %v4014_v37 }
 0x2cb   : > { %v4017_v10 = vpop.f32.mrf.mxu1  ;;  %v3942_v59 = vpop.f32.mrf.mxu0  ;;  %v3155_v3 = vsel %vm3041_vm15, %v3008_v27, %v3136_v42 }
 0x2cc   : > { %4215 = vpow2.f32 %v3098_v30  ;;  %v3021_v62 = vadd.f32 %v4016_v15, %v2909_v0  ;;  %v3174_v28 = vmul.f32 1.050701, %v3155_v3 }
 0x2cd   : > { %v4018_v24 = vpop.f32.mrf.mxu1 }
 0x2ce   : > { %v3063_v57 = vmin.f32 %v3021_v62, 0.0  ;;  %v3700_v13 = vpack.c.bf16 %v3174_v28, %v3173_v52  ;;  %vm3044_vm2 = vcmp.gt.f32.partialorder %v3021_v62, 0.0 }
 0x2d0   : > { %v3100_v63 = vmul.f32 1.442695, %v3063_v57  ;;  %3714 = vst [vmem:[%s7581_s22 + $0x38] sm:$0xff] %v3700_v13  }
 0x2d2   : > { %4217 = vpow2.f32 %v3100_v63 }
 0x2d5   : > { %v4214_v25 = vpop.eup %4213 }
 0x2d6   : > { %v3615_v49 = vadd.f32 -1.0, %v4214_v25 }
 0x2d8   : > { %v3137_v6 = vmul.f32 1.6732632, %v3615_v49 }
 0x2d9   : > { %v4216_v35 = vpop.eup %4215 }
 0x2da   : > { %v3616_v4 = vadd.f32 -1.0, %v4216_v35  ;;  %v3156_v55 = vsel %vm3042_vm0, %v3013_v17, %v3137_v6 }
 0x2db   : > { %v3175_v45 = vmul.f32 1.050701, %v3156_v55 }
 0x2dc   : > { %v3138_v27 = vmul.f32 1.6732632, %v3616_v4 }
 0x2de   : > { %v3157_v19 = vsel %vm3043_vm1, %v3016_v12, %v3138_v27 }
 0x2df   : > { %v3176_v8 = vmul.f32 1.050701, %v3157_v19  ;;  %v4218_v34 = vpop.eup %4217 }
 0x2e0   : > { %v3617_v31 = vadd.f32 -1.0, %v4218_v34 }
 0x2e1   : > { %v3705_v61 = vpack.c.bf16 %v3176_v8, %v3175_v45 }
 0x2e2   : > { %v3139_v40 = vmul.f32 1.6732632, %v3617_v31 }
 0x2e3   : > { %3715 = vst [vmem:[%s7581_s22 + $0x40] sm:$0xff] %v3705_v61  }
 0x2e4   : > { %v3158_v26 = vsel %vm3044_vm2, %v3021_v62, %v3139_v40 }
 0x2e5   : > { %v3177_v22 = vmul.f32 1.050701, %v3158_v26 }
 0x2e7   : > { %v3660_v51 = vpack.c.bf16 %v3177_v22, %v3177_v22 }
 0x2e9   : > { %3273 = vst [vmem:[%s7581_s22 + $0x48] sm:$0xf] %v3660_v51 }
 0x2ea   : > { %4234 = shalt.err (!%p4231_p8)
}
 0x2eb   : > { %s4235_s25 = scalar_lea.hbm %s7652_s5, 1216  ;;  %s4239_s13 = scalar_lea.hbm %s7702_s4, 2432 }
 0x2ec   : > { %p4236_p12 = scmp.ne.s32.totalorder %s7652_s5, %s4235_s25  ;;  %p4240_p1 = scmp.lt.s32.totalorder %s7652_s5, %s7702_s4 }
 0x2ed   : > { %p4241_p2 = scmp.lt.s32.totalorder %s4239_s13, %s4235_s25 }
 0x2ee   : > { %p4237_p13 = pnand %p4236_p12, %p4372_p9 }
 0x2ef   : > { %p4242_p3 = por %p4241_p2, %p4240_p1 }
 0x2f0   : > { %p4238_p0 = pneg %p4237_p13 }
 0x2f2   : > { %p4243_p4 = pnand %p4242_p3, %p4238_p0 }
 0x2f4   : > { %4246 = shalt.err (!%p4243_p4)
}
 0x2f5   : > { %s4297_s22 = smov 64   ;;  %s4298_s26 = smov 4  }
 0x2f6   : > { %4032 = dma.vmem_to_hbm [thread:$0]  (%p4372_p9), %s7654_s23, 1216, %s7652_s5, %s3275_s7, %s4297_s22, %s4297_s22, %s4298_s26  }
 0x2f7 PF: > { %s3303_s30 = sand.u32 1, %s4273_s15   ;;  %p4035_p5 = pnand %p3375_p11, %p4376_p10 }
 0x2f8   : > { %s3304_s6 = scalar_lea.sflag [#allocation4], %s3303_s30 }
 0x2f9   : > { %p4036_p6 = pneg %p4035_p5 }
 0x2fb   : > { %4268 = dma.done.wait (%p4036_p6), %s3304_s6, 1216  }
 0x2fc   : > { %4270 = vsyncadd (%p4036_p6), %s3304_s6, 4294966080  ;;  %p17_p7 = scmp.ge.s32.totalorder %s4349_s21, 4   ;;  %s8698_s15 = smov %s4277_s16 }
 0x2fd   : > { %s8699_s16 = smov %s4281_s17  ;;  %s8700_s17 = smov %s4361_s24 }
 0x2fe   : > { %s8701_s18 = smov %s4349_s21  ;;  %19 = sbr.rel (!%p17_p7) target bundleno = 5 (0x5), region = 91 }
 0x303   :  { %3309 = vsyncpa [#allocation3], 1 }
 0x304   :  { %3311 = vsyncpa [#allocation3 + $0x1], 1 }
 0x305   :  { %3312 = vsyncpa [#allocation4], 1 }
 0x306   :  { %3314 = vsyncpa [#allocation4 + $0x1], 1 }

</bundles_post_ra>
